<compile_context>
chip_gen: v5e
topology: v5e:2x2
jax: 0.10.0
libtpu: 0.0.40
codegen_flags: <defaults>
</compile_context>

<pallas_src>
import functools
import math

import jax
import jax.numpy as jnp
from jax.experimental import pallas as pl
from jax.experimental.pallas import tpu as pltpu

LEAKY_SLOPE = 0.01   # F.leaky_relu default
BN_EPS = 1e-5        # BatchNorm1d default eps
DEG_EPS = 1e-6


def _leaky_relu(x):
    return jnp.where(x > 0, x, LEAKY_SLOPE * x)


def _bn_from_stats(h, sum_all, sq_all, gb, count):
    """Finish training-mode BatchNorm1d given per-channel sum / sum-of-squares."""
    mean = sum_all / count                      # (1, C)
    var = sq_all / count - mean * mean          # (1, C) biased variance
    inv = jax.lax.rsqrt(var + BN_EPS)
    return (h - mean) * (inv * gb[0:1, :]) + gb[1:2, :]


def _sage_core(x, adj, w1, w2a, w2b):
    """One GraphSAGELayer up to (but not including) the batch norm."""
    xh = _leaky_relu(jnp.dot(x, w1, preferred_element_type=jnp.float32))   # (N, H)
    deg = jnp.sum(adj, axis=-1, keepdims=True) + DEG_EPS                   # (N, 1)
    agg = jnp.dot(adj, xh, preferred_element_type=jnp.float32) / deg       # (N, H)
    pre = jnp.dot(xh, w2a, preferred_element_type=jnp.float32)
    pre = pre + jnp.dot(agg, w2b, preferred_element_type=jnp.float32)
    return _leaky_relu(pre)                                                # (N, C)


# ------------------------------- kernels -------------------------------------
def _sage_first_kernel(x_ref, adj_ref, w1_ref, w2a_ref, w2b_ref,
                       h_ref, sum_ref, sq_ref):
    pre = _sage_core(x_ref[0], adj_ref[0], w1_ref[...], w2a_ref[...], w2b_ref[...])
    h_ref[0] = pre
    sum_ref[0] = jnp.sum(pre, axis=0, keepdims=True)
    sq_ref[0] = jnp.sum(pre * pre, axis=0, keepdims=True)


def _sage_next_kernel(hprev_ref, psum_ref, psq_ref, gb_ref,
                      adj_ref, w1_ref, w2a_ref, w2b_ref,
                      h_ref, sum_ref, sq_ref, *, count):
    # Finish the previous layer's BatchNorm (stats over all batches & nodes).
    s = jnp.sum(psum_ref[...], axis=0)       # (1, Cp)
    q = jnp.sum(psq_ref[...], axis=0)        # (1, Cp)
    x = _bn_from_stats(hprev_ref[0], s, q, gb_ref[...], count)
    pre = _sage_core(x, adj_ref[0], w1_ref[...], w2a_ref[...], w2b_ref[...])
    h_ref[0] = pre
    sum_ref[0] = jnp.sum(pre, axis=0, keepdims=True)
    sq_ref[0] = jnp.sum(pre * pre, axis=0, keepdims=True)


def _ff_head_kernel(h1_ref, h2_ref, h3_ref,
                    s1_ref, q1_ref, s2_ref, q2_ref, s3_ref, q3_ref,
                    gb1_ref, gb2_ref, gb3_ref,
                    wa_ref, wb_ref, wc_ref, b1_ref,
                    w2_ref, b2_ref, w3_ref, b3_ref,
                    sa_ref, sb_ref, sc_ref, bs_ref,
                    out_ref, *, count):
    def finish_bn(h_r, s_r, q_r, gb_r):
        s = jnp.sum(s_r[...], axis=0)
        q = jnp.sum(q_r[...], axis=0)
        return _bn_from_stats(h_r[0], s, q, gb_r[...], count)

    h1 = finish_bn(h1_ref, s1_ref, q1_ref, gb1_ref)   # (N, H)
    h2 = finish_bn(h2_ref, s2_ref, q2_ref, gb2_ref)   # (N, H)
    h3 = finish_bn(h3_ref, s3_ref, q3_ref, gb3_ref)   # (N, H)

    # FF block: 3x (Linear + ReLU); first Linear split over [h1 | h2 | h3].
    y = (jnp.dot(h1, wa_ref[...], preferred_element_type=jnp.float32)
         + jnp.dot(h2, wb_ref[...], preferred_element_type=jnp.float32)
         + jnp.dot(h3, wc_ref[...], preferred_element_type=jnp.float32)
         + b1_ref[...])
    y = jnp.maximum(y, 0.0)
    y = jnp.maximum(
        jnp.dot(y, w2_ref[...], preferred_element_type=jnp.float32) + b2_ref[...], 0.0)
    y = jnp.maximum(
        jnp.dot(y, w3_ref[...], preferred_element_type=jnp.float32) + b3_ref[...], 0.0)

    # Linear shortcut (also split over the concat).
    short = (jnp.dot(h1, sa_ref[...], preferred_element_type=jnp.float32)
             + jnp.dot(h2, sb_ref[...], preferred_element_type=jnp.float32)
             + jnp.dot(h3, sc_ref[...], preferred_element_type=jnp.float32)
             + bs_ref[...])

    out = y + short                                       # (N, 3H)
    out_ref[0] = jnp.mean(out, axis=0, keepdims=True)     # mean over nodes -> (1, 3H)


# ------------------------------- wrappers -------------------------------------
def sage_first_call(x, adj, w1, w2a, w2b):
    B, N, Din = x.shape
    H = w1.shape[1]
    C = w2a.shape[1]
    return pl.pallas_call(
        _sage_first_kernel,
        out_shape=(jax.ShapeDtypeStruct((B, N, C), jnp.float32),
                   jax.ShapeDtypeStruct((B, 1, C), jnp.float32),
                   jax.ShapeDtypeStruct((B, 1, C), jnp.float32)),
        grid=(B,),
        in_specs=[
            pl.BlockSpec((1, N, Din), lambda b: (b, 0, 0)),
            pl.BlockSpec((1, N, N), lambda b: (b, 0, 0)),
            pl.BlockSpec((Din, H), lambda b: (0, 0)),
            pl.BlockSpec((H, C), lambda b: (0, 0)),
            pl.BlockSpec((H, C), lambda b: (0, 0)),
        ],
        out_specs=(
            pl.BlockSpec((1, N, C), lambda b: (b, 0, 0)),
            pl.BlockSpec((1, 1, C), lambda b: (b, 0, 0)),
            pl.BlockSpec((1, 1, C), lambda b: (b, 0, 0)),
        ),
        compiler_params=pltpu.CompilerParams(dimension_semantics=("parallel",)),
    )(x, adj, w1, w2a, w2b)


def sage_next_call(h_prev, psum, psq, gb_prev, adj, w1, w2a, w2b, count):
    B, N, Cp = h_prev.shape
    H = w1.shape[1]
    C = w2a.shape[1]
    kernel = functools.partial(_sage_next_kernel, count=count)
    return pl.pallas_call(
        kernel,
        out_shape=(jax.ShapeDtypeStruct((B, N, C), jnp.float32),
                   jax.ShapeDtypeStruct((B, 1, C), jnp.float32),
                   jax.ShapeDtypeStruct((B, 1, C), jnp.float32)),
        grid=(B,),
        in_specs=[
            pl.BlockSpec((1, N, Cp), lambda b: (b, 0, 0)),
            pl.BlockSpec((B, 1, Cp), lambda b: (0, 0, 0)),
            pl.BlockSpec((B, 1, Cp), lambda b: (0, 0, 0)),
            pl.BlockSpec((2, Cp), lambda b: (0, 0)),
            pl.BlockSpec((1, N, N), lambda b: (b, 0, 0)),
            pl.BlockSpec((Cp, H), lambda b: (0, 0)),
            pl.BlockSpec((H, C), lambda b: (0, 0)),
            pl.BlockSpec((H, C), lambda b: (0, 0)),
        ],
        out_specs=(
            pl.BlockSpec((1, N, C), lambda b: (b, 0, 0)),
            pl.BlockSpec((1, 1, C), lambda b: (b, 0, 0)),
            pl.BlockSpec((1, 1, C), lambda b: (b, 0, 0)),
        ),
        compiler_params=pltpu.CompilerParams(dimension_semantics=("parallel",)),
    )(h_prev, psum, psq, gb_prev, adj, w1, w2a, w2b)


def ff_head_call(h1, s1, q1, gb1, h2, s2, q2, gb2, h3, s3, q3, gb3, ff, count):
    B, N, H = h1.shape
    (w1, b1), (w2, b2), (w3, b3), (ws, bs) = ff["w1"], ff["w2"], ff["w3"], ff["ws"]
    D = w1.shape[1]                              # 3 * hid_dim
    wa, wb, wc = w1[:H], w1[H:2 * H], w1[2 * H:]
    sa, sb, sc = ws[:H], ws[H:2 * H], ws[2 * H:]
    kernel = functools.partial(_ff_head_kernel, count=count)

    def batch3(shape):
        return pl.BlockSpec((1,) + shape[1:], lambda b: (b, 0, 0))

    def full3(shape):
        return pl.BlockSpec(shape, lambda b: (0, 0, 0))

    def full2(shape):
        return pl.BlockSpec(shape, lambda b: (0, 0))

    out = pl.pallas_call(
        kernel,
        out_shape=jax.ShapeDtypeStruct((B, 1, D), jnp.float32),
        grid=(B,),
        in_specs=[
            batch3(h1.shape), batch3(h2.shape), batch3(h3.shape),
            full3(s1.shape), full3(q1.shape),
            full3(s2.shape), full3(q2.shape),
            full3(s3.shape), full3(q3.shape),
            full2(gb1.shape), full2(gb2.shape), full2(gb3.shape),
            full2(wa.shape), full2(wb.shape), full2(wc.shape), full2(b1.shape),
            full2(w2.shape), full2(b2.shape), full2(w3.shape), full2(b3.shape),
            full2(sa.shape), full2(sb.shape), full2(sc.shape), full2(bs.shape),
        ],
        out_specs=pl.BlockSpec((1, 1, D), lambda b: (b, 0, 0)),
        compiler_params=pltpu.CompilerParams(dimension_semantics=("parallel",)),
    )(h1, h2, h3, s1, q1, s2, q2, s3, q3, gb1, gb2, gb3,
      wa, wb, wc, b1, w2, b2, w3, b3, sa, sb, sc, bs)
    return out[:, 0, :]


def graphsage_forward(inp, adj, params):
    inp = jnp.asarray(inp, jnp.float32)
    adj = jnp.asarray(adj, jnp.float32)          # matches adj.float() in torch
    B, N, _ = inp.shape
    count = float(B * N)                         # BatchNorm1d stats over (batch, nodes)
    s1p, s2p, s3p = params["sage"]

    def split_w2(w2):
        h = w2.shape[0] // 2
        return w2[:h], w2[h:]

    w2a1, w2b1 = split_w2(s1p["w2"])
    w2a2, w2b2 = split_w2(s2p["w2"])
    w2a3, w2b3 = split_w2(s3p["w2"])

    h1, sum1, sq1 = sage_first_call(inp, adj, s1p["w1"], w2a1, w2b1)
    h2, sum2, sq2 = sage_next_call(h1, sum1, sq1, s1p["gb"], adj,
                                   s2p["w1"], w2a2, w2b2, count)
    h3, sum3, sq3 = sage_next_call(h2, sum2, sq2, s2p["gb"], adj,
                                   s3p["w1"], w2a3, w2b3, count)

    return ff_head_call(h1, sum1, sq1, s1p["gb"],
                        h2, sum2, sq2, s2p["gb"],
                        h3, sum3, sq3, s3p["gb"],
                        params["ff"], count)


# ------------------------------- reference ------------------------------------
def graphsage_reference(inp, adj, params):
    inp = jnp.asarray(inp, jnp.float32)
    adj = jnp.asarray(adj, jnp.float32)

    def bn(h, gb):
        mean = jnp.mean(h, axis=(0, 1), keepdims=True)
        var = jnp.mean(jnp.square(h), axis=(0, 1), keepdims=True) - mean * mean
        return (h - mean) * jax.lax.rsqrt(var + BN_EPS) * gb[0] + gb[1]

    def sage(x, p):
        xh = _leaky_relu(x @ p["w1"])
        deg = jnp.sum(adj, axis=-1, keepdims=True) + DEG_EPS
        agg = (adj @ xh) / deg
        h = _leaky_relu(jnp.concatenate([xh, agg], axis=-1) @ p["w2"])
        return bn(h, p["gb"])

    h1 = sage(inp, params["sage"][0])
    h2 = sage(h1, params["sage"][1])
    h3 = sage(h2, params["sage"][2])
    cat = jnp.concatenate([h1, h2, h3], axis=-1)
    ff = params["ff"]
    y = jnp.maximum(cat @ ff["w1"][0] + ff["w1"][1], 0.0)
    y = jnp.maximum(y @ ff["w2"][0] + ff["w2"][1], 0.0)
    y = jnp.maximum(y @ ff["w3"][0] + ff["w3"][1], 0.0)
    short = cat @ ff["ws"][0] + ff["ws"][1]
    return (y + short).mean(axis=1)


# --------------------------------- init ---------------------------------------
def init_graphsage_params(key, inp_dim, hid_dim, out_dim):
    def xavier(k, shape):
        bound = math.sqrt(6.0 / (shape[0] + shape[1]))
        return jax.random.uniform(k, shape, jnp.float32, -bound, bound)

    def bn_params(c):  # (2, C): row 0 = gamma (1s), row 1 = beta (0s) — torch defaults
        return jnp.concatenate([jnp.ones((1, c), jnp.float32),
                                jnp.zeros((1, c), jnp.float32)], axis=0)

    def linear(k, din, dout):  # nn.Linear default init, weight stored (in, out)
        kw, kb = jax.random.split(k)
        bound = 1.0 / math.sqrt(din)
        w = jax.random.uniform(kw, (din, dout), jnp.float32, -bound, bound)
        b = jax.random.uniform(kb, (1, dout), jnp.float32, -bound, bound)
        return w, b

    sage = []
    layer_dims = [(inp_dim, hid_dim, hid_dim),
                  (hid_dim, hid_dim, hid_dim),
                  (hid_dim, hid_dim, out_dim)]
    for din, dh, dout in layer_dims:
        key, k1, k2 = jax.random.split(key, 3)
        sage.append({"w1": xavier(k1, (din, dh)),
                     "w2": xavier(k2, (2 * dh, dout)),
                     "gb": bn_params(dout)})

    d = 3 * hid_dim  # FF width; torch module requires out_dim == hid_dim here
    key, k1, k2, k3, k4 = jax.random.split(key, 5)
    ff = {"w1": linear(k1, d, d), "w2": linear(k2, d, d),
          "w3": linear(k3, d, d), "ws": linear(k4, d, d)}
    return {"sage": sage, "ff": ff}


# --------------------------------- main ----------------------------------------
if __name__ == "__main__":
    jax.config.update("jax_default_matmul_precision", "highest")
    key = jax.random.PRNGKey(0)
    B, N, inp_dim, hid_dim, out_dim = 2, 16, 16, 32, 32  # out_dim == hid_dim (module requires it)

    kx, ka, kp = jax.random.split(key, 3)
    inp = jax.random.normal(kx, (B, N, inp_dim), jnp.float32)
    adj = jax.random.bernoulli(ka, 0.4, (B, N, N)).astype(jnp.float32)
    params = init_graphsage_params(kp, inp_dim, hid_dim, out_dim)

    fwd = jax.jit(graphsage_forward)
    out = fwd(inp, adj, params)
    jax.block_until_ready(out)

    ref = graphsage_reference(inp, adj, params)
    assert out.shape == (B, 3 * hid_dim), out.shape
    assert jnp.allclose(out, ref, atol=2e-3, rtol=2e-3), float(jnp.max(jnp.abs(out - ref)))

    print("KERNEL_OK")
</pallas_src>

<mosaic_0001>
module attributes {stable_mosaic.version = 11 : i64} {
  func.func @_sage_first_kernel(%arg0: i32, %arg1: memref<1x16x16xf32, #tpu.memory_space<vmem>>, %arg2: memref<1x16x16xf32, #tpu.memory_space<vmem>>, %arg3: memref<16x32xf32, #tpu.memory_space<vmem>>, %arg4: memref<32x32xf32, #tpu.memory_space<vmem>>, %arg5: memref<32x32xf32, #tpu.memory_space<vmem>>, %arg6: memref<1x16x32xf32, #tpu.memory_space<vmem>>, %arg7: memref<1x1x32xf32, #tpu.memory_space<vmem>>, %arg8: memref<1x1x32xf32, #tpu.memory_space<vmem>>) attributes {dimension_semantics = [#tpu.dimension_semantics<parallel>], iteration_bounds = array<i64: 2>, scalar_prefetch = 0 : i64, scratch_operands = 0 : i64, tpu.core_type = #tpu.core_type<tc>, window_params = [{transform_indices = @transform_0, window_bounds = array<i64: 1, 16, 16>}, {transform_indices = @transform_1, window_bounds = array<i64: 1, 16, 16>}, {pipeline_mode = #tpu.pipeline_mode<synchronous>, transform_indices = @transform_2, window_bounds = array<i64: 16, 32>}, {pipeline_mode = #tpu.pipeline_mode<synchronous>, transform_indices = @transform_3, window_bounds = array<i64: 32, 32>}, {pipeline_mode = #tpu.pipeline_mode<synchronous>, transform_indices = @transform_4, window_bounds = array<i64: 32, 32>}, {transform_indices = @transform_5, window_bounds = array<i64: 1, 16, 32>}, {transform_indices = @transform_6, window_bounds = array<i64: 1, 1, 32>}, {transform_indices = @transform_7, window_bounds = array<i64: 1, 1, 32>}]} {
    %c0 = arith.constant 0 : index
    %c0_0 = arith.constant 0 : index
    %c0_1 = arith.constant 0 : index
    %0 = vector.load %arg1[%c0, %c0_0, %c0_1] : memref<1x16x16xf32, #tpu.memory_space<vmem>>, vector<1x16x16xf32>
    %1 = vector.shape_cast %0 : vector<1x16x16xf32> to vector<16x16xf32>
    %c0_2 = arith.constant 0 : index
    %c0_3 = arith.constant 0 : index
    %c0_4 = arith.constant 0 : index
    %2 = vector.load %arg2[%c0_2, %c0_3, %c0_4] : memref<1x16x16xf32, #tpu.memory_space<vmem>>, vector<1x16x16xf32>
    %3 = vector.shape_cast %2 : vector<1x16x16xf32> to vector<16x16xf32>
    %c0_5 = arith.constant 0 : index
    %c0_6 = arith.constant 0 : index
    %4 = vector.load %arg3[%c0_5, %c0_6] : memref<16x32xf32, #tpu.memory_space<vmem>>, vector<16x32xf32>
    %c0_7 = arith.constant 0 : index
    %c0_8 = arith.constant 0 : index
    %5 = vector.load %arg4[%c0_7, %c0_8] : memref<32x32xf32, #tpu.memory_space<vmem>>, vector<32x32xf32>
    %c0_9 = arith.constant 0 : index
    %c0_10 = arith.constant 0 : index
    %6 = vector.load %arg5[%c0_9, %c0_10] : memref<32x32xf32, #tpu.memory_space<vmem>>, vector<32x32xf32>
    %cst = arith.constant dense<0.000000e+00> : vector<16x32xf32>
    %7 = tpu.matmul %1, %4, %cst {dimension_numbers = #tpu.dot_dimension_numbers<[1], [0], [0], [1], [0, 0, 1, 1], [], []>, precision = #tpu.contract_precision<fp32>} : vector<16x16xf32>, vector<16x32xf32>, vector<16x32xf32> -> vector<16x32xf32>
    %cst_11 = arith.constant 0.000000e+00 : f32
    %8 = vector.broadcast %cst_11 : f32 to vector<16x32xf32>
    %9 = arith.cmpf ogt, %7, %8 : vector<16x32xf32>
    %cst_12 = arith.constant 0.00999999977 : f32
    %10 = vector.broadcast %cst_12 : f32 to vector<16x32xf32>
    %11 = arith.mulf %10, %7 : vector<16x32xf32>
    %12 = arith.select %9, %7, %11 : vector<16x32xi1>, vector<16x32xf32>
    %cst_13 = arith.constant dense<0.000000e+00> : vector<16xf32>
    %13 = vector.multi_reduction <add>, %3, %cst_13 [1] : vector<16x16xf32> to vector<16xf32>
    %14 = vector.shape_cast %13 : vector<16xf32> to vector<16x1xf32>
    %cst_14 = arith.constant 9.99999997E-7 : f32
    %15 = vector.broadcast %cst_14 : f32 to vector<16x1xf32>
    %16 = arith.addf %14, %15 : vector<16x1xf32>
    %cst_15 = arith.constant dense<0.000000e+00> : vector<16x32xf32>
    %17 = tpu.matmul %3, %12, %cst_15 {dimension_numbers = #tpu.dot_dimension_numbers<[1], [0], [0], [1], [0, 0, 1, 1], [], []>, precision = #tpu.contract_precision<fp32>} : vector<16x16xf32>, vector<16x32xf32>, vector<16x32xf32> -> vector<16x32xf32>
    %18 = vector.broadcast %16 : vector<16x1xf32> to vector<16x32xf32>
    %19 = arith.divf %17, %18 : vector<16x32xf32>
    %cst_16 = arith.constant dense<0.000000e+00> : vector<16x32xf32>
    %20 = tpu.matmul %12, %5, %cst_16 {dimension_numbers = #tpu.dot_dimension_numbers<[1], [0], [0], [1], [0, 0, 1, 1], [], []>, precision = #tpu.contract_precision<fp32>} : vector<16x32xf32>, vector<32x32xf32>, vector<16x32xf32> -> vector<16x32xf32>
    %cst_17 = arith.constant dense<0.000000e+00> : vector<16x32xf32>
    %21 = tpu.matmul %19, %6, %cst_17 {dimension_numbers = #tpu.dot_dimension_numbers<[1], [0], [0], [1], [0, 0, 1, 1], [], []>, precision = #tpu.contract_precision<fp32>} : vector<16x32xf32>, vector<32x32xf32>, vector<16x32xf32> -> vector<16x32xf32>
    %22 = arith.addf %20, %21 : vector<16x32xf32>
    %cst_18 = arith.constant 0.000000e+00 : f32
    %23 = vector.broadcast %cst_18 : f32 to vector<16x32xf32>
    %24 = arith.cmpf ogt, %22, %23 : vector<16x32xf32>
    %cst_19 = arith.constant 0.00999999977 : f32
    %25 = vector.broadcast %cst_19 : f32 to vector<16x32xf32>
    %26 = arith.mulf %25, %22 : vector<16x32xf32>
    %27 = arith.select %24, %22, %26 : vector<16x32xi1>, vector<16x32xf32>
    %c0_20 = arith.constant 0 : index
    %c0_21 = arith.constant 0 : index
    %c0_22 = arith.constant 0 : index
    %28 = vector.load %arg6[%c0_20, %c0_21, %c0_22] : memref<1x16x32xf32, #tpu.memory_space<vmem>>, vector<1x16x32xf32>
    %29 = vector.shape_cast %28 : vector<1x16x32xf32> to vector<16x32xf32>
    %30 = vector.shape_cast %27 : vector<16x32xf32> to vector<1x16x32xf32>
    tpu.vector_store %arg6[%c0_20, %c0_21, %c0_22], %30 {strides = array<i32>} : memref<1x16x32xf32, #tpu.memory_space<vmem>>, vector<1x16x32xf32>,
    %cst_23 = arith.constant dense<0.000000e+00> : vector<32xf32>
    %31 = vector.multi_reduction <add>, %27, %cst_23 [0] : vector<16x32xf32> to vector<32xf32>
    %32 = vector.shape_cast %31 : vector<32xf32> to vector<1x32xf32>
    %c0_24 = arith.constant 0 : index
    %c0_25 = arith.constant 0 : index
    %c0_26 = arith.constant 0 : index
    %33 = vector.load %arg7[%c0_24, %c0_25, %c0_26] : memref<1x1x32xf32, #tpu.memory_space<vmem>>, vector<1x1x32xf32>
    %34 = vector.shape_cast %33 : vector<1x1x32xf32> to vector<1x32xf32>
    %35 = vector.shape_cast %32 : vector<1x32xf32> to vector<1x1x32xf32>
    tpu.vector_store %arg7[%c0_24, %c0_25, %c0_26], %35 {strides = array<i32>} : memref<1x1x32xf32, #tpu.memory_space<vmem>>, vector<1x1x32xf32>,
    %36 = arith.mulf %27, %27 : vector<16x32xf32>
    %cst_27 = arith.constant dense<0.000000e+00> : vector<32xf32>
    %37 = vector.multi_reduction <add>, %36, %cst_27 [0] : vector<16x32xf32> to vector<32xf32>
    %38 = vector.shape_cast %37 : vector<32xf32> to vector<1x32xf32>
    %c0_28 = arith.constant 0 : index
    %c0_29 = arith.constant 0 : index
    %c0_30 = arith.constant 0 : index
    %39 = vector.load %arg8[%c0_28, %c0_29, %c0_30] : memref<1x1x32xf32, #tpu.memory_space<vmem>>, vector<1x1x32xf32>
    %40 = vector.shape_cast %39 : vector<1x1x32xf32> to vector<1x32xf32>
    %41 = vector.shape_cast %38 : vector<1x32xf32> to vector<1x1x32xf32>
    tpu.vector_store %arg8[%c0_28, %c0_29, %c0_30], %41 {strides = array<i32>} : memref<1x1x32xf32, #tpu.memory_space<vmem>>, vector<1x1x32xf32>,
    return
  }
  func.func @transform_0(%arg0: i32) -> (i32, i32, i32) {
    %c0_i32 = arith.constant 0 : i32
    %c0_i32_0 = arith.constant 0 : i32
    %c0_i32_1 = arith.constant 0 : i32
    return %arg0, %c0_i32, %c0_i32_0 : i32, i32, i32
  }
  func.func @transform_1(%arg0: i32) -> (i32, i32, i32) {
    %c0_i32 = arith.constant 0 : i32
    %c0_i32_0 = arith.constant 0 : i32
    %c0_i32_1 = arith.constant 0 : i32
    return %arg0, %c0_i32, %c0_i32_0 : i32, i32, i32
  }
  func.func @transform_2(%arg0: i32) -> (i32, i32) {
    %c0_i32 = arith.constant 0 : i32
    %c0_i32_0 = arith.constant 0 : i32
    %c0_i32_1 = arith.constant 0 : i32
    return %c0_i32, %c0_i32_0 : i32, i32
  }
  func.func @transform_3(%arg0: i32) -> (i32, i32) {
    %c0_i32 = arith.constant 0 : i32
    %c0_i32_0 = arith.constant 0 : i32
    %c0_i32_1 = arith.constant 0 : i32
    return %c0_i32, %c0_i32_0 : i32, i32
  }
  func.func @transform_4(%arg0: i32) -> (i32, i32) {
    %c0_i32 = arith.constant 0 : i32
    %c0_i32_0 = arith.constant 0 : i32
    %c0_i32_1 = arith.constant 0 : i32
    return %c0_i32, %c0_i32_0 : i32, i32
  }
  func.func @transform_5(%arg0: i32) -> (i32, i32, i32) {
    %c0_i32 = arith.constant 0 : i32
    %c0_i32_0 = arith.constant 0 : i32
    %c0_i32_1 = arith.constant 0 : i32
    return %arg0, %c0_i32, %c0_i32_0 : i32, i32, i32
  }
  func.func @transform_6(%arg0: i32) -> (i32, i32, i32) {
    %c0_i32 = arith.constant 0 : i32
    %c0_i32_0 = arith.constant 0 : i32
    %c0_i32_1 = arith.constant 0 : i32
    return %arg0, %c0_i32, %c0_i32_0 : i32, i32, i32
  }
  func.func @transform_7(%arg0: i32) -> (i32, i32, i32) {
    %c0_i32 = arith.constant 0 : i32
    %c0_i32_0 = arith.constant 0 : i32
    %c0_i32_1 = arith.constant 0 : i32
    return %arg0, %c0_i32, %c0_i32_0 : i32, i32, i32
  }
}

module attributes {stable_mosaic.version = 11 : i64} {
  func.func @_sage_next_kernel(%arg0: i32, %arg1: memref<1x16x32xf32, #tpu.memory_space<vmem>>, %arg2: memref<2x1x32xf32, #tpu.memory_space<vmem>>, %arg3: memref<2x1x32xf32, #tpu.memory_space<vmem>>, %arg4: memref<2x32xf32, #tpu.memory_space<vmem>>, %arg5: memref<1x16x16xf32, #tpu.memory_space<vmem>>, %arg6: memref<32x32xf32, #tpu.memory_space<vmem>>, %arg7: memref<32x32xf32, #tpu.memory_space<vmem>>, %arg8: memref<32x32xf32, #tpu.memory_space<vmem>>, %arg9: memref<1x16x32xf32, #tpu.memory_space<vmem>>, %arg10: memref<1x1x32xf32, #tpu.memory_space<vmem>>, %arg11: memref<1x1x32xf32, #tpu.memory_space<vmem>>) attributes {dimension_semantics = [#tpu.dimension_semantics<parallel>], iteration_bounds = array<i64: 2>, scalar_prefetch = 0 : i64, scratch_operands = 0 : i64, tpu.core_type = #tpu.core_type<tc>, window_params = [{transform_indices = @transform_0, window_bounds = array<i64: 1, 16, 32>}, {pipeline_mode = #tpu.pipeline_mode<synchronous>, transform_indices = @transform_1, window_bounds = array<i64: 2, 1, 32>}, {pipeline_mode = #tpu.pipeline_mode<synchronous>, transform_indices = @transform_2, window_bounds = array<i64: 2, 1, 32>}, {pipeline_mode = #tpu.pipeline_mode<synchronous>, transform_indices = @transform_3, window_bounds = array<i64: 2, 32>}, {transform_indices = @transform_4, window_bounds = array<i64: 1, 16, 16>}, {pipeline_mode = #tpu.pipeline_mode<synchronous>, transform_indices = @transform_5, window_bounds = array<i64: 32, 32>}, {pipeline_mode = #tpu.pipeline_mode<synchronous>, transform_indices = @transform_6, window_bounds = array<i64: 32, 32>}, {pipeline_mode = #tpu.pipeline_mode<synchronous>, transform_indices = @transform_7, window_bounds = array<i64: 32, 32>}, {transform_indices = @transform_8, window_bounds = array<i64: 1, 16, 32>}, {transform_indices = @transform_9, window_bounds = array<i64: 1, 1, 32>}, {transform_indices = @transform_10, window_bounds = array<i64: 1, 1, 32>}]} {
    %c0 = arith.constant 0 : index
    %c0_0 = arith.constant 0 : index
    %c0_1 = arith.constant 0 : index
    %0 = vector.load %arg2[%c0, %c0_0, %c0_1] : memref<2x1x32xf32, #tpu.memory_space<vmem>>, vector<2x1x32xf32>
    %cst = arith.constant dense<0.000000e+00> : vector<1x32xf32>
    %1 = vector.multi_reduction <add>, %0, %cst [0] : vector<2x1x32xf32> to vector<1x32xf32>
    %c0_2 = arith.constant 0 : index
    %c0_3 = arith.constant 0 : index
    %c0_4 = arith.constant 0 : index
    %2 = vector.load %arg3[%c0_2, %c0_3, %c0_4] : memref<2x1x32xf32, #tpu.memory_space<vmem>>, vector<2x1x32xf32>
    %cst_5 = arith.constant dense<0.000000e+00> : vector<1x32xf32>
    %3 = vector.multi_reduction <add>, %2, %cst_5 [0] : vector<2x1x32xf32> to vector<1x32xf32>
    %c0_6 = arith.constant 0 : index
    %c0_7 = arith.constant 0 : index
    %c0_8 = arith.constant 0 : index
    %4 = vector.load %arg1[%c0_6, %c0_7, %c0_8] : memref<1x16x32xf32, #tpu.memory_space<vmem>>, vector<1x16x32xf32>
    %5 = vector.shape_cast %4 : vector<1x16x32xf32> to vector<16x32xf32>
    %c0_9 = arith.constant 0 : index
    %c0_10 = arith.constant 0 : index
    %6 = vector.load %arg4[%c0_9, %c0_10] : memref<2x32xf32, #tpu.memory_space<vmem>>, vector<2x32xf32>
    %cst_11 = arith.constant 3.200000e+01 : f32
    %7 = vector.broadcast %cst_11 : f32 to vector<1x32xf32>
    %8 = arith.divf %1, %7 : vector<1x32xf32>
    %cst_12 = arith.constant 3.200000e+01 : f32
    %9 = vector.broadcast %cst_12 : f32 to vector<1x32xf32>
    %10 = arith.divf %3, %9 : vector<1x32xf32>
    %11 = arith.mulf %8, %8 : vector<1x32xf32>
    %12 = arith.subf %10, %11 : vector<1x32xf32>
    %cst_13 = arith.constant 9.99999974E-6 : f32
    %13 = vector.broadcast %cst_13 : f32 to vector<1x32xf32>
    %14 = arith.addf %12, %13 : vector<1x32xf32>
    %15 = math.rsqrt %14 : vector<1x32xf32>
    %16 = vector.broadcast %8 : vector<1x32xf32> to vector<16x32xf32>
    %17 = arith.subf %5, %16 : vector<16x32xf32>
    %18 = vector.extract_strided_slice %6 {offsets = [0, 0], sizes = [1, 32], strides = [1, 1]} : vector<2x32xf32> to vector<1x32xf32>
    %19 = arith.mulf %15, %18 : vector<1x32xf32>
    %20 = vector.broadcast %19 : vector<1x32xf32> to vector<16x32xf32>
    %21 = arith.mulf %17, %20 : vector<16x32xf32>
    %22 = vector.extract_strided_slice %6 {offsets = [1, 0], sizes = [1, 32], strides = [1, 1]} : vector<2x32xf32> to vector<1x32xf32>
    %23 = vector.broadcast %22 : vector<1x32xf32> to vector<16x32xf32>
    %24 = arith.addf %21, %23 : vector<16x32xf32>
    %c0_14 = arith.constant 0 : index
    %c0_15 = arith.constant 0 : index
    %c0_16 = arith.constant 0 : index
    %25 = vector.load %arg5[%c0_14, %c0_15, %c0_16] : memref<1x16x16xf32, #tpu.memory_space<vmem>>, vector<1x16x16xf32>
    %26 = vector.shape_cast %25 : vector<1x16x16xf32> to vector<16x16xf32>
    %c0_17 = arith.constant 0 : index
    %c0_18 = arith.constant 0 : index
    %27 = vector.load %arg6[%c0_17, %c0_18] : memref<32x32xf32, #tpu.memory_space<vmem>>, vector<32x32xf32>
    %c0_19 = arith.constant 0 : index
    %c0_20 = arith.constant 0 : index
    %28 = vector.load %arg7[%c0_19, %c0_20] : memref<32x32xf32, #tpu.memory_space<vmem>>, vector<32x32xf32>
    %c0_21 = arith.constant 0 : index
    %c0_22 = arith.constant 0 : index
    %29 = vector.load %arg8[%c0_21, %c0_22] : memref<32x32xf32, #tpu.memory_space<vmem>>, vector<32x32xf32>
    %cst_23 = arith.constant dense<0.000000e+00> : vector<16x32xf32>
    %30 = tpu.matmul %24, %27, %cst_23 {dimension_numbers = #tpu.dot_dimension_numbers<[1], [0], [0], [1], [0, 0, 1, 1], [], []>, precision = #tpu.contract_precision<fp32>} : vector<16x32xf32>, vector<32x32xf32>, vector<16x32xf32> -> vector<16x32xf32>
    %cst_24 = arith.constant 0.000000e+00 : f32
    %31 = vector.broadcast %cst_24 : f32 to vector<16x32xf32>
    %32 = arith.cmpf ogt, %30, %31 : vector<16x32xf32>
    %cst_25 = arith.constant 0.00999999977 : f32
    %33 = vector.broadcast %cst_25 : f32 to vector<16x32xf32>
    %34 = arith.mulf %33, %30 : vector<16x32xf32>
    %35 = arith.select %32, %30, %34 : vector<16x32xi1>, vector<16x32xf32>
    %cst_26 = arith.constant dense<0.000000e+00> : vector<16xf32>
    %36 = vector.multi_reduction <add>, %26, %cst_26 [1] : vector<16x16xf32> to vector<16xf32>
    %37 = vector.shape_cast %36 : vector<16xf32> to vector<16x1xf32>
    %cst_27 = arith.constant 9.99999997E-7 : f32
    %38 = vector.broadcast %cst_27 : f32 to vector<16x1xf32>
    %39 = arith.addf %37, %38 : vector<16x1xf32>
    %cst_28 = arith.constant dense<0.000000e+00> : vector<16x32xf32>
    %40 = tpu.matmul %26, %35, %cst_28 {dimension_numbers = #tpu.dot_dimension_numbers<[1], [0], [0], [1], [0, 0, 1, 1], [], []>, precision = #tpu.contract_precision<fp32>} : vector<16x16xf32>, vector<16x32xf32>, vector<16x32xf32> -> vector<16x32xf32>
    %41 = vector.broadcast %39 : vector<16x1xf32> to vector<16x32xf32>
    %42 = arith.divf %40, %41 : vector<16x32xf32>
    %cst_29 = arith.constant dense<0.000000e+00> : vector<16x32xf32>
    %43 = tpu.matmul %35, %28, %cst_29 {dimension_numbers = #tpu.dot_dimension_numbers<[1], [0], [0], [1], [0, 0, 1, 1], [], []>, precision = #tpu.contract_precision<fp32>} : vector<16x32xf32>, vector<32x32xf32>, vector<16x32xf32> -> vector<16x32xf32>
    %cst_30 = arith.constant dense<0.000000e+00> : vector<16x32xf32>
    %44 = tpu.matmul %42, %29, %cst_30 {dimension_numbers = #tpu.dot_dimension_numbers<[1], [0], [0], [1], [0, 0, 1, 1], [], []>, precision = #tpu.contract_precision<fp32>} : vector<16x32xf32>, vector<32x32xf32>, vector<16x32xf32> -> vector<16x32xf32>
    %45 = arith.addf %43, %44 : vector<16x32xf32>
    %cst_31 = arith.constant 0.000000e+00 : f32
    %46 = vector.broadcast %cst_31 : f32 to vector<16x32xf32>
    %47 = arith.cmpf ogt, %45, %46 : vector<16x32xf32>
    %cst_32 = arith.constant 0.00999999977 : f32
    %48 = vector.broadcast %cst_32 : f32 to vector<16x32xf32>
    %49 = arith.mulf %48, %45 : vector<16x32xf32>
    %50 = arith.select %47, %45, %49 : vector<16x32xi1>, vector<16x32xf32>
    %c0_33 = arith.constant 0 : index
    %c0_34 = arith.constant 0 : index
    %c0_35 = arith.constant 0 : index
    %51 = vector.load %arg9[%c0_33, %c0_34, %c0_35] : memref<1x16x32xf32, #tpu.memory_space<vmem>>, vector<1x16x32xf32>
    %52 = vector.shape_cast %51 : vector<1x16x32xf32> to vector<16x32xf32>
    %53 = vector.shape_cast %50 : vector<16x32xf32> to vector<1x16x32xf32>
    tpu.vector_store %arg9[%c0_33, %c0_34, %c0_35], %53 {strides = array<i32>} : memref<1x16x32xf32, #tpu.memory_space<vmem>>, vector<1x16x32xf32>,
    %cst_36 = arith.constant dense<0.000000e+00> : vector<32xf32>
    %54 = vector.multi_reduction <add>, %50, %cst_36 [0] : vector<16x32xf32> to vector<32xf32>
    %55 = vector.shape_cast %54 : vector<32xf32> to vector<1x32xf32>
    %c0_37 = arith.constant 0 : index
    %c0_38 = arith.constant 0 : index
    %c0_39 = arith.constant 0 : index
    %56 = vector.load %arg10[%c0_37, %c0_38, %c0_39] : memref<1x1x32xf32, #tpu.memory_space<vmem>>, vector<1x1x32xf32>
    %57 = vector.shape_cast %56 : vector<1x1x32xf32> to vector<1x32xf32>
    %58 = vector.shape_cast %55 : vector<1x32xf32> to vector<1x1x32xf32>
    tpu.vector_store %arg10[%c0_37, %c0_38, %c0_39], %58 {strides = array<i32>} : memref<1x1x32xf32, #tpu.memory_space<vmem>>, vector<1x1x32xf32>,
    %59 = arith.mulf %50, %50 : vector<16x32xf32>
    %cst_40 = arith.constant dense<0.000000e+00> : vector<32xf32>
    %60 = vector.multi_reduction <add>, %59, %cst_40 [0] : vector<16x32xf32> to vector<32xf32>
    %61 = vector.shape_cast %60 : vector<32xf32> to vector<1x32xf32>
    %c0_41 = arith.constant 0 : index
    %c0_42 = arith.constant 0 : index
    %c0_43 = arith.constant 0 : index
    %62 = vector.load %arg11[%c0_41, %c0_42, %c0_43] : memref<1x1x32xf32, #tpu.memory_space<vmem>>, vector<1x1x32xf32>
    %63 = vector.shape_cast %62 : vector<1x1x32xf32> to vector<1x32xf32>
    %64 = vector.shape_cast %61 : vector<1x32xf32> to vector<1x1x32xf32>
    tpu.vector_store %arg11[%c0_41, %c0_42, %c0_43], %64 {strides = array<i32>} : memref<1x1x32xf32, #tpu.memory_space<vmem>>, vector<1x1x32xf32>,
    return
  }
  func.func @transform_0(%arg0: i32) -> (i32, i32, i32) {
    %c0_i32 = arith.constant 0 : i32
    %c0_i32_0 = arith.constant 0 : i32
    %c0_i32_1 = arith.constant 0 : i32
    return %arg0, %c0_i32, %c0_i32_0 : i32, i32, i32
  }
  func.func @transform_1(%arg0: i32) -> (i32, i32, i32) {
    %c0_i32 = arith.constant 0 : i32
    %c0_i32_0 = arith.constant 0 : i32
    %c0_i32_1 = arith.constant 0 : i32
    %c0_i32_2 = arith.constant 0 : i32
    return %c0_i32, %c0_i32_0, %c0_i32_1 : i32, i32, i32
  }
  func.func @transform_2(%arg0: i32) -> (i32, i32, i32) {
    %c0_i32 = arith.constant 0 : i32
    %c0_i32_0 = arith.constant 0 : i32
    %c0_i32_1 = arith.constant 0 : i32
    %c0_i32_2 = arith.constant 0 : i32
    return %c0_i32, %c0_i32_0, %c0_i32_1 : i32, i32, i32
  }
  func.func @transform_3(%arg0: i32) -> (i32, i32) {
    %c0_i32 = arith.constant 0 : i32
    %c0_i32_0 = arith.constant 0 : i32
    %c0_i32_1 = arith.constant 0 : i32
    return %c0_i32, %c0_i32_0 : i32, i32
  }
  func.func @transform_4(%arg0: i32) -> (i32, i32, i32) {
    %c0_i32 = arith.constant 0 : i32
    %c0_i32_0 = arith.constant 0 : i32
    %c0_i32_1 = arith.constant 0 : i32
    return %arg0, %c0_i32, %c0_i32_0 : i32, i32, i32
  }
  func.func @transform_5(%arg0: i32) -> (i32, i32) {
    %c0_i32 = arith.constant 0 : i32
    %c0_i32_0 = arith.constant 0 : i32
    %c0_i32_1 = arith.constant 0 : i32
    return %c0_i32, %c0_i32_0 : i32, i32
  }
  func.func @transform_6(%arg0: i32) -> (i32, i32) {
    %c0_i32 = arith.constant 0 : i32
    %c0_i32_0 = arith.constant 0 : i32
    %c0_i32_1 = arith.constant 0 : i32
    return %c0_i32, %c0_i32_0 : i32, i32
  }
  func.func @transform_7(%arg0: i32) -> (i32, i32) {
    %c0_i32 = arith.constant 0 : i32
    %c0_i32_0 = arith.constant 0 : i32
    %c0_i32_1 = arith.constant 0 : i32
    return %c0_i32, %c0_i32_0 : i32, i32
  }
  func.func @transform_8(%arg0: i32) -> (i32, i32, i32) {
    %c0_i32 = arith.constant 0 : i32
    %c0_i32_0 = arith.constant 0 : i32
    %c0_i32_1 = arith.constant 0 : i32
    return %arg0, %c0_i32, %c0_i32_0 : i32, i32, i32
  }
  func.func @transform_9(%arg0: i32) -> (i32, i32, i32) {
    %c0_i32 = arith.constant 0 : i32
    %c0_i32_0 = arith.constant 0 : i32
    %c0_i32_1 = arith.constant 0 : i32
    return %arg0, %c0_i32, %c0_i32_0 : i32, i32, i32
  }
  func.func @transform_10(%arg0: i32) -> (i32, i32, i32) {
    %c0_i32 = arith.constant 0 : i32
    %c0_i32_0 = arith.constant 0 : i32
    %c0_i32_1 = arith.constant 0 : i32
    return %arg0, %c0_i32, %c0_i32_0 : i32, i32, i32
  }
}

module attributes {stable_mosaic.version = 11 : i64} {
  func.func @_ff_head_kernel(%arg0: i32, %arg1: memref<1x16x32xf32, #tpu.memory_space<vmem>>, %arg2: memref<1x16x32xf32, #tpu.memory_space<vmem>>, %arg3: memref<1x16x32xf32, #tpu.memory_space<vmem>>, %arg4: memref<2x1x32xf32, #tpu.memory_space<vmem>>, %arg5: memref<2x1x32xf32, #tpu.memory_space<vmem>>, %arg6: memref<2x1x32xf32, #tpu.memory_space<vmem>>, %arg7: memref<2x1x32xf32, #tpu.memory_space<vmem>>, %arg8: memref<2x1x32xf32, #tpu.memory_space<vmem>>, %arg9: memref<2x1x32xf32, #tpu.memory_space<vmem>>, %arg10: memref<2x32xf32, #tpu.memory_space<vmem>>, %arg11: memref<2x32xf32, #tpu.memory_space<vmem>>, %arg12: memref<2x32xf32, #tpu.memory_space<vmem>>, %arg13: memref<32x96xf32, #tpu.memory_space<vmem>>, %arg14: memref<32x96xf32, #tpu.memory_space<vmem>>, %arg15: memref<32x96xf32, #tpu.memory_space<vmem>>, %arg16: memref<1x96xf32, #tpu.memory_space<vmem>>, %arg17: memref<96x96xf32, #tpu.memory_space<vmem>>, %arg18: memref<1x96xf32, #tpu.memory_space<vmem>>, %arg19: memref<96x96xf32, #tpu.memory_space<vmem>>, %arg20: memref<1x96xf32, #tpu.memory_space<vmem>>, %arg21: memref<32x96xf32, #tpu.memory_space<vmem>>, %arg22: memref<32x96xf32, #tpu.memory_space<vmem>>, %arg23: memref<32x96xf32, #tpu.memory_space<vmem>>, %arg24: memref<1x96xf32, #tpu.memory_space<vmem>>, %arg25: memref<1x1x96xf32, #tpu.memory_space<vmem>>) attributes {dimension_semantics = [#tpu.dimension_semantics<parallel>], iteration_bounds = array<i64: 2>, scalar_prefetch = 0 : i64, scratch_operands = 0 : i64, tpu.core_type = #tpu.core_type<tc>, window_params = [{transform_indices = @transform_0, window_bounds = array<i64: 1, 16, 32>}, {transform_indices = @transform_1, window_bounds = array<i64: 1, 16, 32>}, {transform_indices = @transform_2, window_bounds = array<i64: 1, 16, 32>}, {pipeline_mode = #tpu.pipeline_mode<synchronous>, transform_indices = @transform_3, window_bounds = array<i64: 2, 1, 32>}, {pipeline_mode = #tpu.pipeline_mode<synchronous>, transform_indices = @transform_4, window_bounds = array<i64: 2, 1, 32>}, {pipeline_mode = #tpu.pipeline_mode<synchronous>, transform_indices = @transform_5, window_bounds = array<i64: 2, 1, 32>}, {pipeline_mode = #tpu.pipeline_mode<synchronous>, transform_indices = @transform_6, window_bounds = array<i64: 2, 1, 32>}, {pipeline_mode = #tpu.pipeline_mode<synchronous>, transform_indices = @transform_7, window_bounds = array<i64: 2, 1, 32>}, {pipeline_mode = #tpu.pipeline_mode<synchronous>, transform_indices = @transform_8, window_bounds = array<i64: 2, 1, 32>}, {pipeline_mode = #tpu.pipeline_mode<synchronous>, transform_indices = @transform_9, window_bounds = array<i64: 2, 32>}, {pipeline_mode = #tpu.pipeline_mode<synchronous>, transform_indices = @transform_10, window_bounds = array<i64: 2, 32>}, {pipeline_mode = #tpu.pipeline_mode<synchronous>, transform_indices = @transform_11, window_bounds = array<i64: 2, 32>}, {pipeline_mode = #tpu.pipeline_mode<synchronous>, transform_indices = @transform_12, window_bounds = array<i64: 32, 96>}, {pipeline_mode = #tpu.pipeline_mode<synchronous>, transform_indices = @transform_13, window_bounds = array<i64: 32, 96>}, {pipeline_mode = #tpu.pipeline_mode<synchronous>, transform_indices = @transform_14, window_bounds = array<i64: 32, 96>}, {pipeline_mode = #tpu.pipeline_mode<synchronous>, transform_indices = @transform_15, window_bounds = array<i64: 1, 96>}, {pipeline_mode = #tpu.pipeline_mode<synchronous>, transform_indices = @transform_16, window_bounds = array<i64: 96, 96>}, {pipeline_mode = #tpu.pipeline_mode<synchronous>, transform_indices = @transform_17, window_bounds = array<i64: 1, 96>}, {pipeline_mode = #tpu.pipeline_mode<synchronous>, transform_indices = @transform_18, window_bounds = array<i64: 96, 96>}, {pipeline_mode = #tpu.pipeline_mode<synchronous>, transform_indices = @transform_19, window_bounds = array<i64: 1, 96>}, {pipeline_mode = #tpu.pipeline_mode<synchronous>, transform_indices = @transform_20, window_bounds = array<i64: 32, 96>}, {pipeline_mode = #tpu.pipeline_mode<synchronous>, transform_indices = @transform_21, window_bounds = array<i64: 32, 96>}, {pipeline_mode = #tpu.pipeline_mode<synchronous>, transform_indices = @transform_22, window_bounds = array<i64: 32, 96>}, {pipeline_mode = #tpu.pipeline_mode<synchronous>, transform_indices = @transform_23, window_bounds = array<i64: 1, 96>}, {transform_indices = @transform_24, window_bounds = array<i64: 1, 1, 96>}]} {
    %c0 = arith.constant 0 : index
    %c0_0 = arith.constant 0 : index
    %c0_1 = arith.constant 0 : index
    %0 = vector.load %arg4[%c0, %c0_0, %c0_1] : memref<2x1x32xf32, #tpu.memory_space<vmem>>, vector<2x1x32xf32>
    %cst = arith.constant dense<0.000000e+00> : vector<1x32xf32>
    %1 = vector.multi_reduction <add>, %0, %cst [0] : vector<2x1x32xf32> to vector<1x32xf32>
    %c0_2 = arith.constant 0 : index
    %c0_3 = arith.constant 0 : index
    %c0_4 = arith.constant 0 : index
    %2 = vector.load %arg5[%c0_2, %c0_3, %c0_4] : memref<2x1x32xf32, #tpu.memory_space<vmem>>, vector<2x1x32xf32>
    %cst_5 = arith.constant dense<0.000000e+00> : vector<1x32xf32>
    %3 = vector.multi_reduction <add>, %2, %cst_5 [0] : vector<2x1x32xf32> to vector<1x32xf32>
    %c0_6 = arith.constant 0 : index
    %c0_7 = arith.constant 0 : index
    %c0_8 = arith.constant 0 : index
    %4 = vector.load %arg1[%c0_6, %c0_7, %c0_8] : memref<1x16x32xf32, #tpu.memory_space<vmem>>, vector<1x16x32xf32>
    %5 = vector.shape_cast %4 : vector<1x16x32xf32> to vector<16x32xf32>
    %c0_9 = arith.constant 0 : index
    %c0_10 = arith.constant 0 : index
    %6 = vector.load %arg10[%c0_9, %c0_10] : memref<2x32xf32, #tpu.memory_space<vmem>>, vector<2x32xf32>
    %cst_11 = arith.constant 3.200000e+01 : f32
    %7 = vector.broadcast %cst_11 : f32 to vector<1x32xf32>
    %8 = arith.divf %1, %7 : vector<1x32xf32>
    %cst_12 = arith.constant 3.200000e+01 : f32
    %9 = vector.broadcast %cst_12 : f32 to vector<1x32xf32>
    %10 = arith.divf %3, %9 : vector<1x32xf32>
    %11 = arith.mulf %8, %8 : vector<1x32xf32>
    %12 = arith.subf %10, %11 : vector<1x32xf32>
    %cst_13 = arith.constant 9.99999974E-6 : f32
    %13 = vector.broadcast %cst_13 : f32 to vector<1x32xf32>
    %14 = arith.addf %12, %13 : vector<1x32xf32>
    %15 = math.rsqrt %14 : vector<1x32xf32>
    %16 = vector.broadcast %8 : vector<1x32xf32> to vector<16x32xf32>
    %17 = arith.subf %5, %16 : vector<16x32xf32>
    %18 = vector.extract_strided_slice %6 {offsets = [0, 0], sizes = [1, 32], strides = [1, 1]} : vector<2x32xf32> to vector<1x32xf32>
    %19 = arith.mulf %15, %18 : vector<1x32xf32>
    %20 = vector.broadcast %19 : vector<1x32xf32> to vector<16x32xf32>
    %21 = arith.mulf %17, %20 : vector<16x32xf32>
    %22 = vector.extract_strided_slice %6 {offsets = [1, 0], sizes = [1, 32], strides = [1, 1]} : vector<2x32xf32> to vector<1x32xf32>
    %23 = vector.broadcast %22 : vector<1x32xf32> to vector<16x32xf32>
    %24 = arith.addf %21, %23 : vector<16x32xf32>
    %c0_14 = arith.constant 0 : index
    %c0_15 = arith.constant 0 : index
    %c0_16 = arith.constant 0 : index
    %25 = vector.load %arg6[%c0_14, %c0_15, %c0_16] : memref<2x1x32xf32, #tpu.memory_space<vmem>>, vector<2x1x32xf32>
    %cst_17 = arith.constant dense<0.000000e+00> : vector<1x32xf32>
    %26 = vector.multi_reduction <add>, %25, %cst_17 [0] : vector<2x1x32xf32> to vector<1x32xf32>
    %c0_18 = arith.constant 0 : index
    %c0_19 = arith.constant 0 : index
    %c0_20 = arith.constant 0 : index
    %27 = vector.load %arg7[%c0_18, %c0_19, %c0_20] : memref<2x1x32xf32, #tpu.memory_space<vmem>>, vector<2x1x32xf32>
    %cst_21 = arith.constant dense<0.000000e+00> : vector<1x32xf32>
    %28 = vector.multi_reduction <add>, %27, %cst_21 [0] : vector<2x1x32xf32> to vector<1x32xf32>
    %c0_22 = arith.constant 0 : index
    %c0_23 = arith.constant 0 : index
    %c0_24 = arith.constant 0 : index
    %29 = vector.load %arg2[%c0_22, %c0_23, %c0_24] : memref<1x16x32xf32, #tpu.memory_space<vmem>>, vector<1x16x32xf32>
    %30 = vector.shape_cast %29 : vector<1x16x32xf32> to vector<16x32xf32>
    %c0_25 = arith.constant 0 : index
    %c0_26 = arith.constant 0 : index
    %31 = vector.load %arg11[%c0_25, %c0_26] : memref<2x32xf32, #tpu.memory_space<vmem>>, vector<2x32xf32>
    %cst_27 = arith.constant 3.200000e+01 : f32
    %32 = vector.broadcast %cst_27 : f32 to vector<1x32xf32>
    %33 = arith.divf %26, %32 : vector<1x32xf32>
    %cst_28 = arith.constant 3.200000e+01 : f32
    %34 = vector.broadcast %cst_28 : f32 to vector<1x32xf32>
    %35 = arith.divf %28, %34 : vector<1x32xf32>
    %36 = arith.mulf %33, %33 : vector<1x32xf32>
    %37 = arith.subf %35, %36 : vector<1x32xf32>
    %cst_29 = arith.constant 9.99999974E-6 : f32
    %38 = vector.broadcast %cst_29 : f32 to vector<1x32xf32>
    %39 = arith.addf %37, %38 : vector<1x32xf32>
    %40 = math.rsqrt %39 : vector<1x32xf32>
    %41 = vector.broadcast %33 : vector<1x32xf32> to vector<16x32xf32>
    %42 = arith.subf %30, %41 : vector<16x32xf32>
    %43 = vector.extract_strided_slice %31 {offsets = [0, 0], sizes = [1, 32], strides = [1, 1]} : vector<2x32xf32> to vector<1x32xf32>
    %44 = arith.mulf %40, %43 : vector<1x32xf32>
    %45 = vector.broadcast %44 : vector<1x32xf32> to vector<16x32xf32>
    %46 = arith.mulf %42, %45 : vector<16x32xf32>
    %47 = vector.extract_strided_slice %31 {offsets = [1, 0], sizes = [1, 32], strides = [1, 1]} : vector<2x32xf32> to vector<1x32xf32>
    %48 = vector.broadcast %47 : vector<1x32xf32> to vector<16x32xf32>
    %49 = arith.addf %46, %48 : vector<16x32xf32>
    %c0_30 = arith.constant 0 : index
    %c0_31 = arith.constant 0 : index
    %c0_32 = arith.constant 0 : index
    %50 = vector.load %arg8[%c0_30, %c0_31, %c0_32] : memref<2x1x32xf32, #tpu.memory_space<vmem>>, vector<2x1x32xf32>
    %cst_33 = arith.constant dense<0.000000e+00> : vector<1x32xf32>
    %51 = vector.multi_reduction <add>, %50, %cst_33 [0] : vector<2x1x32xf32> to vector<1x32xf32>
    %c0_34 = arith.constant 0 : index
    %c0_35 = arith.constant 0 : index
    %c0_36 = arith.constant 0 : index
    %52 = vector.load %arg9[%c0_34, %c0_35, %c0_36] : memref<2x1x32xf32, #tpu.memory_space<vmem>>, vector<2x1x32xf32>
    %cst_37 = arith.constant dense<0.000000e+00> : vector<1x32xf32>
    %53 = vector.multi_reduction <add>, %52, %cst_37 [0] : vector<2x1x32xf32> to vector<1x32xf32>
    %c0_38 = arith.constant 0 : index
    %c0_39 = arith.constant 0 : index
    %c0_40 = arith.constant 0 : index
    %54 = vector.load %arg3[%c0_38, %c0_39, %c0_40] : memref<1x16x32xf32, #tpu.memory_space<vmem>>, vector<1x16x32xf32>
    %55 = vector.shape_cast %54 : vector<1x16x32xf32> to vector<16x32xf32>
    %c0_41 = arith.constant 0 : index
    %c0_42 = arith.constant 0 : index
    %56 = vector.load %arg12[%c0_41, %c0_42] : memref<2x32xf32, #tpu.memory_space<vmem>>, vector<2x32xf32>
    %cst_43 = arith.constant 3.200000e+01 : f32
    %57 = vector.broadcast %cst_43 : f32 to vector<1x32xf32>
    %58 = arith.divf %51, %57 : vector<1x32xf32>
    %cst_44 = arith.constant 3.200000e+01 : f32
    %59 = vector.broadcast %cst_44 : f32 to vector<1x32xf32>
    %60 = arith.divf %53, %59 : vector<1x32xf32>
    %61 = arith.mulf %58, %58 : vector<1x32xf32>
    %62 = arith.subf %60, %61 : vector<1x32xf32>
    %cst_45 = arith.constant 9.99999974E-6 : f32
    %63 = vector.broadcast %cst_45 : f32 to vector<1x32xf32>
    %64 = arith.addf %62, %63 : vector<1x32xf32>
    %65 = math.rsqrt %64 : vector<1x32xf32>
    %66 = vector.broadcast %58 : vector<1x32xf32> to vector<16x32xf32>
    %67 = arith.subf %55, %66 : vector<16x32xf32>
    %68 = vector.extract_strided_slice %56 {offsets = [0, 0], sizes = [1, 32], strides = [1, 1]} : vector<2x32xf32> to vector<1x32xf32>
    %69 = arith.mulf %65, %68 : vector<1x32xf32>
    %70 = vector.broadcast %69 : vector<1x32xf32> to vector<16x32xf32>
    %71 = arith.mulf %67, %70 : vector<16x32xf32>
    %72 = vector.extract_strided_slice %56 {offsets = [1, 0], sizes = [1, 32], strides = [1, 1]} : vector<2x32xf32> to vector<1x32xf32>
    %73 = vector.broadcast %72 : vector<1x32xf32> to vector<16x32xf32>
    %74 = arith.addf %71, %73 : vector<16x32xf32>
    %c0_46 = arith.constant 0 : index
    %c0_47 = arith.constant 0 : index
    %75 = vector.load %arg13[%c0_46, %c0_47] : memref<32x96xf32, #tpu.memory_space<vmem>>, vector<32x96xf32>
    %cst_48 = arith.constant dense<0.000000e+00> : vector<16x96xf32>
    %76 = tpu.matmul %24, %75, %cst_48 {dimension_numbers = #tpu.dot_dimension_numbers<[1], [0], [0], [1], [0, 0, 1, 1], [], []>, precision = #tpu.contract_precision<fp32>} : vector<16x32xf32>, vector<32x96xf32>, vector<16x96xf32> -> vector<16x96xf32>
    %c0_49 = arith.constant 0 : index
    %c0_50 = arith.constant 0 : index
    %77 = vector.load %arg14[%c0_49, %c0_50] : memref<32x96xf32, #tpu.memory_space<vmem>>, vector<32x96xf32>
    %cst_51 = arith.constant dense<0.000000e+00> : vector<16x96xf32>
    %78 = tpu.matmul %49, %77, %cst_51 {dimension_numbers = #tpu.dot_dimension_numbers<[1], [0], [0], [1], [0, 0, 1, 1], [], []>, precision = #tpu.contract_precision<fp32>} : vector<16x32xf32>, vector<32x96xf32>, vector<16x96xf32> -> vector<16x96xf32>
    %79 = arith.addf %76, %78 : vector<16x96xf32>
    %c0_52 = arith.constant 0 : index
    %c0_53 = arith.constant 0 : index
    %80 = vector.load %arg15[%c0_52, %c0_53] : memref<32x96xf32, #tpu.memory_space<vmem>>, vector<32x96xf32>
    %cst_54 = arith.constant dense<0.000000e+00> : vector<16x96xf32>
    %81 = tpu.matmul %74, %80, %cst_54 {dimension_numbers = #tpu.dot_dimension_numbers<[1], [0], [0], [1], [0, 0, 1, 1], [], []>, precision = #tpu.contract_precision<fp32>} : vector<16x32xf32>, vector<32x96xf32>, vector<16x96xf32> -> vector<16x96xf32>
    %82 = arith.addf %79, %81 : vector<16x96xf32>
    %c0_55 = arith.constant 0 : index
    %c0_56 = arith.constant 0 : index
    %83 = vector.load %arg16[%c0_55, %c0_56] : memref<1x96xf32, #tpu.memory_space<vmem>>, vector<1x96xf32>
    %84 = vector.broadcast %83 : vector<1x96xf32> to vector<16x96xf32>
    %85 = arith.addf %82, %84 : vector<16x96xf32>
    %cst_57 = arith.constant 0.000000e+00 : f32
    %86 = vector.broadcast %cst_57 : f32 to vector<16x96xf32>
    %87 = arith.maximumf %85, %86 : vector<16x96xf32>
    %c0_58 = arith.constant 0 : index
    %c0_59 = arith.constant 0 : index
    %88 = vector.load %arg17[%c0_58, %c0_59] : memref<96x96xf32, #tpu.memory_space<vmem>>, vector<96x96xf32>
    %cst_60 = arith.constant dense<0.000000e+00> : vector<16x96xf32>
    %89 = tpu.matmul %87, %88, %cst_60 {dimension_numbers = #tpu.dot_dimension_numbers<[1], [0], [0], [1], [0, 0, 1, 1], [], []>, precision = #tpu.contract_precision<fp32>} : vector<16x96xf32>, vector<96x96xf32>, vector<16x96xf32> -> vector<16x96xf32>
    %c0_61 = arith.constant 0 : index
    %c0_62 = arith.constant 0 : index
    %90 = vector.load %arg18[%c0_61, %c0_62] : memref<1x96xf32, #tpu.memory_space<vmem>>, vector<1x96xf32>
    %91 = vector.broadcast %90 : vector<1x96xf32> to vector<16x96xf32>
    %92 = arith.addf %89, %91 : vector<16x96xf32>
    %cst_63 = arith.constant 0.000000e+00 : f32
    %93 = vector.broadcast %cst_63 : f32 to vector<16x96xf32>
    %94 = arith.maximumf %92, %93 : vector<16x96xf32>
    %c0_64 = arith.constant 0 : index
    %c0_65 = arith.constant 0 : index
    %95 = vector.load %arg19[%c0_64, %c0_65] : memref<96x96xf32, #tpu.memory_space<vmem>>, vector<96x96xf32>
    %cst_66 = arith.constant dense<0.000000e+00> : vector<16x96xf32>
    %96 = tpu.matmul %94, %95, %cst_66 {dimension_numbers = #tpu.dot_dimension_numbers<[1], [0], [0], [1], [0, 0, 1, 1], [], []>, precision = #tpu.contract_precision<fp32>} : vector<16x96xf32>, vector<96x96xf32>, vector<16x96xf32> -> vector<16x96xf32>
    %c0_67 = arith.constant 0 : index
    %c0_68 = arith.constant 0 : index
    %97 = vector.load %arg20[%c0_67, %c0_68] : memref<1x96xf32, #tpu.memory_space<vmem>>, vector<1x96xf32>
    %98 = vector.broadcast %97 : vector<1x96xf32> to vector<16x96xf32>
    %99 = arith.addf %96, %98 : vector<16x96xf32>
    %cst_69 = arith.constant 0.000000e+00 : f32
    %100 = vector.broadcast %cst_69 : f32 to vector<16x96xf32>
    %101 = arith.maximumf %99, %100 : vector<16x96xf32>
    %c0_70 = arith.constant 0 : index
    %c0_71 = arith.constant 0 : index
    %102 = vector.load %arg21[%c0_70, %c0_71] : memref<32x96xf32, #tpu.memory_space<vmem>>, vector<32x96xf32>
    %cst_72 = arith.constant dense<0.000000e+00> : vector<16x96xf32>
    %103 = tpu.matmul %24, %102, %cst_72 {dimension_numbers = #tpu.dot_dimension_numbers<[1], [0], [0], [1], [0, 0, 1, 1], [], []>, precision = #tpu.contract_precision<fp32>} : vector<16x32xf32>, vector<32x96xf32>, vector<16x96xf32> -> vector<16x96xf32>
    %c0_73 = arith.constant 0 : index
    %c0_74 = arith.constant 0 : index
    %104 = vector.load %arg22[%c0_73, %c0_74] : memref<32x96xf32, #tpu.memory_space<vmem>>, vector<32x96xf32>
    %cst_75 = arith.constant dense<0.000000e+00> : vector<16x96xf32>
    %105 = tpu.matmul %49, %104, %cst_75 {dimension_numbers = #tpu.dot_dimension_numbers<[1], [0], [0], [1], [0, 0, 1, 1], [], []>, precision = #tpu.contract_precision<fp32>} : vector<16x32xf32>, vector<32x96xf32>, vector<16x96xf32> -> vector<16x96xf32>
    %106 = arith.addf %103, %105 : vector<16x96xf32>
    %c0_76 = arith.constant 0 : index
    %c0_77 = arith.constant 0 : index
    %107 = vector.load %arg23[%c0_76, %c0_77] : memref<32x96xf32, #tpu.memory_space<vmem>>, vector<32x96xf32>
    %cst_78 = arith.constant dense<0.000000e+00> : vector<16x96xf32>
    %108 = tpu.matmul %74, %107, %cst_78 {dimension_numbers = #tpu.dot_dimension_numbers<[1], [0], [0], [1], [0, 0, 1, 1], [], []>, precision = #tpu.contract_precision<fp32>} : vector<16x32xf32>, vector<32x96xf32>, vector<16x96xf32> -> vector<16x96xf32>
    %109 = arith.addf %106, %108 : vector<16x96xf32>
    %c0_79 = arith.constant 0 : index
    %c0_80 = arith.constant 0 : index
    %110 = vector.load %arg24[%c0_79, %c0_80] : memref<1x96xf32, #tpu.memory_space<vmem>>, vector<1x96xf32>
    %111 = vector.broadcast %110 : vector<1x96xf32> to vector<16x96xf32>
    %112 = arith.addf %109, %111 : vector<16x96xf32>
    %113 = arith.addf %101, %112 : vector<16x96xf32>
    %cst_81 = arith.constant dense<0.000000e+00> : vector<96xf32>
    %114 = vector.multi_reduction <add>, %113, %cst_81 [0] : vector<16x96xf32> to vector<96xf32>
    %115 = vector.shape_cast %114 : vector<96xf32> to vector<1x96xf32>
    %cst_82 = arith.constant 1.600000e+01 : f32
    %116 = vector.broadcast %cst_82 : f32 to vector<1x96xf32>
    %117 = arith.divf %115, %116 : vector<1x96xf32>
    %c0_83 = arith.constant 0 : index
    %c0_84 = arith.constant 0 : index
    %c0_85 = arith.constant 0 : index
    %118 = vector.load %arg25[%c0_83, %c0_84, %c0_85] : memref<1x1x96xf32, #tpu.memory_space<vmem>>, vector<1x1x96xf32>
    %119 = vector.shape_cast %118 : vector<1x1x96xf32> to vector<1x96xf32>
    %120 = vector.shape_cast %117 : vector<1x96xf32> to vector<1x1x96xf32>
    tpu.vector_store %arg25[%c0_83, %c0_84, %c0_85], %120 {strides = array<i32>} : memref<1x1x96xf32, #tpu.memory_space<vmem>>, vector<1x1x96xf32>,
    return
  }
  func.func @transform_0(%arg0: i32) -> (i32, i32, i32) {
    %c0_i32 = arith.constant 0 : i32
    %c0_i32_0 = arith.constant 0 : i32
    %c0_i32_1 = arith.constant 0 : i32
    return %arg0, %c0_i32, %c0_i32_0 : i32, i32, i32
  }
  func.func @transform_1(%arg0: i32) -> (i32, i32, i32) {
    %c0_i32 = arith.constant 0 : i32
    %c0_i32_0 = arith.constant 0 : i32
    %c0_i32_1 = arith.constant 0 : i32
    return %arg0, %c0_i32, %c0_i32_0 : i32, i32, i32
  }
  func.func @transform_2(%arg0: i32) -> (i32, i32, i32) {
    %c0_i32 = arith.constant 0 : i32
    %c0_i32_0 = arith.constant 0 : i32
    %c0_i32_1 = arith.constant 0 : i32
    return %arg0, %c0_i32, %c0_i32_0 : i32, i32, i32
  }
  func.func @transform_3(%arg0: i32) -> (i32, i32, i32) {
    %c0_i32 = arith.constant 0 : i32
    %c0_i32_0 = arith.constant 0 : i32
    %c0_i32_1 = arith.constant 0 : i32
    %c0_i32_2 = arith.constant 0 : i32
    return %c0_i32, %c0_i32_0, %c0_i32_1 : i32, i32, i32
  }
  func.func @transform_4(%arg0: i32) -> (i32, i32, i32) {
    %c0_i32 = arith.constant 0 : i32
    %c0_i32_0 = arith.constant 0 : i32
    %c0_i32_1 = arith.constant 0 : i32
    %c0_i32_2 = arith.constant 0 : i32
    return %c0_i32, %c0_i32_0, %c0_i32_1 : i32, i32, i32
  }
  func.func @transform_5(%arg0: i32) -> (i32, i32, i32) {
    %c0_i32 = arith.constant 0 : i32
    %c0_i32_0 = arith.constant 0 : i32
    %c0_i32_1 = arith.constant 0 : i32
    %c0_i32_2 = arith.constant 0 : i32
    return %c0_i32, %c0_i32_0, %c0_i32_1 : i32, i32, i32
  }
  func.func @transform_6(%arg0: i32) -> (i32, i32, i32) {
    %c0_i32 = arith.constant 0 : i32
    %c0_i32_0 = arith.constant 0 : i32
    %c0_i32_1 = arith.constant 0 : i32
    %c0_i32_2 = arith.constant 0 : i32
    return %c0_i32, %c0_i32_0, %c0_i32_1 : i32, i32, i32
  }
  func.func @transform_7(%arg0: i32) -> (i32, i32, i32) {
    %c0_i32 = arith.constant 0 : i32
    %c0_i32_0 = arith.constant 0 : i32
    %c0_i32_1 = arith.constant 0 : i32
    %c0_i32_2 = arith.constant 0 : i32
    return %c0_i32, %c0_i32_0, %c0_i32_1 : i32, i32, i32
  }
  func.func @transform_8(%arg0: i32) -> (i32, i32, i32) {
    %c0_i32 = arith.constant 0 : i32
    %c0_i32_0 = arith.constant 0 : i32
    %c0_i32_1 = arith.constant 0 : i32
    %c0_i32_2 = arith.constant 0 : i32
    return %c0_i32, %c0_i32_0, %c0_i32_1 : i32, i32, i32
  }
  func.func @transform_9(%arg0: i32) -> (i32, i32) {
    %c0_i32 = arith.constant 0 : i32
    %c0_i32_0 = arith.constant 0 : i32
    %c0_i32_1 = arith.constant 0 : i32
    return %c0_i32, %c0_i32_0 : i32, i32
  }
  func.func @transform_10(%arg0: i32) -> (i32, i32) {
    %c0_i32 = arith.constant 0 : i32
    %c0_i32_0 = arith.constant 0 : i32
    %c0_i32_1 = arith.constant 0 : i32
    return %c0_i32, %c0_i32_0 : i32, i32
  }
  func.func @transform_11(%arg0: i32) -> (i32, i32) {
    %c0_i32 = arith.constant 0 : i32
    %c0_i32_0 = arith.constant 0 : i32
    %c0_i32_1 = arith.constant 0 : i32
    return %c0_i32, %c0_i32_0 : i32, i32
  }
  func.func @transform_12(%arg0: i32) -> (i32, i32) {
    %c0_i32 = arith.constant 0 : i32
    %c0_i32_0 = arith.constant 0 : i32
    %c0_i32_1 = arith.constant 0 : i32
    return %c0_i32, %c0_i32_0 : i32, i32
  }
  func.func @transform_13(%arg0: i32) -> (i32, i32) {
    %c0_i32 = arith.constant 0 : i32
    %c0_i32_0 = arith.constant 0 : i32
    %c0_i32_1 = arith.constant 0 : i32
    return %c0_i32, %c0_i32_0 : i32, i32
  }
  func.func @transform_14(%arg0: i32) -> (i32, i32) {
    %c0_i32 = arith.constant 0 : i32
    %c0_i32_0 = arith.constant 0 : i32
    %c0_i32_1 = arith.constant 0 : i32
    return %c0_i32, %c0_i32_0 : i32, i32
  }
  func.func @transform_15(%arg0: i32) -> (i32, i32) {
    %c0_i32 = arith.constant 0 : i32
    %c0_i32_0 = arith.constant 0 : i32
    %c0_i32_1 = arith.constant 0 : i32
    return %c0_i32, %c0_i32_0 : i32, i32
  }
  func.func @transform_16(%arg0: i32) -> (i32, i32) {
    %c0_i32 = arith.constant 0 : i32
    %c0_i32_0 = arith.constant 0 : i32
    %c0_i32_1 = arith.constant 0 : i32
    return %c0_i32, %c0_i32_0 : i32, i32
  }
  func.func @transform_17(%arg0: i32) -> (i32, i32) {
    %c0_i32 = arith.constant 0 : i32
    %c0_i32_0 = arith.constant 0 : i32
    %c0_i32_1 = arith.constant 0 : i32
    return %c0_i32, %c0_i32_0 : i32, i32
  }
  func.func @transform_18(%arg0: i32) -> (i32, i32) {
    %c0_i32 = arith.constant 0 : i32
    %c0_i32_0 = arith.constant 0 : i32
    %c0_i32_1 = arith.constant 0 : i32
    return %c0_i32, %c0_i32_0 : i32, i32
  }
  func.func @transform_19(%arg0: i32) -> (i32, i32) {
    %c0_i32 = arith.constant 0 : i32
    %c0_i32_0 = arith.constant 0 : i32
    %c0_i32_1 = arith.constant 0 : i32
    return %c0_i32, %c0_i32_0 : i32, i32
  }
  func.func @transform_20(%arg0: i32) -> (i32, i32) {
    %c0_i32 = arith.constant 0 : i32
    %c0_i32_0 = arith.constant 0 : i32
    %c0_i32_1 = arith.constant 0 : i32
    return %c0_i32, %c0_i32_0 : i32, i32
  }
  func.func @transform_21(%arg0: i32) -> (i32, i32) {
    %c0_i32 = arith.constant 0 : i32
    %c0_i32_0 = arith.constant 0 : i32
    %c0_i32_1 = arith.constant 0 : i32
    return %c0_i32, %c0_i32_0 : i32, i32
  }
  func.func @transform_22(%arg0: i32) -> (i32, i32) {
    %c0_i32 = arith.constant 0 : i32
    %c0_i32_0 = arith.constant 0 : i32
    %c0_i32_1 = arith.constant 0 : i32
    return %c0_i32, %c0_i32_0 : i32, i32
  }
  func.func @transform_23(%arg0: i32) -> (i32, i32) {
    %c0_i32 = arith.constant 0 : i32
    %c0_i32_0 = arith.constant 0 : i32
    %c0_i32_1 = arith.constant 0 : i32
    return %c0_i32, %c0_i32_0 : i32, i32
  }
  func.func @transform_24(%arg0: i32) -> (i32, i32, i32) {
    %c0_i32 = arith.constant 0 : i32
    %c0_i32_0 = arith.constant 0 : i32
    %c0_i32_1 = arith.constant 0 : i32
    return %arg0, %c0_i32, %c0_i32_0 : i32, i32, i32
  }
}

</mosaic_0001>

<bundles_post_ra>
// kernel: graphsage_forward.4
= control target key start
LH: loop header
LB: loop body
LE: loop exit
PB: predicated region body
PF: predicated region fallthrough
CT: control target
= control target key end

     0   :  { %s1436_s24 = smov 0   ;;  %s1628_s0 = inlined_call_operand.vmem [shape: f32[2,16,16], index: 0, kind: input, shape index: {}]   ;;  %s1629_s1 = inlined_call_operand.vmem [shape: f32[2,16,16], index: 1, kind: input, shape index: {}]   ;;  %s1630_s2 = inlined_call_operand.vmem [shape: f32[16,32], index: 2, kind: input, shape index: {}]   ;;  %s1631_s3 = inlined_call_operand.vmem [shape: f32[32,32], index: 3, kind: input, shape index: {}]   ;;  %s1632_s4 = inlined_call_operand.vmem [shape: f32[32,32], index: 4, kind: input, shape index: {}]   ;;  %s1633_s5 = inlined_call_operand.vmem [shape: f32[2,16,32], index: 5, kind: output, shape index: {0}]   ;;  %s1634_s6 = inlined_call_operand.vmem [shape: f32[2,1,32], index: 6, kind: output, shape index: {1}]   ;;  %s1635_s7 = inlined_call_operand.vmem [shape: f32[2,1,32], index: 7, kind: output, shape index: {2}]  }
   0x1 LB: > { %s1360_s25 = sadd.s32 4294967295, %s1394_s24   ;;  %p1364_p0 = scmp.ge.s32.totalorder %s1394_s24, 1  ;;  %s1394_s24 = sphi %s1436_s24, %s18_s24  }
   0x2   : > { %p252_p1 = scmp.lt.s32.totalorder %s1394_s24, 3 }
   0x4   : > { %p253_p2 = pnand %p1364_p0, %p252_p1 }
   0x5   : > { %p295_p3 = scmp.lt.s32.totalorder (!%p253_p2), %s1360_s25, 1 }
   0x6   : > { %256 = sbr.rel (%p253_p2) target bundleno = 554 (0x22a), region = 40 }
   0xb   : > { %v321_v0 = vld [vmem:[%s1630_s2 + $0x8] sm:$0xff]  ;;  %v320_v1 = vld [vmem:[%s1630_s2] sm:$0xff]  ;;  %s1641_s25 = smov (!%p295_p3, %s1360_s25), 1  ;;  %vm330_vm0 = vcmask 130048   ;;  %vm767_vm9 = vcmask 261120   ;;  %vm1229_vm14 = vcmask 253952  }
   0xc   : > { %v351_v2 = vand.u32 4294901760, %v321_v0  ;;  %v353_v3 = vand.u32 4294901760, %v320_v1  ;;  %s1453_s30 = sshll.u32 %s1641_s25, 4  ;;  %s312_s14 = scalar_lea.vmem %s1634_s6, %s1641_s25 }
   0xd   : > { %s299_s10 = scalar_lea.vmem %s1628_s0, %s1453_s30  ;;  %s304_s13 = scalar_lea.vmem %s1629_s1, %s1453_s30 }
   0xe   : > { %v387_v4 = vsub.f32 %v321_v0, %v351_v2  ;;  %v393_v5 = vsub.f32 %v320_v1, %v353_v3  ;;  %453 = vmatpush.msra.mxu3 %v351_v2  ;;  %352 = vmatpush.msra.mxu0 %v351_v2  ;;  %v316_v8 = vld [vmem:[%s299_s10] sm:$0xff]  ;;  %v317_v9 = vld [vmem:[%s299_s10 + $0x8] sm:$0xff]  ;;  %s309_s12 = scalar_lea.vmem %s1633_s5, %s1453_s30  ;;  %s315_s17 = scalar_lea.vmem %s1635_s7, %s1641_s25 }
   0xf   : > { %v332_v10 = vsel %vm330_vm0, %v316_v8, 0  ;;  %v335_v13 = vsel %vm330_vm0, %v317_v9, 0  ;;  %v318_v34 = vld [vmem:[%s304_s13] sm:$0xff]  ;;  %v319_v46 = vld [vmem:[%s304_s13 + $0x8] sm:$0xff] }
  0x10   : > { %423 = vmatpush.msra.mxu2 %v387_v4  ;;  %v388_v6 = vand.u32 4294901760, %v387_v4  ;;  %455 = vmatpush.msra.mxu3 %v353_v3  ;;  %v394_v7 = vand.u32 4294901760, %v393_v5  ;;  %v355_v14 = vand.u32 4294901760, %v332_v10  ;;  %v363_v15 = vand.u32 4294901760, %v335_v13 }
  0x11   : > { %354 = vmatpush.msra.mxu0 %v353_v3  ;;  %v542_v36 = vsel %vm330_vm0, %v318_v34, 0  ;;  %v533_v39 = vsel %vm330_vm0, %v318_v34, 0.0  ;;  %v545_v50 = vsel %vm330_vm0, %v319_v46, 0  ;;  %v536_v53 = vsel %vm330_vm0, %v319_v46, 0.0  ;;  %v324_v46 = vld [vmem:[%s1631_s3 + $0x10] sm:$0xff] }
  0x12   : > { %426 = vmatpush.msra.mxu2 %v393_v5  ;;  %v389_v11 = vsub.f32 %v387_v4, %v388_v6  ;;  %v395_v12 = vsub.f32 %v393_v5, %v394_v7  ;;  %v356_v18 = vsub.f32 %v332_v10, %v355_v14  ;;  %v364_v19 = vsub.f32 %v335_v13, %v363_v15 }
  0x13   : > { %486 = vmatpush.msrb.mxu0 %v388_v6  ;;  %534 = vadd.xlane.f32.xlu0 %v533_v39  ;;  %v565_v43 = vand.u32 4294901760, %v542_v36  ;;  %v573_v58 = vand.u32 4294901760, %v545_v50 }
  0x14   : > { %v390_v16 = vand.u32 4294901760, %v389_v11  ;;  %v396_v17 = vand.u32 4294901760, %v395_v12  ;;  %429 = vmatmul.f32.vlgmr.msra.gmra.mxu2 %v356_v18  ;;  %v357_v20 = vand.u32 4294901760, %v356_v18  ;;  %v365_v22 = vand.u32 4294901760, %v364_v19 }
  0x15   : > { %490 = vmatpush.msrb.mxu0 %v394_v7  ;;  %v566_v49 = vsub.f32 %v542_v36, %v565_v43  ;;  %v574_v63 = vsub.f32 %v545_v50, %v573_v58  ;;  %v323_v50 = vld [vmem:[%s1631_s3 + $0x8] sm:$0xff] }
  0x16   : > { %391 = vmatpush.msra.mxu1 %v390_v16  ;;  %459 = vmatmul.f32.vlgmr.msra.gmra.mxu3 %v357_v20  ;;  %v358_v21 = vsub.f32 %v356_v18, %v357_v20  ;;  %v366_v24 = vsub.f32 %v364_v19, %v365_v22  ;;  %v328_v16 = vld [vmem:[%s1632_s4 + $0x10] sm:$0xff] }
  0x17   : > { %v567_v57 = vand.u32 4294901760, %v566_v49  ;;  %v575_v4 = vand.u32 4294901760, %v574_v63  ;;  %v788_v18 = vand.u32 4294901760, %v328_v16 }
  0x18   : > { %397 = vmatpush.msra.mxu1 %v396_v17  ;;  %v359_v23 = vand.u32 4294901760, %v358_v21  ;;  %v367_v25 = vand.u32 4294901760, %v366_v24  ;;  %v326_v24 = vld [vmem:[%s1632_s4] sm:$0xff] }
  0x19   : > { %399 = vmatmul.f32.vlgmr.msra.gmra.mxu1 %v355_v14  ;;  %v568_v62 = vsub.f32 %v566_v49, %v567_v57  ;;  %v576_v8 = vsub.f32 %v574_v63, %v575_v4  ;;  %v830_v21 = vsub.f32 %v328_v16, %v788_v18 }
  0x1a   : > { %515 = vmatpush.msrb.mxu1 %v351_v2  ;;  %360 = vmatmul.f32.vlgmr.msra.gmra.mxu0 %v359_v23 }
  0x1b   : > { %537 = vadd.xlane.f32.xlu0 %v536_v53  ;;  %v577_v12 = vand.u32 4294901760, %v576_v8 }
  0x1c   : > { %517 = vmatpush.msrb.mxu1 %v353_v3  ;;  %434 = vmatmul.f32.gmra.mxu2 %v364_v19  ;;  %v569_v3 = vand.u32 4294901760, %v568_v62  ;;  %v327_v19 = vld [vmem:[%s1632_s4 + $0x8] sm:$0xff] }
  0x1e   : > { %465 = vmatmul.f32.gmra.mxu3 %v365_v22  ;;  %v790_v22 = vand.u32 4294901760, %v327_v19 }
  0x21   : > { %403 = vmatmul.f32.gmra.mxu1 %v363_v15 }
  0x22   : > { %368 = vmatmul.f32.gmra.mxu0 %v367_v25 }
  0x29   : > { %519 = vmatmul.f32.vlgmr.msrb.gmra.mxu1 %v355_v14 }
  0x2a   : > { %492 = vmatmul.f32.vlgmr.msrb.gmra.mxu0 %v355_v14  ;;  %v329_v14 = vld [vmem:[%s1632_s4 + $0x18] sm:$0xff] }
  0x31   : > { %523 = vmatmul.f32.gmra.mxu1 %v363_v15 }
  0x32   : > { %496 = vmatmul.f32.gmra.mxu0 %v363_v15  ;;  %v786_v15 = vand.u32 4294901760, %v329_v14 }
  0x34   : > { %v824_v17 = vsub.f32 %v329_v14, %v786_v15 }
  0x36   : > { %v825_v20 = vand.u32 4294901760, %v824_v17 }
  0x38   : > { %v826_v25 = vsub.f32 %v824_v17, %v825_v20 }
  0x86   : > { %v535_v23 = vpop.xlane.xlu0 %534 }
  0x96   : > { %v400_v26 = vpop.f32.mrf.mxu1 }
  0x97   : > { %v361_v27 = vpop.f32.mrf.mxu0  ;;  %v430_v28 = vpop.f32.mrf.mxu2 }
  0x98   : > { %v401_v30 = vadd.f32 %v400_v26, %v361_v27  ;;  %v831_v26 = vand.u32 4294901760, %v830_v21  ;;  %v836_v27 = vsub.f32 %v327_v19, %v790_v22 }
  0x99   : > { %v460_v32 = vpop.f32.mrf.mxu3 }
  0x9a   : > { %v431_v33 = vadd.f32 %v430_v28, %v401_v30  ;;  %v792_v28 = vand.u32 4294901760, %v326_v24  ;;  %v832_v30 = vsub.f32 %v830_v21, %v831_v26 }
  0x9c   : > { %v461_v37 = vadd.f32 %v460_v32, %v431_v33  ;;  %v842_v32 = vsub.f32 %v326_v24, %v792_v28  ;;  %v1489_v33 = vadd.f32 1e-06, %v535_v23  ;;  %v833_v34 = vand.u32 4294901760, %v832_v30 }
  0x9e   : > { %v404_v29 = vpop.f32.mrf.mxu1  ;;  %v843_v36 = vand.u32 4294901760, %v842_v32  ;;  %1384 = vrcp.f32 %v1489_v33  ;;  %vm742_vm3 = vweird.f32 %v1489_v33 }
  0x9f   : > { %v369_v31 = vpop.f32.mrf.mxu0  ;;  %v435_v40 = vpop.f32.mrf.mxu2 }
  0xa0   : > { %v405_v38 = vadd.f32 %v404_v29, %v369_v31  ;;  %v827_v29 = vand.u32 4294901760, %v826_v25  ;;  %v837_v31 = vand.u32 4294901760, %v836_v27 }
  0xa1   : > { %v466_v47 = vpop.f32.mrf.mxu3 }
  0xa2   : > { %v436_v44 = vadd.f32 %v435_v40, %v405_v38  ;;  %v844_v38 = vsub.f32 %v842_v32, %v843_v36  ;;  %v538_v40 = vpop.xlane.xlu0 %537 }
  0xa4   : > { %v467_v51 = vadd.f32 %v466_v47, %v436_v44  ;;  %v845_v39 = vand.u32 4294901760, %v844_v38  ;;  %v1497_v44 = vpop.eup %1384 }
  0xa5   : > { %vm743_vm4 = vweird.f32 %v1497_v44 }
  0xa6   : > { %v520_v35 = vpop.f32.mrf.mxu1  ;;  %vm1561_vm5 = vmor %vm742_vm3, %vm743_vm4 }
  0xa7   : > { %v493_v41 = vpop.f32.mrf.mxu0 }
  0xa8   : > { %v494_v42 = vadd.f32 %v493_v41, %v461_v37 }
  0xaa   : > { %v521_v45 = vadd.f32 %v520_v35, %v494_v42  ;;  %v838_v35 = vsub.f32 %v836_v27, %v837_v31  ;;  %v1492_v42 = vadd.f32 1e-06, %v538_v40 }
  0xac   : > { %vm527_vm1 = vcmp.gt.f32.partialorder %v521_v45, 0.0  ;;  %v529_v48 = vmul.f32 0.01, %v521_v45  ;;  %v839_v37 = vand.u32 4294901760, %v838_v35  ;;  %1386 = vrcp.f32 %v1492_v42 }
  0xad   : > { %vm757_vm7 = vweird.f32 %v1492_v42 }
  0xae   : > { %v1468_v52 = vsel %vm527_vm1, %v521_v45, %v529_v48  ;;  %v524_v55 = vpop.f32.mrf.mxu1  ;;  %v1509_v48 = vand.u32 4294901760, %v324_v46 }
  0xaf   : > { %v497_v54 = vpop.f32.mrf.mxu0  ;;  %v563_v59 = vand.u32 4294901760, %v1468_v52 }
  0xb0   : > { %v498_v56 = vadd.f32 %v497_v54, %v467_v51 }
  0xb1   : > { %v603_v0 = vsub.f32 %v1468_v52, %v563_v59 }
  0xb2   : > { %v525_v60 = vadd.f32 %v524_v55, %v498_v56  ;;  %v1518_v55 = vand.u32 4294901760, %v323_v50  ;;  %v1521_v56 = vsub.f32 %v324_v46, %v1509_v48 }
  0xb3   : > { %v604_v6 = vand.u32 4294901760, %v603_v0 }
  0xb4   : > { %vm528_vm2 = vcmp.gt.f32.partialorder %v525_v60, 0.0  ;;  %v530_v61 = vmul.f32 0.01, %v525_v60 }
  0xb5   : > { %v605_v10 = vsub.f32 %v603_v0, %v604_v6 }
  0xb6   : > { %v1473_v1 = vsel %vm528_vm2, %v525_v60, %v530_v61  ;;  %v1534_v61 = vsub.f32 %v323_v50, %v1518_v55 }
  0xb7   : > { %v561_v2 = vand.u32 4294901760, %v1473_v1  ;;  %v606_v13 = vand.u32 4294901760, %v605_v10 }
  0xb9   : > { %v597_v5 = vsub.f32 %v1473_v1, %v561_v2  ;;  %562 = vmatpush.msrb.mxu2 %v561_v2  ;;  %663 = vmatpush.msra.mxu1 %v561_v2 }
  0xbb   : > { %564 = vmatpush.msrb.mxu2 %v563_v59  ;;  %633 = vmatpush.msra.mxu0 %v597_v5  ;;  %v598_v7 = vand.u32 4294901760, %v597_v5 }
  0xbc   : > { %665 = vmatpush.msra.mxu1 %v563_v59  ;;  %570 = vmatmul.f32.vlgmr.msrb.gmra.mxu2 %v569_v3 }
  0xbd   : > { %636 = vmatpush.msra.mxu0 %v603_v0  ;;  %696 = vmatpush.msra.mxu2 %v598_v7  ;;  %v599_v9 = vsub.f32 %v597_v5, %v598_v7 }
  0xbe   : > { %639 = vmatmul.f32.vlgmr.msra.gmra.mxu0 %v566_v49  ;;  %669 = vmatmul.f32.vlgmr.msra.gmra.mxu1 %v567_v57  ;;  %v738_v49 = vmul.f32 %v1497_v44, %v1489_v33  ;;  %v322_v57 = vld [vmem:[%s1631_s3] sm:$0xff] }
  0xbf   : > { %700 = vmatpush.msra.mxu2 %v604_v6  ;;  %v600_v11 = vand.u32 4294901760, %v599_v9  ;;  %787 = vmatpush.msrb.mxu0 %v786_v15  ;;  %v1531_v60 = vand.u32 4294901760, %v322_v57 }
  0xc0   : > { %828 = vmatpush.msrb.mxu1 %v827_v29  ;;  %v739_v62 = vsub.f32 1.0, %v738_v49 }
  0xc1   : > { %601 = vmatpush.msrb.mxu3 %v600_v11  ;;  %870 = vmatpush.msrb.mxu2 %v824_v17  ;;  %v1544_v5 = vsub.f32 %v322_v57, %v1531_v60 }
  0xc2   : > { %789 = vmatpush.msrb.mxu0 %v788_v18  ;;  %834 = vmatpush.msrb.mxu1 %v833_v34  ;;  %v740_v11 = vmul.f32 %v1497_v44, %v739_v62 }
  0xc3   : > { %607 = vmatpush.msrb.mxu3 %v606_v13  ;;  %873 = vmatpush.msrb.mxu2 %v830_v21  ;;  %v1065_v9 = vand.u32 4294901760, %v1544_v5 }
  0xc4   : > { %609 = vmatmul.f32.vlgmr.msrb.gmra.mxu3 %v565_v43  ;;  %578 = vmatmul.f32.gmra.mxu2 %v577_v12  ;;  %v741_v21 = vadd.f32 %v1497_v44, %v740_v11 }
  0xc5   : > { %725 = vmatpush.msra.mxu3 %v561_v2  ;;  %791 = vmatpush.msrb.mxu0 %v790_v22 }
  0xc6   : > { %644 = vmatmul.f32.gmra.mxu0 %v574_v63  ;;  %675 = vmatmul.f32.gmra.mxu1 %v575_v4  ;;  %v1536_v63 = vpop.eup %1386  ;;  %v1059_v4 = vand.u32 4294901760, %v1534_v61  ;;  %v745_v29 = vsel %vm1561_vm5, %v1497_v44, %v741_v21 }
  0xc7   : > { %727 = vmatpush.msra.mxu3 %v563_v59  ;;  %876 = vmatpush.msrb.mxu2 %v836_v27  ;;  %v1053_v59 = vand.u32 4294901760, %v1521_v56  ;;  %v753_v10 = vmul.f32 %v1536_v63, %v1492_v42  ;;  %vm758_vm8 = vweird.f32 %v1536_v63 }
  0xc8   : > { %793 = vmatpush.msrb.mxu0 %v792_v28  ;;  %840 = vmatpush.msrb.mxu1 %v839_v37  ;;  %v1060_v8 = vsub.f32 %v1534_v61, %v1059_v4  ;;  %vm1574_vm10 = vmor %vm757_vm7, %vm758_vm8 }
  0xc9   : > { %904 = vmatpush.msrb.mxu3 %v786_v15  ;;  %879 = vmatpush.msrb.mxu2 %v842_v32  ;;  %v1054_v3 = vsub.f32 %v1521_v56, %v1053_v59 }
  0xca   : > { %939 = vmatpush.msra.mxu0 %v825_v20  ;;  %846 = vmatpush.msrb.mxu1 %v845_v39  ;;  %v1061_v14 = vand.u32 4294901760, %v1060_v8  ;;  %v754_v20 = vsub.f32 1.0, %v753_v10  ;;  %v761_v39 = vand.u32 2147483647, %v1492_v42 }
  0xcb   : > { %906 = vmatpush.msrb.mxu3 %v788_v18  ;;  %v1055_v7 = vand.u32 4294901760, %v1054_v3 }
  0xcc   : > { %613 = vmatmul.f32.gmra.mxu3 %v573_v58  ;;  %702 = vmatmul.f32.vlgmr.msra.gmra.mxu2 %v565_v43  ;;  %v755_v30 = vmul.f32 %v1536_v63, %v754_v20  ;;  %vm762_vm11 = vcmp.eq.f32.partialorder %v761_v39, 8.507059e+37 }
  0xcd   : > { %908 = vmatpush.msrb.mxu3 %v790_v22  ;;  %943 = vmatpush.msra.mxu0 %v831_v26 }
  0xce   : > { %974 = vmatpush.msra.mxu1 %v786_v15  ;;  %v1066_v15 = vsub.f32 %v1544_v5, %v1065_v9  ;;  %v756_v38 = vadd.f32 %v1536_v63, %v755_v30 }
  0xcf   : > { %910 = vmatpush.msrb.mxu3 %v792_v28  ;;  %947 = vmatpush.msra.mxu0 %v837_v31 }
  0xd0   : > { %976 = vmatpush.msra.mxu1 %v788_v18  ;;  %v748_v18 = vand.u32 2147483648, %v1489_v33  ;;  %v1067_v19 = vand.u32 4294901760, %v1066_v15 }
  0xd1   : > { %951 = vmatpush.msra.mxu0 %v843_v36  ;;  %v763_v36 = vand.u32 2147483648, %v1492_v42 }
  0xd2   : > { %978 = vmatpush.msra.mxu1 %v790_v22  ;;  %v746_v22 = vand.u32 2147483647, %v1489_v33  ;;  %v749_v26 = vor.u32 1.1754944e-38, %v748_v18 }
  0xd3   : > { %v764_v50 = vor.u32 1.1754944e-38, %v763_v36 }
  0xd4   : > { %729 = vmatmul.f32.vlgmr.msra.gmra.mxu3 %v565_v43  ;;  %706 = vmatmul.f32.gmra.mxu2 %v573_v58  ;;  %v325_v43 = vld [vmem:[%s1631_s3 + $0x18] sm:$0xff]  ;;  %vm747_vm6 = vcmp.eq.f32.partialorder %v746_v22, 8.507059e+37 }
  0xd5   : > { %v1499_v45 = vand.u32 4294901760, %v325_v43  ;;  %980 = vmatpush.msra.mxu1 %v792_v28  ;;  %v750_v34 = vsel %vm747_vm6, %v749_v26, %v745_v29 }
  0xd7   : > { %1009 = vmatpush.msra.mxu2 %v1499_v45  ;;  %v1507_v47 = vsub.f32 %v325_v43, %v1499_v45  ;;  %v991_v43 = vsel %vm767_vm9, %v1468_v52, 0 }
  0xd8   : > { %v1016_v42 = vand.u32 4294901760, %v991_v43 }
  0xd9   : > { %1011 = vmatpush.msra.mxu2 %v1509_v48  ;;  %v1047_v54 = vand.u32 4294901760, %v1507_v47 }
  0xda   : > { %v1017_v3 = vsub.f32 %v991_v43, %v1016_v42 }
  0xdb   : > { %1013 = vmatpush.msra.mxu2 %v1518_v55 }
  0xdc   : > { %733 = vmatmul.f32.gmra.mxu3 %v573_v58  ;;  %v1048_v58 = vsub.f32 %v1507_v47, %v1047_v54  ;;  %v1018_v11 = vand.u32 4294901760, %v1017_v3 }
  0xdd   : > { %1015 = vmatpush.msra.mxu2 %v1531_v60 }
  0xde   : > { %v1049_v2 = vand.u32 4294901760, %v1048_v58 }
  0xe0   : > { %1050 = vmatpush.msra.mxu3 %v1049_v2 }
  0xe2   : > { %1056 = vmatpush.msra.mxu3 %v1055_v7 }
  0xe4   : > { %1062 = vmatpush.msra.mxu3 %v1061_v14 }
  0xe6   : > { %1068 = vmatpush.msra.mxu3 %v1067_v19 }
 0x13b   : > { %v640_v0 = vpop.f32.mrf.mxu0  ;;  %v670_v13 = vpop.f32.mrf.mxu1 }
 0x13f   : > { %v571_v41 = vpop.f32.mrf.mxu2 }
 0x143   : > { %v645_v27 = vpop.f32.mrf.mxu0  ;;  %v676_v35 = vpop.f32.mrf.mxu1 }
 0x147   : > { %v610_v51 = vpop.f32.mrf.mxu3  ;;  %v579_v53 = vpop.f32.mrf.mxu2 }
 0x148   : > { %v611_v6 = vadd.f32 %v610_v51, %v571_v41 }
 0x14a   : > { %v641_v16 = vadd.f32 %v640_v0, %v611_v6  ;;  %v994_v6 = vsel %vm767_vm9, %v1473_v1, 0 }
 0x14c   : > { %v671_v25 = vadd.f32 %v670_v13, %v641_v16 }
 0x14f   : > { %v614_v12 = vpop.f32.mrf.mxu3  ;;  %v703_v17 = vpop.f32.mrf.mxu2 }
 0x150   : > { %v615_v24 = vadd.f32 %v614_v12, %v579_v53  ;;  %v704_v28 = vadd.f32 %v703_v17, %v671_v25  ;;  %v760_v53 = vsel %vm1574_vm10, %v1536_v63, %v756_v38  ;;  %v1019_v12 = vsub.f32 %v1017_v3, %v1018_v11 }
 0x151   : > { %v765_v0 = vsel %vm762_vm11, %v764_v50, %v760_v53 }
 0x152   : > { %v646_v33 = vadd.f32 %v645_v27, %v615_v24 }
 0x154   : > { %v677_v46 = vadd.f32 %v676_v35, %v646_v33 }
 0x157   : > { %v730_v31 = vpop.f32.mrf.mxu3  ;;  %v707_v40 = vpop.f32.mrf.mxu2 }
 0x158   : > { %v731_v32 = vadd.f32 %v730_v31, %v704_v28  ;;  %v708_v51 = vadd.f32 %v707_v40, %v677_v46 }
 0x15a   : > { %v751_v37 = vmul.f32 %v750_v34, %v731_v32 }
 0x15c   : > { %v769_v44 = vsel %vm767_vm9, %v751_v37, 0 }
 0x15d   : > { %v794_v49 = vand.u32 4294901760, %v769_v44 }
 0x15f   : > { %v795_v57 = vsub.f32 %v769_v44, %v794_v49  ;;  %v734_v58 = vpop.f32.mrf.mxu3  ;;  %848 = vmatmul.f32.vlgmr.msrb.gmra.mxu1 %v794_v49 }
 0x160   : > { %v735_v62 = vadd.f32 %v734_v58, %v708_v51  ;;  %1126 = vmatpush.msrb.mxu1 %v1499_v45 }
 0x161   : > { %882 = vmatmul.f32.vlgmr.msrb.gmra.mxu2 %v795_v57  ;;  %v796_v52 = vand.u32 4294901760, %v795_v57 }
 0x162   : > { %v766_v2 = vmul.f32 %v765_v0, %v735_v62  ;;  %1128 = vmatpush.msrb.mxu1 %v1509_v48  ;;  %1161 = vmatpush.msrb.mxu2 %v1047_v54  ;;  %v1024_v54 = vand.u32 4294901760, %v994_v6 }
 0x163   : > { %914 = vmatmul.f32.vlgmr.msrb.gmra.mxu3 %v796_v52  ;;  %v797_v63 = vsub.f32 %v795_v57, %v796_v52 }
 0x164   : > { %v772_v7 = vsel %vm767_vm9, %v766_v2, 0  ;;  %1130 = vmatpush.msrb.mxu1 %v1518_v55  ;;  %1165 = vmatpush.msrb.mxu2 %v1053_v59 }
 0x165   : > { %v802_v8 = vand.u32 4294901760, %v772_v7  ;;  %v798_v10 = vand.u32 4294901760, %v797_v63  ;;  %1196 = vmatpush.msrb.mxu3 %v1499_v45 }
 0x166   : > { %1132 = vmatpush.msrb.mxu1 %v1531_v60  ;;  %1169 = vmatpush.msrb.mxu2 %v1059_v4  ;;  %v1025_v4 = vsub.f32 %v994_v6, %v1024_v54 }
 0x167   : > { %799 = vmatmul.f32.vlgmr.msrb.gmra.mxu0 %v798_v10  ;;  %852 = vmatmul.f32.gmra.mxu1 %v802_v8  ;;  %v803_v1 = vsub.f32 %v772_v7, %v802_v8 }
 0x168   : > { %1198 = vmatpush.msrb.mxu3 %v1509_v48  ;;  %1092 = vmatpush.msrb.mxu0 %v1507_v47  ;;  %v1020_v47 = vand.u32 4294901760, %v1019_v12  ;;  %v1026_v48 = vand.u32 4294901760, %v1025_v4 }
 0x169   : > { %887 = vmatmul.f32.gmra.mxu2 %v803_v1  ;;  %v804_v59 = vand.u32 4294901760, %v803_v1 }
 0x16a   : > { %1173 = vmatpush.msrb.mxu2 %v1065_v9  ;;  %1200 = vmatpush.msrb.mxu3 %v1518_v55  ;;  %v1027_v55 = vsub.f32 %v1025_v4, %v1026_v48 }
 0x16b   : > { %920 = vmatmul.f32.gmra.mxu3 %v804_v59  ;;  %v805_v45 = vsub.f32 %v803_v1, %v804_v59  ;;  %1095 = vmatpush.msrb.mxu0 %v1521_v56 }
 0x16c   : > { %1202 = vmatpush.msrb.mxu3 %v1531_v60  ;;  %v1028_v9 = vand.u32 4294901760, %v1027_v55 }
 0x16d   : > { %v806_v13 = vand.u32 4294901760, %v805_v45  ;;  %1098 = vmatpush.msrb.mxu0 %v1534_v61 }
 0x16f   : > { %807 = vmatmul.f32.gmra.mxu0 %v806_v13  ;;  %982 = vmatmul.f32.vlgmr.msra.gmra.mxu1 %v794_v49 }
 0x170   : > { %1101 = vmatpush.msrb.mxu0 %v1544_v5 }
 0x171   : > { %1021 = vmatmul.f32.vlgmr.msra.gmra.mxu2 %v1020_v47 }
 0x173   : > { %1070 = vmatmul.f32.vlgmr.msra.gmra.mxu3 %v1016_v42 }
 0x177   : > { %953 = vmatmul.f32.vlgmr.msra.gmra.mxu0 %v794_v49  ;;  %986 = vmatmul.f32.gmra.mxu1 %v802_v8 }
 0x179   : > { %1029 = vmatmul.f32.gmra.mxu2 %v1028_v9 }
 0x17b   : > { %1074 = vmatmul.f32.gmra.mxu3 %v1024_v54 }
 0x17f   : > { %957 = vmatmul.f32.gmra.mxu0 %v802_v8  ;;  %1136 = vmatmul.f32.vlgmr.msrb.gmra.mxu1 %v1018_v11 }
 0x181   : > { %1175 = vmatmul.f32.vlgmr.msrb.gmra.mxu2 %v1016_v42 }
 0x183   : > { %1204 = vmatmul.f32.vlgmr.msrb.gmra.mxu3 %v1016_v42 }
 0x187   : > { %1104 = vmatmul.f32.vlgmr.msrb.gmra.mxu0 %v1017_v3  ;;  %1142 = vmatmul.f32.gmra.mxu1 %v1026_v48 }
 0x189   : > { %1179 = vmatmul.f32.gmra.mxu2 %v1024_v54 }
 0x18b   : > { %1208 = vmatmul.f32.gmra.mxu3 %v1024_v54 }
 0x18f   : > { %1109 = vmatmul.f32.gmra.mxu0 %v1025_v4 }
 0x1dc   : > { %v849_v56 = vpop.f32.mrf.mxu1 }
 0x1e4   : > { %v800_v60 = vpop.f32.mrf.mxu0  ;;  %v883_v61 = vpop.f32.mrf.mxu2 }
 0x1e5   : > { %v853_v5 = vpop.f32.mrf.mxu1  ;;  %v850_v16 = vadd.f32 %v849_v56, %v800_v60 }
 0x1e6   : > { %v915_v14 = vpop.f32.mrf.mxu3 }
 0x1e7   : > { %v884_v20 = vadd.f32 %v883_v61, %v850_v16 }
 0x1e9   : > { %v916_v22 = vadd.f32 %v915_v14, %v884_v20 }
 0x1ec   : > { %v808_v15 = vpop.f32.mrf.mxu0  ;;  %v888_v17 = vpop.f32.mrf.mxu2 }
 0x1ed   : > { %v983_v19 = vpop.f32.mrf.mxu1  ;;  %v854_v23 = vadd.f32 %v853_v5, %v808_v15 }
 0x1ee   : > { %v921_v18 = vpop.f32.mrf.mxu3 }
 0x1ef   : > { %v889_v27 = vadd.f32 %v888_v17, %v854_v23 }
 0x1f1   : > { %v922_v31 = vadd.f32 %v921_v18, %v889_v27 }
 0x1f4   : > { %v954_v21 = vpop.f32.mrf.mxu0  ;;  %v1022_v24 = vpop.f32.mrf.mxu2 }
 0x1f5   : > { %v955_v26 = vadd.f32 %v954_v21, %v916_v22  ;;  %v987_v28 = vpop.f32.mrf.mxu1 }
 0x1f6   : > { %v1071_v25 = vpop.f32.mrf.mxu3 }
 0x1f7   : > { %v984_v29 = vadd.f32 %v983_v19, %v955_v26 }
 0x1f9   : > { %v1023_v34 = vadd.f32 %v1022_v24, %v984_v29 }
 0x1fb   : > { %v1072_v36 = vadd.f32 %v1071_v25, %v1023_v34 }
 0x1fc   : > { %v958_v30 = vpop.f32.mrf.mxu0  ;;  %v1030_v32 = vpop.f32.mrf.mxu2 }
 0x1fd   : > { %v959_v35 = vadd.f32 %v958_v30, %v922_v31  ;;  %v1137_v38 = vpop.f32.mrf.mxu1 }
 0x1fe   : > { %v1075_v33 = vpop.f32.mrf.mxu3 }
 0x1ff   : > { %v988_v37 = vadd.f32 %v987_v28, %v959_v35 }
 0x201   : > { %v1031_v43 = vadd.f32 %v1030_v32, %v988_v37 }
 0x203   : > { %v1076_v50 = vadd.f32 %v1075_v33, %v1031_v43 }
 0x204   : > { %v1105_v39 = vpop.f32.mrf.mxu0  ;;  %v1176_v41 = vpop.f32.mrf.mxu2 }
 0x205   : > { %v1106_v40 = vadd.f32 %v1105_v39, %v1072_v36  ;;  %v1143_v58 = vpop.f32.mrf.mxu1 }
 0x206   : > { %v1205_v46 = vpop.f32.mrf.mxu3 }
 0x207   : > { %v1138_v44 = vadd.f32 %v1137_v38, %v1106_v40 }
 0x209   : > { %v1177_v49 = vadd.f32 %v1176_v41, %v1138_v44 }
 0x20b   : > { %v1206_v51 = vadd.f32 %v1205_v46, %v1177_v49 }
 0x20c   : > { %v1110_v53 = vpop.f32.mrf.mxu0  ;;  %v1180_v52 = vpop.f32.mrf.mxu2 }
 0x20d   : > { %vm1212_vm12 = vcmp.gt.f32.partialorder %v1206_v51, 0.0  ;;  %v1214_v42 = vmul.f32 0.01, %v1206_v51  ;;  %v1111_v57 = vadd.f32 %v1110_v53, %v1076_v50 }
 0x20e   : > { %v1209_v3 = vpop.f32.mrf.mxu3 }
 0x20f   : > { %v1216_v62 = vsel %vm1212_vm12, %v1206_v51, %v1214_v42  ;;  %v1144_v0 = vadd.f32 %v1143_v58, %v1111_v57 }
 0x210   : > { %1218 = vst.msk [vmem:[%s309_s12] sm:$0xff] %vm767_vm9, %v1216_v62  ;;  %v1231_v7 = vmul.f32 %v1216_v62, %v1216_v62  ;;  %v1220_v10 = vsel %vm767_vm9, %v1216_v62, 0.0 }
 0x211   : > { %v1181_v2 = vadd.f32 %v1180_v52, %v1144_v0 }
 0x212   : > { %v1233_v59 = vsel %vm767_vm9, %v1231_v7, 0.0 }
 0x213   : > { %v1210_v63 = vadd.f32 %v1209_v3, %v1181_v2 }
 0x215   : > { %vm1213_vm13 = vcmp.gt.f32.partialorder %v1210_v63, 0.0  ;;  %v1215_v6 = vmul.f32 0.01, %v1210_v63 }
 0x217   : > { %v1217_v8 = vsel %vm1213_vm13, %v1210_v63, %v1215_v6 }
 0x218   : > { %1219 = vst.msk [vmem:[%s309_s12 + $0x8] sm:$0xff] %vm767_vm9, %v1217_v8  ;;  %v1221_v54 = vsel %vm767_vm9, %v1217_v8, 0.0  ;;  %v1232_v1 = vmul.f32 %v1217_v8, %v1217_v8 }
 0x219   : > { %v1222_v11 = vadd.f32 %v1221_v54, %v1220_v10 }
 0x21a   : > { %v1234_v45 = vsel %vm767_vm9, %v1232_v1, 0.0 }
 0x21b   : > { %v1223_v12 = vrot.slane %v1222_v11, 4  ;;  %v1235_v4 = vadd.f32 %v1234_v45, %v1233_v59 }
 0x21d   : > { %v1224_v13 = vadd.f32 %v1223_v12, %v1222_v11  ;;  %v1236_v47 = vrot.slane %v1235_v4, 4 }
 0x21f   : > { %v1225_v48 = vrot.slane %v1224_v13, 2  ;;  %v1237_v55 = vadd.f32 %v1236_v47, %v1235_v4 }
 0x221   : > { %v1226_v9 = vadd.f32 %v1225_v48, %v1224_v13  ;;  %v1238_v56 = vrot.slane %v1237_v55, 2 }
 0x223   : > { %v1227_v60 = vrot.slane %v1226_v9, 1  ;;  %v1239_v61 = vadd.f32 %v1238_v56, %v1237_v55 }
 0x225   : > { %v1228_v5 = vadd.f32 %v1227_v60, %v1226_v9  ;;  %v1240_v14 = vrot.slane %v1239_v61, 1 }
 0x227   : > { %1230 = vst.msk [vmem:[%s312_s14] sm:$0x1] %vm1229_vm14, %v1228_v5  ;;  %v1241_v15 = vadd.f32 %v1240_v14, %v1239_v61 }
 0x229   : > { %1242 = vst.msk [vmem:[%s315_s17] sm:$0x1] %vm1229_vm14, %v1241_v15 }
 0x22a PF: > { %s18_s24 = sadd.s32 1, %s1394_s24  }
 0x22b   : > { %p15_p4 = scmp.ge.s32.totalorder %s18_s24, 4  }
 0x22d   :  { %17 = sbr.rel (!%p15_p4) target bundleno = 1 (0x1), region = 97 }

// kernel: graphsage_forward.5
= control target key start
LH: loop header
LB: loop body
LE: loop exit
PB: predicated region body
PF: predicated region fallthrough
CT: control target
= control target key end

     0   :  { %s1609_s13 = smov 0   ;;  %s1856_s0 = inlined_call_operand.vmem [shape: f32[2,16,32], index: 0, kind: input, shape index: {}]   ;;  %s1857_s1 = inlined_call_operand.vmem [shape: f32[2,1,32], index: 1, kind: input, shape index: {}]   ;;  %s1858_s2 = inlined_call_operand.vmem [shape: f32[2,1,32], index: 2, kind: input, shape index: {}]   ;;  %s1859_s3 = inlined_call_operand.vmem [shape: f32[2,32], index: 3, kind: input, shape index: {}]   ;;  %s1860_s4 = inlined_call_operand.vmem [shape: f32[2,16,16], index: 4, kind: input, shape index: {}]   ;;  %s1861_s5 = inlined_call_operand.vmem [shape: f32[32,32], index: 5, kind: input, shape index: {}]   ;;  %s1862_s6 = inlined_call_operand.vmem [shape: f32[32,32], index: 6, kind: input, shape index: {}]   ;;  %s1863_s7 = inlined_call_operand.vmem [shape: f32[32,32], index: 7, kind: input, shape index: {}]   ;;  %s1864_s8 = inlined_call_operand.vmem [shape: f32[2,16,32], index: 8, kind: output, shape index: {0}]   ;;  %s1865_s9 = inlined_call_operand.vmem [shape: f32[2,1,32], index: 9, kind: output, shape index: {1}]   ;;  %s1866_s10 = inlined_call_operand.vmem [shape: f32[2,1,32], index: 10, kind: output, shape index: {2}]  }
   0x1 LB: > { %s1512_s14 = sadd.s32 4294967295, %s1551_s13   ;;  %p1516_p0 = scmp.ge.s32.totalorder %s1551_s13, 1  ;;  %s1551_s13 = sphi %s1609_s13, %s21_s13  }
   0x2   : > { %p327_p1 = scmp.lt.s32.totalorder %s1551_s13, 3 }
   0x4   : > { %p328_p2 = pnand %p1516_p0, %p327_p1 }
   0x5   : > { %p376_p3 = scmp.lt.s32.totalorder (!%p328_p2), %s1512_s14, 1 }
   0x6   : > { %331 = sbr.rel (%p328_p2) target bundleno = 601 (0x259), region = 52 }
   0xb   : > { %v448_v0 = vld [vmem:[%s1861_s5 + $0x18] sm:$0xff]  ;;  %v447_v1 = vld [vmem:[%s1861_s5 + $0x10] sm:$0xff]  ;;  %v446_v2 = vld [vmem:[%s1861_s5 + $0x8] sm:$0xff]  ;;  %v1553_v5 = vmov 32.0   ;;  %vm399_vm0 = vcmask 253952   ;;  %s1872_s14 = smov (!%p376_p3, %s1512_s14), 1 }
   0xc   : > { %v1626_v3 = vand.u32 4294901760, %v448_v0  ;;  %v1628_v4 = vand.u32 4294901760, %v447_v1  ;;  %1537 = vrcp.f32 %v1553_v5  ;;  %v445_v6 = vld [vmem:[%s1861_s5] sm:$0xff]  ;;  %v1637_v9 = vand.u32 4294901760, %v446_v2  ;;  %s1674_s11 = sshll.u32 %s1872_s14, 4  ;;  %s393_s25 = scalar_lea.vmem %s1865_s9, %s1872_s14 }
   0xd   : > { %v1640_v12 = vand.u32 4294901760, %v445_v6  ;;  %v397_v13 = vld [vmem:[%s1857_s1] sm:$0x1]  ;;  %v398_v18 = vld [vmem:[%s1857_s1 + $0x1] sm:$0x1]  ;;  %s380_s16 = scalar_lea.vmem %s1856_s0, %s1674_s11  ;;  %vm457_vm5 = vcmask 261120   ;;  %s385_s21 = scalar_lea.vmem %s1860_s4, %s1674_s11 }
   0xe   : > { %v514_v7 = vsub.f32 %v448_v0, %v1626_v3  ;;  %v520_v8 = vsub.f32 %v447_v1, %v1628_v4  ;;  %594 = vmatpush.msra.mxu3 %v1626_v3  ;;  %477 = vmatpush.msra.mxu0 %v1626_v3  ;;  %v526_v16 = vsub.f32 %v446_v2, %v1637_v9  ;;  %v403_v19 = vld [vmem:[%s1858_s2] sm:$0x1]  ;;  %v404_v20 = vld [vmem:[%s1858_s2 + $0x1] sm:$0x1]  ;;  %v400_v25 = vsel %vm399_vm0, %v397_v13, 0.0  ;;  %v409_v55 = vld [vmem:[%s380_s16 + $0x8] sm:$0xff]  ;;  %s390_s23 = scalar_lea.vmem %s1864_s8, %s1674_s11  ;;  %s396_s28 = scalar_lea.vmem %s1866_s10, %s1872_s14 }
   0xf   : > { %v532_v24 = vsub.f32 %v445_v6, %v1640_v12  ;;  %v401_v26 = vsel %vm399_vm0, %v398_v18, 0.0  ;;  %v405_v27 = vsel %vm399_vm0, %v403_v19, 0.0  ;;  %v406_v28 = vsel %vm399_vm0, %v404_v20, 0.0  ;;  %v408_v52 = vld [vmem:[%s380_s16] sm:$0xff] }
  0x10   : > { %560 = vmatpush.msra.mxu2 %v514_v7  ;;  %v515_v10 = vand.u32 4294901760, %v514_v7  ;;  %596 = vmatpush.msra.mxu3 %v1628_v4  ;;  %v521_v11 = vand.u32 4294901760, %v520_v8  ;;  %v402_v31 = vadd.f32 %v401_v26, %v400_v25  ;;  %v407_v32 = vadd.f32 %v406_v28, %v405_v27  ;;  %v410_v53 = vld [vmem:[%s1859_s3] sm:$0x3] }
  0x11   : > { %479 = vmatpush.msra.mxu0 %v1628_v4  ;;  %v527_v39 = vand.u32 4294901760, %v526_v16  ;;  %v533_v42 = vand.u32 4294901760, %v532_v24  ;;  %v440_v61 = vperm.slane %v410_v53, 1  ;;  %vm686_vm6 = vcmask 130048  }
  0x12   : > { %v1538_v14 = vpop.eup %1537  ;;  %563 = vmatpush.msra.mxu2 %v520_v8  ;;  %v516_v15 = vsub.f32 %v514_v7, %v515_v10  ;;  %v522_v17 = vsub.f32 %v520_v8, %v521_v11  ;;  %598 = vmatpush.msra.mxu3 %v1637_v9 }
  0x13   : > { %v412_v21 = vmul.f32 32.0, %v1538_v14  ;;  %481 = vmatpush.msra.mxu0 %v1637_v9  ;;  %vm416_vm1 = vweird.f32 %v1538_v14  ;;  %v528_v41 = vsub.f32 %v526_v16, %v527_v39  ;;  %v534_v44 = vsub.f32 %v532_v24, %v533_v42 }
  0x14   : > { %v517_v22 = vand.u32 4294901760, %v516_v15  ;;  %566 = vmatpush.msra.mxu2 %v526_v16  ;;  %v523_v23 = vand.u32 4294901760, %v522_v17  ;;  %600 = vmatpush.msra.mxu3 %v1640_v12 }
  0x15   : > { %v413_v29 = vsub.f32 1.0, %v412_v21  ;;  %483 = vmatpush.msra.mxu0 %v1640_v12  ;;  %v529_v43 = vand.u32 4294901760, %v528_v41  ;;  %v535_v45 = vand.u32 4294901760, %v534_v44 }
  0x16   : > { %518 = vmatpush.msra.mxu1 %v517_v22  ;;  %569 = vmatpush.msra.mxu2 %v532_v24  ;;  %v443_v22 = vld [vmem:[%s385_s21] sm:$0xff] }
  0x17   : > { %v414_v30 = vmul.f32 %v1538_v14, %v413_v29  ;;  %629 = vmatpush.msrb.mxu0 %v515_v10  ;;  %v696_v24 = vsel %vm686_vm6, %v443_v22, 0  ;;  %v687_v27 = vsel %vm686_vm6, %v443_v22, 0.0 }
  0x18   : > { %524 = vmatpush.msra.mxu1 %v523_v23  ;;  %688 = vadd.xlane.f32.xlu0 %v687_v27 }
  0x19   : > { %v415_v33 = vadd.f32 %v1538_v14, %v414_v30  ;;  %633 = vmatpush.msrb.mxu0 %v521_v11 }
  0x1a   : > { %530 = vmatpush.msra.mxu1 %v529_v43 }
  0x1b   : > { %v417_v34 = vsel %vm416_vm1, %v1538_v14, %v415_v33  ;;  %637 = vmatpush.msrb.mxu0 %v527_v39 }
  0x1c   : > { %v418_v35 = vmul.f32 %v417_v34, %v402_v31  ;;  %v419_v36 = vmul.f32 %v417_v34, %v407_v32  ;;  %536 = vmatpush.msra.mxu1 %v535_v45  ;;  %v719_v31 = vand.u32 4294901760, %v696_v24  ;;  %v444_v34 = vld [vmem:[%s385_s21 + $0x8] sm:$0xff] }
  0x1d   : > { %641 = vmatpush.msrb.mxu0 %v533_v42  ;;  %v690_v41 = vsel %vm686_vm6, %v444_v34, 0.0 }
  0x1e   : > { %v420_v37 = vmul.f32 %v418_v35, %v418_v35  ;;  %664 = vmatpush.msrb.mxu1 %v1626_v3  ;;  %v433_v51 = vperm.slane %v418_v35, 0 }
  0x20   : > { %v421_v38 = vsub.f32 %v419_v36, %v420_v37  ;;  %666 = vmatpush.msrb.mxu1 %v1628_v4  ;;  %v434_v57 = vsub.f32 %v408_v52, %v433_v51  ;;  %v435_v59 = vsub.f32 %v409_v55, %v433_v51  ;;  %v720_v37 = vsub.f32 %v696_v24, %v719_v31 }
  0x21   : > { %691 = vadd.xlane.f32.xlu0 %v690_v41 }
  0x22   : > { %v422_v40 = vadd.f32 1e-05, %v421_v38  ;;  %668 = vmatpush.msrb.mxu1 %v1637_v9  ;;  %v699_v38 = vsel %vm686_vm6, %v444_v34, 0  ;;  %v721_v45 = vand.u32 4294901760, %v720_v37  ;;  %v451_v34 = vld [vmem:[%s1862_s6 + $0x10] sm:$0xff] }
  0x24   : > { %1539 = vrsqrt.f32 %v422_v40  ;;  %vm429_vm2 = vweird.f32 %v422_v40  ;;  %670 = vmatpush.msrb.mxu1 %v1640_v12 }
  0x2a   : > { %v1540_v46 = vpop.eup %1539 }
  0x2b   : > { %v424_v47 = vmul.f32 %v1540_v46, %v422_v40  ;;  %vm430_vm3 = vweird.f32 %v1540_v46 }
  0x2c   : > { %vm431_vm4 = vmor %vm429_vm2, %vm430_vm3 }
  0x2d   : > { %v425_v48 = vmul.f32 %v1540_v46, %v424_v47 }
  0x2f   : > { %v426_v49 = vmul.f32 0.5, %v425_v48 }
  0x31   : > { %v427_v50 = vsub.f32 1.5, %v426_v49 }
  0x33   : > { %v428_v54 = vmul.f32 %v1540_v46, %v427_v50  ;;  %v722_v50 = vsub.f32 %v720_v37, %v721_v45 }
  0x35   : > { %v432_v56 = vsel %vm431_vm4, %v1540_v46, %v428_v54  ;;  %v727_v46 = vand.u32 4294901760, %v699_v38  ;;  %v723_v55 = vand.u32 4294901760, %v722_v50 }
  0x36   : > { %v436_v58 = vmul.f32 %v432_v56, %v410_v53 }
  0x37   : > { %v728_v51 = vsub.f32 %v699_v38, %v727_v46  ;;  %v450_v38 = vld [vmem:[%s1862_s6 + $0x8] sm:$0xff] }
  0x38   : > { %v437_v60 = vperm.slane %v436_v58, 0 }
  0x39   : > { %v729_v56 = vand.u32 4294901760, %v728_v51 }
  0x3a   : > { %v438_v62 = vmul.f32 %v437_v60, %v434_v57  ;;  %v439_v63 = vmul.f32 %v437_v60, %v435_v59 }
  0x3b   : > { %v730_v60 = vsub.f32 %v728_v51, %v729_v56 }
  0x3c   : > { %v441_v0 = vadd.f32 %v440_v61, %v438_v62  ;;  %v442_v1 = vadd.f32 %v440_v61, %v439_v63 }
  0x3e   : > { %v459_v2 = vsel %vm457_vm5, %v441_v0, 0  ;;  %v462_v3 = vsel %vm457_vm5, %v442_v1, 0  ;;  %v731_v0 = vand.u32 4294901760, %v730_v60 }
  0x3f   : > { %v484_v4 = vand.u32 4294901760, %v459_v2  ;;  %v492_v5 = vand.u32 4294901760, %v462_v3 }
  0x41   : > { %v485_v6 = vsub.f32 %v459_v2, %v484_v4  ;;  %538 = vmatmul.f32.vlgmr.msra.gmra.mxu1 %v484_v4  ;;  %v493_v7 = vsub.f32 %v462_v3, %v492_v5  ;;  %v456_v2 = vld [vmem:[%s1863_s7 + $0x18] sm:$0xff] }
  0x42   : > { %v939_v3 = vand.u32 4294901760, %v456_v2 }
  0x43   : > { %572 = vmatmul.f32.vlgmr.msra.gmra.mxu2 %v485_v6  ;;  %v486_v8 = vand.u32 4294901760, %v485_v6  ;;  %v494_v10 = vand.u32 4294901760, %v493_v7 }
  0x45   : > { %604 = vmatmul.f32.vlgmr.msra.gmra.mxu3 %v486_v8  ;;  %v487_v9 = vsub.f32 %v485_v6, %v486_v8  ;;  %v495_v12 = vsub.f32 %v493_v7, %v494_v10 }
  0x47   : > { %v488_v11 = vand.u32 4294901760, %v487_v9  ;;  %v496_v13 = vand.u32 4294901760, %v495_v12  ;;  %v453_v12 = vld [vmem:[%s1863_s7] sm:$0xff] }
  0x49   : > { %489 = vmatmul.f32.vlgmr.msra.gmra.mxu0 %v488_v11  ;;  %542 = vmatmul.f32.gmra.mxu1 %v492_v5 }
  0x4b   : > { %577 = vmatmul.f32.gmra.mxu2 %v493_v7  ;;  %v454_v7 = vld [vmem:[%s1863_s7 + $0x8] sm:$0xff] }
  0x4d   : > { %610 = vmatmul.f32.gmra.mxu3 %v494_v10  ;;  %v943_v10 = vand.u32 4294901760, %v454_v7 }
  0x51   : > { %497 = vmatmul.f32.gmra.mxu0 %v496_v13  ;;  %672 = vmatmul.f32.vlgmr.msrb.gmra.mxu1 %v484_v4 }
  0x59   : > { %643 = vmatmul.f32.vlgmr.msrb.gmra.mxu0 %v484_v4  ;;  %676 = vmatmul.f32.gmra.mxu1 %v492_v5  ;;  %v455_v4 = vld [vmem:[%s1863_s7 + $0x10] sm:$0xff] }
  0x5a   : > { %v941_v6 = vand.u32 4294901760, %v455_v4 }
  0x5c   : > { %v983_v9 = vsub.f32 %v455_v4, %v941_v6 }
  0x61   : > { %647 = vmatmul.f32.gmra.mxu0 %v492_v5  ;;  %v977_v5 = vsub.f32 %v456_v2, %v939_v3 }
  0x63   : > { %v978_v8 = vand.u32 4294901760, %v977_v5 }
  0x65   : > { %v979_v13 = vsub.f32 %v977_v5, %v978_v8 }
  0x8b   : > { %v689_v11 = vpop.xlane.xlu0 %688 }
  0xbe   : > { %v539_v14 = vpop.f32.mrf.mxu1 }
  0xc6   : > { %v490_v15 = vpop.f32.mrf.mxu0  ;;  %v573_v16 = vpop.f32.mrf.mxu2 }
  0xc7   : > { %v543_v17 = vpop.f32.mrf.mxu1  ;;  %v540_v18 = vadd.f32 %v539_v14, %v490_v15  ;;  %v984_v14 = vand.u32 4294901760, %v983_v9  ;;  %v989_v15 = vsub.f32 %v454_v7, %v943_v10 }
  0xc8   : > { %v605_v20 = vpop.f32.mrf.mxu3 }
  0xc9   : > { %v574_v21 = vadd.f32 %v573_v16, %v540_v18  ;;  %v945_v16 = vand.u32 4294901760, %v453_v12  ;;  %v985_v18 = vsub.f32 %v983_v9, %v984_v14 }
  0xcb   : > { %v606_v25 = vadd.f32 %v605_v20, %v574_v21  ;;  %v995_v20 = vsub.f32 %v453_v12, %v945_v16  ;;  %v1715_v21 = vadd.f32 1e-06, %v689_v11  ;;  %v986_v22 = vand.u32 4294901760, %v985_v18 }
  0xcd   : > { %v996_v24 = vand.u32 4294901760, %v995_v20  ;;  %1541 = vrcp.f32 %v1715_v21  ;;  %vm896_vm9 = vweird.f32 %v1715_v21 }
  0xce   : > { %v498_v19 = vpop.f32.mrf.mxu0  ;;  %v578_v28 = vpop.f32.mrf.mxu2 }
  0xcf   : > { %v673_v23 = vpop.f32.mrf.mxu1  ;;  %v544_v26 = vadd.f32 %v543_v17, %v498_v19  ;;  %v980_v17 = vand.u32 4294901760, %v979_v13  ;;  %v990_v19 = vand.u32 4294901760, %v989_v15 }
  0xd0   : > { %v611_v35 = vpop.f32.mrf.mxu3 }
  0xd1   : > { %v579_v32 = vadd.f32 %v578_v28, %v544_v26  ;;  %v997_v26 = vsub.f32 %v995_v20, %v996_v24  ;;  %v692_v28 = vpop.xlane.xlu0 %691 }
  0xd3   : > { %v612_v39 = vadd.f32 %v611_v35, %v579_v32  ;;  %v998_v27 = vand.u32 4294901760, %v997_v26  ;;  %v1723_v32 = vpop.eup %1541 }
  0xd4   : > { %vm897_vm10 = vweird.f32 %v1723_v32 }
  0xd5   : > { %vm1787_vm11 = vmor %vm896_vm9, %vm897_vm10 }
  0xd6   : > { %v644_v29 = vpop.f32.mrf.mxu0 }
  0xd7   : > { %v645_v30 = vadd.f32 %v644_v29, %v606_v25  ;;  %v677_v43 = vpop.f32.mrf.mxu1 }
  0xd9   : > { %v674_v33 = vadd.f32 %v673_v23, %v645_v30  ;;  %v991_v23 = vsub.f32 %v989_v15, %v990_v19  ;;  %v1718_v30 = vadd.f32 1e-06, %v692_v28 }
  0xdb   : > { %vm680_vm7 = vcmp.gt.f32.partialorder %v674_v33, 0.0  ;;  %v682_v36 = vmul.f32 0.01, %v674_v33  ;;  %v992_v25 = vand.u32 4294901760, %v991_v23  ;;  %1543 = vrcp.f32 %v1718_v30 }
  0xdc   : > { %vm911_vm13 = vweird.f32 %v1718_v30 }
  0xdd   : > { %v1694_v40 = vsel %vm680_vm7, %v674_v33, %v682_v36  ;;  %v1735_v36 = vand.u32 4294901760, %v451_v34 }
  0xde   : > { %v648_v42 = vpop.f32.mrf.mxu0  ;;  %v717_v47 = vand.u32 4294901760, %v1694_v40 }
  0xdf   : > { %v649_v44 = vadd.f32 %v648_v42, %v612_v39 }
  0xe0   : > { %v757_v52 = vsub.f32 %v1694_v40, %v717_v47 }
  0xe1   : > { %v678_v48 = vadd.f32 %v677_v43, %v649_v44  ;;  %v1744_v43 = vand.u32 4294901760, %v450_v38  ;;  %v1747_v44 = vsub.f32 %v451_v34, %v1735_v36 }
  0xe2   : > { %v758_v58 = vand.u32 4294901760, %v757_v52 }
  0xe3   : > { %vm681_vm8 = vcmp.gt.f32.partialorder %v678_v48, 0.0  ;;  %v683_v49 = vmul.f32 0.01, %v678_v48 }
  0xe4   : > { %v759_v62 = vsub.f32 %v757_v52, %v758_v58 }
  0xe5   : > { %v1699_v53 = vsel %vm681_vm8, %v678_v48, %v683_v49  ;;  %v1760_v49 = vsub.f32 %v450_v38, %v1744_v43 }
  0xe6   : > { %v715_v54 = vand.u32 4294901760, %v1699_v53  ;;  %v760_v1 = vand.u32 4294901760, %v759_v62 }
  0xe8   : > { %v751_v57 = vsub.f32 %v1699_v53, %v715_v54  ;;  %716 = vmatpush.msrb.mxu2 %v715_v54  ;;  %817 = vmatpush.msra.mxu1 %v715_v54 }
  0xea   : > { %718 = vmatpush.msrb.mxu2 %v717_v47  ;;  %787 = vmatpush.msra.mxu0 %v751_v57  ;;  %v752_v59 = vand.u32 4294901760, %v751_v57 }
  0xeb   : > { %819 = vmatpush.msra.mxu1 %v717_v47  ;;  %724 = vmatmul.f32.vlgmr.msrb.gmra.mxu2 %v723_v55 }
  0xec   : > { %790 = vmatpush.msra.mxu0 %v757_v52  ;;  %850 = vmatpush.msra.mxu2 %v752_v59  ;;  %v753_v61 = vsub.f32 %v751_v57, %v752_v59 }
  0xed   : > { %793 = vmatmul.f32.vlgmr.msra.gmra.mxu0 %v720_v37  ;;  %823 = vmatmul.f32.vlgmr.msra.gmra.mxu1 %v721_v45  ;;  %v892_v37 = vmul.f32 %v1723_v32, %v1715_v21  ;;  %v449_v45 = vld [vmem:[%s1862_s6] sm:$0xff] }
  0xee   : > { %854 = vmatpush.msra.mxu2 %v758_v58  ;;  %v754_v63 = vand.u32 4294901760, %v753_v61  ;;  %940 = vmatpush.msrb.mxu0 %v939_v3  ;;  %v1757_v48 = vand.u32 4294901760, %v449_v45 }
  0xef   : > { %981 = vmatpush.msrb.mxu1 %v980_v17  ;;  %v893_v50 = vsub.f32 1.0, %v892_v37 }
  0xf0   : > { %755 = vmatpush.msrb.mxu3 %v754_v63  ;;  %1023 = vmatpush.msrb.mxu2 %v977_v5  ;;  %v1770_v57 = vsub.f32 %v449_v45, %v1757_v48 }
  0xf1   : > { %942 = vmatpush.msrb.mxu0 %v941_v6  ;;  %987 = vmatpush.msrb.mxu1 %v986_v22  ;;  %v894_v63 = vmul.f32 %v1723_v32, %v893_v50 }
  0xf2   : > { %761 = vmatpush.msrb.mxu3 %v760_v1  ;;  %1026 = vmatpush.msrb.mxu2 %v983_v9  ;;  %v1218_v61 = vand.u32 4294901760, %v1770_v57 }
  0xf3   : > { %763 = vmatmul.f32.vlgmr.msrb.gmra.mxu3 %v719_v31  ;;  %732 = vmatmul.f32.gmra.mxu2 %v731_v0  ;;  %v895_v9 = vadd.f32 %v1723_v32, %v894_v63 }
  0xf4   : > { %879 = vmatpush.msra.mxu3 %v715_v54  ;;  %944 = vmatpush.msrb.mxu0 %v943_v10 }
  0xf5   : > { %798 = vmatmul.f32.gmra.mxu0 %v728_v51  ;;  %829 = vmatmul.f32.gmra.mxu1 %v729_v56  ;;  %v1762_v51 = vpop.eup %1543  ;;  %v1212_v56 = vand.u32 4294901760, %v1760_v49  ;;  %v899_v17 = vsel %vm1787_vm11, %v1723_v32, %v895_v9 }
  0xf6   : > { %881 = vmatpush.msra.mxu3 %v717_v47  ;;  %1029 = vmatpush.msrb.mxu2 %v989_v15  ;;  %v1206_v47 = vand.u32 4294901760, %v1747_v44  ;;  %v907_v62 = vmul.f32 %v1762_v51, %v1718_v30  ;;  %vm912_vm14 = vweird.f32 %v1762_v51 }
  0xf7   : > { %946 = vmatpush.msrb.mxu0 %v945_v16  ;;  %993 = vmatpush.msrb.mxu1 %v992_v25  ;;  %v1213_v60 = vsub.f32 %v1760_v49, %v1212_v56  ;;  %vm1800_vm15 = vmor %vm911_vm13, %vm912_vm14 }
  0xf8   : > { %1057 = vmatpush.msrb.mxu3 %v939_v3  ;;  %1032 = vmatpush.msrb.mxu2 %v995_v20  ;;  %v1207_v55 = vsub.f32 %v1747_v44, %v1206_v47 }
  0xf9   : > { %1092 = vmatpush.msra.mxu0 %v978_v8  ;;  %999 = vmatpush.msrb.mxu1 %v998_v27  ;;  %v1214_v2 = vand.u32 4294901760, %v1213_v60  ;;  %v908_v8 = vsub.f32 1.0, %v907_v62  ;;  %v915_v27 = vand.u32 2147483647, %v1718_v30 }
  0xfa   : > { %1059 = vmatpush.msrb.mxu3 %v941_v6  ;;  %v1208_v59 = vand.u32 4294901760, %v1207_v55 }
  0xfb   : > { %767 = vmatmul.f32.gmra.mxu3 %v727_v46  ;;  %856 = vmatmul.f32.vlgmr.msra.gmra.mxu2 %v719_v31  ;;  %v909_v18 = vmul.f32 %v1762_v51, %v908_v8  ;;  %vm916_vm1 = vcmp.eq.f32.partialorder %v915_v27, 8.507059e+37 }
  0xfc   : > { %1061 = vmatpush.msrb.mxu3 %v943_v10  ;;  %1096 = vmatpush.msra.mxu0 %v984_v14 }
  0xfd   : > { %1127 = vmatpush.msra.mxu1 %v939_v3  ;;  %v1219_v3 = vsub.f32 %v1770_v57, %v1218_v61  ;;  %v910_v26 = vadd.f32 %v1762_v51, %v909_v18 }
  0xfe   : > { %1063 = vmatpush.msrb.mxu3 %v945_v16  ;;  %1100 = vmatpush.msra.mxu0 %v990_v19 }
  0xff   : > { %1129 = vmatpush.msra.mxu1 %v941_v6  ;;  %v902_v6 = vand.u32 2147483648, %v1715_v21  ;;  %v1220_v7 = vand.u32 4294901760, %v1219_v3 }
 0x100   : > { %1104 = vmatpush.msra.mxu0 %v996_v24  ;;  %v917_v24 = vand.u32 2147483648, %v1718_v30 }
 0x101   : > { %1131 = vmatpush.msra.mxu1 %v943_v10  ;;  %v900_v10 = vand.u32 2147483647, %v1715_v21  ;;  %v903_v14 = vor.u32 1.1754944e-38, %v902_v6 }
 0x102   : > { %v918_v38 = vor.u32 1.1754944e-38, %v917_v24 }
 0x103   : > { %883 = vmatmul.f32.vlgmr.msra.gmra.mxu3 %v719_v31  ;;  %860 = vmatmul.f32.gmra.mxu2 %v727_v46  ;;  %v452_v31 = vld [vmem:[%s1862_s6 + $0x18] sm:$0xff]  ;;  %vm901_vm12 = vcmp.eq.f32.partialorder %v900_v10, 8.507059e+37 }
 0x104   : > { %v1725_v33 = vand.u32 4294901760, %v452_v31  ;;  %1133 = vmatpush.msra.mxu1 %v945_v16  ;;  %v904_v22 = vsel %vm901_vm12, %v903_v14, %v899_v17 }
 0x106   : > { %1162 = vmatpush.msra.mxu2 %v1725_v33  ;;  %v1733_v35 = vsub.f32 %v452_v31, %v1725_v33  ;;  %v1144_v31 = vsel %vm457_vm5, %v1694_v40, 0 }
 0x107   : > { %v1169_v30 = vand.u32 4294901760, %v1144_v31 }
 0x108   : > { %1164 = vmatpush.msra.mxu2 %v1735_v36  ;;  %v1200_v42 = vand.u32 4294901760, %v1733_v35 }
 0x109   : > { %v1170_v55 = vsub.f32 %v1144_v31, %v1169_v30 }
 0x10a   : > { %1166 = vmatpush.msra.mxu2 %v1744_v43 }
 0x10b   : > { %887 = vmatmul.f32.gmra.mxu3 %v727_v46  ;;  %v1201_v46 = vsub.f32 %v1733_v35, %v1200_v42  ;;  %v1171_v63 = vand.u32 4294901760, %v1170_v55 }
 0x10c   : > { %1168 = vmatpush.msra.mxu2 %v1757_v48 }
 0x10d   : > { %v1202_v54 = vand.u32 4294901760, %v1201_v46 }
 0x10f   : > { %1203 = vmatpush.msra.mxu3 %v1202_v54 }
 0x111   : > { %1209 = vmatpush.msra.mxu3 %v1208_v59 }
 0x113   : > { %1215 = vmatpush.msra.mxu3 %v1214_v2 }
 0x115   : > { %1221 = vmatpush.msra.mxu3 %v1220_v7 }
 0x16a   : > { %v794_v52 = vpop.f32.mrf.mxu0  ;;  %v824_v1 = vpop.f32.mrf.mxu1 }
 0x16e   : > { %v725_v29 = vpop.f32.mrf.mxu2 }
 0x172   : > { %v799_v15 = vpop.f32.mrf.mxu0  ;;  %v830_v23 = vpop.f32.mrf.mxu1 }
 0x176   : > { %v764_v39 = vpop.f32.mrf.mxu3  ;;  %v733_v41 = vpop.f32.mrf.mxu2 }
 0x177   : > { %v765_v58 = vadd.f32 %v764_v39, %v725_v29 }
 0x179   : > { %v795_v4 = vadd.f32 %v794_v52, %v765_v58  ;;  %v1147_v58 = vsel %vm457_vm5, %v1699_v53, 0 }
 0x17b   : > { %v825_v13 = vadd.f32 %v824_v1, %v795_v4 }
 0x17e   : > { %v768_v0 = vpop.f32.mrf.mxu3  ;;  %v857_v5 = vpop.f32.mrf.mxu2 }
 0x17f   : > { %v769_v12 = vadd.f32 %v768_v0, %v733_v41  ;;  %v858_v16 = vadd.f32 %v857_v5, %v825_v13  ;;  %v914_v41 = vsel %vm1800_vm15, %v1762_v51, %v910_v26  ;;  %v1172_v0 = vsub.f32 %v1170_v55, %v1171_v63 }
 0x180   : > { %v919_v52 = vsel %vm916_vm1, %v918_v38, %v914_v41 }
 0x181   : > { %v800_v21 = vadd.f32 %v799_v15, %v769_v12 }
 0x183   : > { %v831_v34 = vadd.f32 %v830_v23, %v800_v21 }
 0x186   : > { %v884_v19 = vpop.f32.mrf.mxu3  ;;  %v861_v28 = vpop.f32.mrf.mxu2 }
 0x187   : > { %v885_v20 = vadd.f32 %v884_v19, %v858_v16  ;;  %v862_v39 = vadd.f32 %v861_v28, %v831_v34 }
 0x189   : > { %v905_v25 = vmul.f32 %v904_v22, %v885_v20 }
 0x18b   : > { %v922_v32 = vsel %vm457_vm5, %v905_v25, 0 }
 0x18c   : > { %v947_v37 = vand.u32 4294901760, %v922_v32 }
 0x18e   : > { %v948_v45 = vsub.f32 %v922_v32, %v947_v37  ;;  %v888_v46 = vpop.f32.mrf.mxu3  ;;  %1001 = vmatmul.f32.vlgmr.msrb.gmra.mxu1 %v947_v37 }
 0x18f   : > { %v889_v50 = vadd.f32 %v888_v46, %v862_v39  ;;  %1279 = vmatpush.msrb.mxu1 %v1725_v33 }
 0x190   : > { %1035 = vmatmul.f32.vlgmr.msrb.gmra.mxu2 %v948_v45  ;;  %v949_v40 = vand.u32 4294901760, %v948_v45 }
 0x191   : > { %v920_v54 = vmul.f32 %v919_v52, %v889_v50  ;;  %1281 = vmatpush.msrb.mxu1 %v1735_v36  ;;  %1314 = vmatpush.msrb.mxu2 %v1200_v42  ;;  %v1177_v42 = vand.u32 4294901760, %v1147_v58 }
 0x192   : > { %1067 = vmatmul.f32.vlgmr.msrb.gmra.mxu3 %v949_v40  ;;  %v950_v51 = vsub.f32 %v948_v45, %v949_v40 }
 0x193   : > { %v925_v59 = vsel %vm457_vm5, %v920_v54, 0  ;;  %1283 = vmatpush.msrb.mxu1 %v1744_v43  ;;  %1318 = vmatpush.msrb.mxu2 %v1206_v47 }
 0x194   : > { %v955_v60 = vand.u32 4294901760, %v925_v59  ;;  %v951_v62 = vand.u32 4294901760, %v950_v51  ;;  %1349 = vmatpush.msrb.mxu3 %v1725_v33 }
 0x195   : > { %1285 = vmatpush.msrb.mxu1 %v1757_v48  ;;  %1322 = vmatpush.msrb.mxu2 %v1212_v56  ;;  %v1178_v56 = vsub.f32 %v1147_v58, %v1177_v42 }
 0x196   : > { %952 = vmatmul.f32.vlgmr.msrb.gmra.mxu0 %v951_v62  ;;  %1005 = vmatmul.f32.gmra.mxu1 %v955_v60  ;;  %v956_v53 = vsub.f32 %v925_v59, %v955_v60 }
 0x197   : > { %1351 = vmatpush.msrb.mxu3 %v1735_v36  ;;  %1245 = vmatpush.msrb.mxu0 %v1733_v35  ;;  %v1173_v35 = vand.u32 4294901760, %v1172_v0  ;;  %v1179_v36 = vand.u32 4294901760, %v1178_v56 }
 0x198   : > { %1040 = vmatmul.f32.gmra.mxu2 %v956_v53  ;;  %v957_v47 = vand.u32 4294901760, %v956_v53 }
 0x199   : > { %1326 = vmatpush.msrb.mxu2 %v1218_v61  ;;  %1353 = vmatpush.msrb.mxu3 %v1744_v43  ;;  %v1180_v43 = vsub.f32 %v1178_v56, %v1179_v36 }
 0x19a   : > { %1073 = vmatmul.f32.gmra.mxu3 %v957_v47  ;;  %v958_v33 = vsub.f32 %v956_v53, %v957_v47  ;;  %1248 = vmatpush.msrb.mxu0 %v1747_v44 }
 0x19b   : > { %1355 = vmatpush.msrb.mxu3 %v1757_v48  ;;  %v1181_v61 = vand.u32 4294901760, %v1180_v43 }
 0x19c   : > { %v959_v1 = vand.u32 4294901760, %v958_v33  ;;  %1251 = vmatpush.msrb.mxu0 %v1760_v49 }
 0x19e   : > { %960 = vmatmul.f32.gmra.mxu0 %v959_v1  ;;  %1135 = vmatmul.f32.vlgmr.msra.gmra.mxu1 %v947_v37 }
 0x19f   : > { %1254 = vmatpush.msrb.mxu0 %v1770_v57 }
 0x1a0   : > { %1174 = vmatmul.f32.vlgmr.msra.gmra.mxu2 %v1173_v35 }
 0x1a2   : > { %1223 = vmatmul.f32.vlgmr.msra.gmra.mxu3 %v1169_v30 }
 0x1a6   : > { %1106 = vmatmul.f32.vlgmr.msra.gmra.mxu0 %v947_v37  ;;  %1139 = vmatmul.f32.gmra.mxu1 %v955_v60 }
 0x1a8   : > { %1182 = vmatmul.f32.gmra.mxu2 %v1181_v61 }
 0x1aa   : > { %1227 = vmatmul.f32.gmra.mxu3 %v1177_v42 }
 0x1ae   : > { %1110 = vmatmul.f32.gmra.mxu0 %v955_v60  ;;  %1289 = vmatmul.f32.vlgmr.msrb.gmra.mxu1 %v1171_v63 }
 0x1b0   : > { %1328 = vmatmul.f32.vlgmr.msrb.gmra.mxu2 %v1169_v30 }
 0x1b2   : > { %1357 = vmatmul.f32.vlgmr.msrb.gmra.mxu3 %v1169_v30 }
 0x1b6   : > { %1257 = vmatmul.f32.vlgmr.msrb.gmra.mxu0 %v1170_v55  ;;  %1295 = vmatmul.f32.gmra.mxu1 %v1179_v36 }
 0x1b8   : > { %1332 = vmatmul.f32.gmra.mxu2 %v1177_v42 }
 0x1ba   : > { %1361 = vmatmul.f32.gmra.mxu3 %v1177_v42 }
 0x1be   : > { %1262 = vmatmul.f32.gmra.mxu0 %v1178_v56 }
 0x20b   : > { %v1002_v44 = vpop.f32.mrf.mxu1 }
 0x213   : > { %v953_v48 = vpop.f32.mrf.mxu0  ;;  %v1036_v49 = vpop.f32.mrf.mxu2 }
 0x214   : > { %v1006_v57 = vpop.f32.mrf.mxu1  ;;  %v1003_v4 = vadd.f32 %v1002_v44, %v953_v48 }
 0x215   : > { %v1068_v2 = vpop.f32.mrf.mxu3 }
 0x216   : > { %v1037_v8 = vadd.f32 %v1036_v49, %v1003_v4 }
 0x218   : > { %v1069_v10 = vadd.f32 %v1068_v2, %v1037_v8 }
 0x21b   : > { %v961_v3 = vpop.f32.mrf.mxu0  ;;  %v1041_v5 = vpop.f32.mrf.mxu2 }
 0x21c   : > { %v1136_v7 = vpop.f32.mrf.mxu1  ;;  %v1007_v11 = vadd.f32 %v1006_v57, %v961_v3 }
 0x21d   : > { %v1074_v6 = vpop.f32.mrf.mxu3 }
 0x21e   : > { %v1042_v15 = vadd.f32 %v1041_v5, %v1007_v11 }
 0x220   : > { %v1075_v19 = vadd.f32 %v1074_v6, %v1042_v15 }
 0x223   : > { %v1107_v9 = vpop.f32.mrf.mxu0  ;;  %v1175_v12 = vpop.f32.mrf.mxu2 }
 0x224   : > { %v1108_v14 = vadd.f32 %v1107_v9, %v1069_v10  ;;  %v1140_v16 = vpop.f32.mrf.mxu1 }
 0x225   : > { %v1224_v13 = vpop.f32.mrf.mxu3 }
 0x226   : > { %v1137_v17 = vadd.f32 %v1136_v7, %v1108_v14 }
 0x228   : > { %v1176_v22 = vadd.f32 %v1175_v12, %v1137_v17 }
 0x22a   : > { %v1225_v24 = vadd.f32 %v1224_v13, %v1176_v22 }
 0x22b   : > { %v1111_v18 = vpop.f32.mrf.mxu0  ;;  %v1183_v20 = vpop.f32.mrf.mxu2 }
 0x22c   : > { %v1112_v23 = vadd.f32 %v1111_v18, %v1075_v19  ;;  %v1290_v26 = vpop.f32.mrf.mxu1 }
 0x22d   : > { %v1228_v21 = vpop.f32.mrf.mxu3 }
 0x22e   : > { %v1141_v25 = vadd.f32 %v1140_v16, %v1112_v23 }
 0x230   : > { %v1184_v31 = vadd.f32 %v1183_v20, %v1141_v25 }
 0x232   : > { %v1229_v38 = vadd.f32 %v1228_v21, %v1184_v31 }
 0x233   : > { %v1258_v27 = vpop.f32.mrf.mxu0  ;;  %v1329_v29 = vpop.f32.mrf.mxu2 }
 0x234   : > { %v1259_v28 = vadd.f32 %v1258_v27, %v1225_v24  ;;  %v1296_v46 = vpop.f32.mrf.mxu1 }
 0x235   : > { %v1358_v34 = vpop.f32.mrf.mxu3 }
 0x236   : > { %v1291_v32 = vadd.f32 %v1290_v26, %v1259_v28 }
 0x238   : > { %v1330_v37 = vadd.f32 %v1329_v29, %v1291_v32 }
 0x23a   : > { %v1359_v39 = vadd.f32 %v1358_v34, %v1330_v37 }
 0x23b   : > { %v1263_v41 = vpop.f32.mrf.mxu0  ;;  %v1333_v40 = vpop.f32.mrf.mxu2 }
 0x23c   : > { %vm1365_vm2 = vcmp.gt.f32.partialorder %v1359_v39, 0.0  ;;  %v1367_v30 = vmul.f32 0.01, %v1359_v39  ;;  %v1264_v45 = vadd.f32 %v1263_v41, %v1229_v38 }
 0x23d   : > { %v1362_v55 = vpop.f32.mrf.mxu3 }
 0x23e   : > { %v1369_v50 = vsel %vm1365_vm2, %v1359_v39, %v1367_v30  ;;  %v1297_v52 = vadd.f32 %v1296_v46, %v1264_v45 }
 0x23f   : > { %1371 = vst.msk [vmem:[%s390_s23] sm:$0xff] %vm457_vm5, %v1369_v50  ;;  %v1383_v59 = vmul.f32 %v1369_v50, %v1369_v50  ;;  %v1373_v62 = vsel %vm457_vm5, %v1369_v50, 0.0 }
 0x240   : > { %v1334_v54 = vadd.f32 %v1333_v40, %v1297_v52 }
 0x241   : > { %v1385_v47 = vsel %vm457_vm5, %v1383_v59, 0.0 }
 0x242   : > { %v1363_v51 = vadd.f32 %v1362_v55, %v1334_v54 }
 0x244   : > { %vm1366_vm3 = vcmp.gt.f32.partialorder %v1363_v51, 0.0  ;;  %v1368_v58 = vmul.f32 0.01, %v1363_v51 }
 0x246   : > { %v1370_v60 = vsel %vm1366_vm3, %v1363_v51, %v1368_v58 }
 0x247   : > { %1372 = vst.msk [vmem:[%s390_s23 + $0x8] sm:$0xff] %vm457_vm5, %v1370_v60  ;;  %v1374_v42 = vsel %vm457_vm5, %v1370_v60, 0.0  ;;  %v1384_v53 = vmul.f32 %v1370_v60, %v1370_v60 }
 0x248   : > { %v1375_v63 = vadd.f32 %v1374_v42, %v1373_v62 }
 0x249   : > { %v1386_v33 = vsel %vm457_vm5, %v1384_v53, 0.0 }
 0x24a   : > { %v1376_v0 = vrot.slane %v1375_v63, 4  ;;  %v1387_v56 = vadd.f32 %v1386_v33, %v1385_v47 }
 0x24c   : > { %v1377_v1 = vadd.f32 %v1376_v0, %v1375_v63  ;;  %v1388_v35 = vrot.slane %v1387_v56, 4 }
 0x24e   : > { %v1378_v36 = vrot.slane %v1377_v1, 2  ;;  %v1389_v43 = vadd.f32 %v1388_v35, %v1387_v56 }
 0x250   : > { %v1379_v61 = vadd.f32 %v1378_v36, %v1377_v1  ;;  %v1390_v44 = vrot.slane %v1389_v43, 2 }
 0x252   : > { %v1380_v48 = vrot.slane %v1379_v61, 1  ;;  %v1391_v49 = vadd.f32 %v1390_v44, %v1389_v43 }
 0x254   : > { %v1381_v57 = vadd.f32 %v1380_v48, %v1379_v61  ;;  %v1392_v2 = vrot.slane %v1391_v49, 1 }
 0x256   : > { %1382 = vst.msk [vmem:[%s393_s25] sm:$0x1] %vm399_vm0, %v1381_v57  ;;  %v1393_v3 = vadd.f32 %v1392_v2, %v1391_v49 }
 0x258   : > { %1394 = vst.msk [vmem:[%s396_s28] sm:$0x1] %vm399_vm0, %v1393_v3 }
 0x259 PF: > { %s21_s13 = sadd.s32 1, %s1551_s13  }
 0x25a   : > { %p18_p4 = scmp.ge.s32.totalorder %s21_s13, 4  }
 0x25c   :  { %20 = sbr.rel (!%p18_p4) target bundleno = 1 (0x1), region = 109 }

// kernel: graphsage_forward.7
= control target key start
LH: loop header
LB: loop body
LE: loop exit
PB: predicated region body
PF: predicated region fallthrough
CT: control target
= control target key end

     0   :  { %s4527_s0 = inlined_call_operand.vmem [shape: f32[2,16,32], index: 0, kind: input, shape index: {}]   ;;  %s4528_s1 = inlined_call_operand.vmem [shape: f32[2,16,32], index: 1, kind: input, shape index: {}]   ;;  %s4529_s2 = inlined_call_operand.vmem [shape: f32[2,16,32], index: 2, kind: input, shape index: {}]   ;;  %s4530_s3 = inlined_call_operand.vmem [shape: f32[2,1,32], index: 3, kind: input, shape index: {}]   ;;  %s4531_s4 = inlined_call_operand.vmem [shape: f32[2,1,32], index: 4, kind: input, shape index: {}]   ;;  %s4532_s5 = inlined_call_operand.vmem [shape: f32[2,1,32], index: 5, kind: input, shape index: {}]   ;;  %s4533_s6 = inlined_call_operand.vmem [shape: f32[2,1,32], index: 6, kind: input, shape index: {}]   ;;  %s4534_s7 = inlined_call_operand.vmem [shape: f32[2,1,32], index: 7, kind: input, shape index: {}]   ;;  %s4535_s8 = inlined_call_operand.vmem [shape: f32[2,1,32], index: 8, kind: input, shape index: {}]   ;;  %s4536_s9 = inlined_call_operand.vmem [shape: f32[2,32], index: 9, kind: input, shape index: {}]   ;;  %s4537_s10 = inlined_call_operand.vmem [shape: f32[2,32], index: 10, kind: input, shape index: {}]   ;;  %s4538_s11 = inlined_call_operand.vmem [shape: f32[2,32], index: 11, kind: input, shape index: {}]   ;;  %s4539_s12 = inlined_call_operand.vmem [shape: f32[32,96], index: 12, kind: input, shape index: {}]   ;;  %s4540_s13 = inlined_call_operand.vmem [shape: f32[32,96], index: 13, kind: input, shape index: {}]   ;;  %s4541_s14 = inlined_call_operand.vmem [shape: f32[32,96], index: 14, kind: input, shape index: {}]   ;;  %s4542_s15 = inlined_call_operand.vmem [shape: f32[1,96], index: 15, kind: input, shape index: {}]   ;;  %s4543_s16 = inlined_call_operand.vmem [shape: f32[96,96], index: 16, kind: input, shape index: {}]   ;;  %s4544_s17 = inlined_call_operand.vmem [shape: f32[1,96], index: 17, kind: input, shape index: {}]   ;;  %s4545_s18 = inlined_call_operand.vmem [shape: f32[96,96], index: 18, kind: input, shape index: {}]   ;;  %s4546_s19 = inlined_call_operand.vmem [shape: f32[1,96], index: 19, kind: input, shape index: {}]   ;;  %s4547_s20 = inlined_call_operand.vmem [shape: f32[32,96], index: 20, kind: input, shape index: {}]   ;;  %s4548_s21 = inlined_call_operand.vmem [shape: f32[32,96], index: 21, kind: input, shape index: {}]   ;;  %s4549_s22 = inlined_call_operand.vmem [shape: f32[32,96], index: 22, kind: input, shape index: {}]   ;;  %s4550_s23 = inlined_call_operand.vmem [shape: f32[1,96], index: 23, kind: input, shape index: {}]   ;;  %s4551_s24 = inlined_call_operand.hbm [shape: f32[2,1,96], index: 24, kind: output, shape index: {}]  }
   0x1   :  { %4593 = sst [smem:[#allocation23_spill]] %s4527_s0 }
   0x2   :  { %4594 = sst [smem:[#allocation24_spill]] %s4528_s1 }
   0x3   :  { %4595 = sst [smem:[#allocation25_spill]] %s4529_s2 }
   0x4   :  { %4596 = sst [smem:[#allocation26_spill]] %s4530_s3 }
   0x5   :  { %4597 = sst [smem:[#allocation27_spill]] %s4531_s4 }
   0x6   :  { %4598 = sst [smem:[#allocation28_spill]] %s4532_s5 }
   0x7   :  { %4599 = sst [smem:[#allocation29_spill]] %s4533_s6 }
   0x8   :  { %4600 = sst [smem:[#allocation30_spill]] %s4534_s7 }
   0x9   :  { %4601 = sst [smem:[#allocation31_spill]] %s4535_s8 }
   0xa   :  { %4602 = sst [smem:[#allocation32_spill]] %s4536_s9 }
   0xb   :  { %4603 = sst [smem:[#allocation33_spill]] %s4537_s10 }
   0xc   :  { %4604 = sst [smem:[#allocation34_spill]] %s4540_s13 }
   0xd   :  { %29 = vsyncpa [#allocation3], 0 }
   0xe   :  { %31 = vsyncpa [#allocation3 + $0x1], 0  ;;  %s3317_s5 = smov 0   ;;  %s3319_s26 = smov 0  }
   0xf   :  { %s3321_s27 = smov 0   ;;  %s3323_s28 = smov 0  }
  0x10 LB: > { %4605 = sst [smem:[#allocation5_spill]] %s3184_s27  ;;  %s3338_s6 = sadd.s32 4294967295, %s3188_s28   ;;  %s3188_s28 = sphi %s3323_s28, %s4667_s28   ;;  %s3184_s27 = sphi %s3321_s27, %s4669_s27   ;;  %s3180_s26 = sphi %s3319_s26, %s4671_s26   ;;  %s3176_s5 = sphi %s3317_s5, %s4670_s5  }
  0x11   : > { %s3056_s2 = sadd.s32 4294967294, %s3188_s28   ;;  %s3342_s29 = sadd.s32 1, %s3188_s28  }
  0x12   : > { %4606 = sst [smem:[#allocation6_spill]] %s3342_s29  ;;  %s563_s0 = sadd.s32 1, %s3184_s27 }
  0x13   : > { %s560_s7 = ssub.s32 %s3188_s28, %s3342_s29  ;;  %p573_p0 = scmp.ne.s32.totalorder %s3184_s27, %s3180_s26 }
  0x14   : > { %p561_p1 = scmp.eq.s32.totalorder %s560_s7, 0  ;;  %p574_p2 = scmp.eq.s32.totalorder %s3338_s6, 1 }
  0x15   : > { %p579_p3 = scmp.ne.s32.totalorder %s3180_s26, %s3176_s5  ;;  %p580_p4 = scmp.eq.s32.totalorder %s3056_s2, 1 }
  0x16   : > { %s3353_s30 = scalar_select %p561_p1, %s3184_s27, %s563_s0  }
  0x17   : > { %p3355_p5 = por %p574_p2, %p573_p0  ;;  %p3359_p6 = por %p580_p4, %p579_p3 }
  0x18   : > { %4607 = sst [smem:[#allocation7_spill]] %s3353_s30  ;;  %p3059_p7 = scmp.ge.s32.totalorder %s3188_s28, 1 }
  0x19   : > { %p685_p8 = scmp.lt.s32.totalorder %s3188_s28, 3 }
  0x1b   : > { %p686_p9 = pnand %p3059_p7, %p685_p8 }
  0x1d   : > { %689 = sbr.rel (%p686_p9) target bundleno = 722 (0x2d2), region = 116 }
  0x22   : > { %s4610_s13 = sld [smem:[#allocation34_spill]]  ;;  %v3190_v5 = vmov 32.0   ;;  %vm777_vm0 = vcmask 253952   ;;  %p760_p10 = scmp.lt.s32.totalorder %s3338_s6, 1  ;;  %v900_v60 = vld [vmem:[%s4539_s12 + $0x18] sm:$0xff]  ;;  %v899_v63 = vld [vmem:[%s4539_s12 + $0x10] sm:$0xff] }
  0x23   : > { %3116 = vrcp.f32 %v3190_v5  ;;  %s4611_s29 = sld [smem:[#allocation28_spill]]  ;;  %v3453_v62 = vand.u32 4294901760, %v900_v60  ;;  %vm905_vm8 = vcmask 261120   ;;  %vm1602_vm12 = vcmask 785408  }
  0x24   : > { %s4612_s0 = sld [smem:[#allocation29_spill]]  ;;  %vm2962_vm14 = vcmask 778240  }
  0x25   : > { %s4613_s2 = sld [smem:[#allocation26_spill]] }
  0x26   : > { %s4614_s7 = sld [smem:[#allocation27_spill]] }
  0x27   : > { %s4615_s30 = sld [smem:[#allocation30_spill]] }
  0x28   : > { %v904_v0 = vld [vmem:[%s4610_s13 + $0x18] sm:$0xff]  ;;  %v903_v1 = vld [vmem:[%s4610_s13 + $0x10] sm:$0xff]  ;;  %v902_v2 = vld [vmem:[%s4610_s13 + $0x8] sm:$0xff]  ;;  %s4616_s8 = sld [smem:[#allocation31_spill]] }
  0x29   : > { %v3374_v3 = vand.u32 4294901760, %v904_v0  ;;  %v3376_v4 = vand.u32 4294901760, %v903_v1  ;;  %v901_v6 = vld [vmem:[%s4610_s13] sm:$0xff]  ;;  %v3388_v10 = vand.u32 4294901760, %v902_v2  ;;  %v3117_v20 = vpop.eup %3116  ;;  %s4617_s27 = sld [smem:[#allocation24_spill]] }
  0x2a   : > { %v821_v7 = vld [vmem:[%s4611_s29] sm:$0x1]  ;;  %v822_v11 = vld [vmem:[%s4611_s29 + $0x1] sm:$0x1]  ;;  %v3394_v14 = vand.u32 4294901760, %v901_v6  ;;  %v790_v26 = vmul.f32 32.0, %v3117_v20  ;;  %vm794_vm1 = vweird.f32 %v3117_v20 }
  0x2b   : > { %v962_v8 = vsub.f32 %v904_v0, %v3374_v3  ;;  %v968_v9 = vsub.f32 %v903_v1, %v3376_v4  ;;  %1042 = vmatpush.msra.mxu3 %v3374_v3  ;;  %925 = vmatpush.msra.mxu0 %v3374_v3  ;;  %v823_v15 = vsel %vm777_vm0, %v821_v7, 0.0  ;;  %v826_v16 = vld [vmem:[%s4612_s0] sm:$0x1]  ;;  %v827_v17 = vld [vmem:[%s4612_s0 + $0x1] sm:$0x1]  ;;  %v974_v22 = vsub.f32 %v902_v2, %v3388_v10  ;;  %s761_s29 = scalar_select %p760_p10, %s3338_s6, 1 }
  0x2c   : > { %v775_v18 = vld [vmem:[%s4613_s2] sm:$0x1]  ;;  %v776_v19 = vld [vmem:[%s4613_s2 + $0x1] sm:$0x1]  ;;  %v824_v27 = vsel %vm777_vm0, %v822_v11, 0.0  ;;  %v980_v30 = vsub.f32 %v901_v6, %v3394_v14  ;;  %v828_v31 = vsel %vm777_vm0, %v826_v16, 0.0  ;;  %v3462_v1 = vsub.f32 %v900_v60, %v3453_v62 }
  0x2d   : > { %1008 = vmatpush.msra.mxu2 %v962_v8  ;;  %v963_v12 = vand.u32 4294901760, %v962_v8  ;;  %1044 = vmatpush.msra.mxu3 %v3376_v4  ;;  %v969_v13 = vand.u32 4294901760, %v968_v9  ;;  %v781_v24 = vld [vmem:[%s4614_s7] sm:$0x1]  ;;  %v782_v25 = vld [vmem:[%s4614_s7 + $0x1] sm:$0x1]  ;;  %v825_v39 = vadd.f32 %v824_v27, %v823_v15 }
  0x2e   : > { %927 = vmatpush.msra.mxu0 %v3376_v4  ;;  %v791_v32 = vsub.f32 1.0, %v790_v26  ;;  %v829_v33 = vsel %vm777_vm0, %v827_v17, 0.0  ;;  %v778_v34 = vsel %vm777_vm0, %v775_v18, 0.0  ;;  %v779_v35 = vsel %vm777_vm0, %v776_v19, 0.0  ;;  %v859_v2 = vld [vmem:[%s4615_s30] sm:$0x1] }
  0x2f   : > { %1011 = vmatpush.msra.mxu2 %v968_v9  ;;  %v964_v21 = vsub.f32 %v962_v8, %v963_v12  ;;  %v970_v23 = vsub.f32 %v968_v9, %v969_v13  ;;  %1046 = vmatpush.msra.mxu3 %v3388_v10  ;;  %v783_v36 = vsel %vm777_vm0, %v781_v24, 0.0  ;;  %v784_v37 = vsel %vm777_vm0, %v782_v25, 0.0  ;;  %v860_v5 = vld [vmem:[%s4615_s30 + $0x1] sm:$0x1]  ;;  %v898_v6 = vld [vmem:[%s4539_s12 + $0x8] sm:$0xff]  ;;  %s3513_s2 = sshll.u32 %s761_s29, 4 }
  0x30   : > { %929 = vmatpush.msra.mxu0 %v3388_v10  ;;  %v792_v38 = vmul.f32 %v3117_v20, %v791_v32  ;;  %v830_v40 = vadd.f32 %v829_v33, %v828_v31  ;;  %v780_v41 = vadd.f32 %v779_v35, %v778_v34  ;;  %v785_v43 = vadd.f32 %v784_v37, %v783_v36  ;;  %v865_v15 = vld [vmem:[%s4616_s8 + $0x1] sm:$0x1]  ;;  %s769_s13 = scalar_lea.vmem %s4617_s27, %s3513_s2  ;;  %s4618_s29 = sld [smem:[#allocation23_spill]] }
  0x31   : > { %v965_v28 = vand.u32 4294901760, %v964_v21  ;;  %1014 = vmatpush.msra.mxu2 %v974_v22  ;;  %v971_v29 = vand.u32 4294901760, %v970_v23  ;;  %1048 = vmatpush.msra.mxu3 %v3394_v14  ;;  %v975_v52 = vand.u32 4294901760, %v974_v22  ;;  %v981_v56 = vand.u32 4294901760, %v980_v30  ;;  %v897_v18 = vld [vmem:[%s4539_s12] sm:$0xff]  ;;  %s4621_s10 = sld [smem:[#allocation33_spill]] }
  0x32   : > { %931 = vmatpush.msra.mxu0 %v3394_v14  ;;  %v793_v42 = vadd.f32 %v3117_v20, %v792_v38  ;;  %v3459_v0 = vand.u32 4294901760, %v899_v63  ;;  %v861_v7 = vsel %vm777_vm0, %v859_v2, 0.0  ;;  %v862_v8 = vsel %vm777_vm0, %v860_v5, 0.0  ;;  %s4624_s9 = sld [smem:[#allocation32_spill]] }
  0x33   : > { %966 = vmatpush.msra.mxu1 %v965_v28  ;;  %1017 = vmatpush.msra.mxu2 %v980_v30  ;;  %v976_v55 = vsub.f32 %v974_v22, %v975_v52  ;;  %v982_v59 = vsub.f32 %v980_v30, %v981_v56  ;;  %v1185_v11 = vand.u32 4294901760, %v3462_v1  ;;  %v863_v19 = vadd.f32 %v862_v8, %v861_v7 }
  0x34   : > { %1077 = vmatpush.msrb.mxu0 %v963_v12  ;;  %v3429_v44 = vsel %vm794_vm1, %v3117_v20, %v793_v42  ;;  %v3482_v12 = vand.u32 4294901760, %v898_v6  ;;  %v867_v21 = vsel %vm777_vm0, %v865_v15, 0.0  ;;  %v3508_v24 = vand.u32 4294901760, %v897_v18 }
  0x35   : > { %972 = vmatpush.msra.mxu1 %v971_v29  ;;  %v3432_v45 = vmul.f32 %v825_v39, %v3429_v44  ;;  %v835_v46 = vmul.f32 %v830_v40, %v3429_v44  ;;  %v3436_v47 = vmul.f32 %v3429_v44, %v780_v41  ;;  %v797_v48 = vmul.f32 %v3429_v44, %v785_v43 }
  0x36   : > { %1081 = vmatpush.msrb.mxu0 %v969_v13  ;;  %v977_v58 = vand.u32 4294901760, %v976_v55  ;;  %v983_v61 = vand.u32 4294901760, %v982_v59  ;;  %1147 = vmatpush.msrb.mxu2 %v3453_v62  ;;  %v864_v13 = vld [vmem:[%s4616_s8] sm:$0x1]  ;;  %v1186_v22 = vsub.f32 %v3462_v1, %v1185_v11  ;;  %v3527_v30 = vsub.f32 %v897_v18, %v3508_v24  ;;  %s764_s1 = scalar_lea.vmem %s4618_s29, %s3513_s2  ;;  %s4633_s29 = sld [smem:[#allocation25_spill]] }
  0x37   : > { %v836_v49 = vmul.f32 %v3432_v45, %v3432_v45  ;;  %v798_v50 = vmul.f32 %v3436_v47, %v3436_v47  ;;  %v866_v20 = vsel %vm777_vm0, %v864_v13, 0.0  ;;  %v3532_v33 = vmul.f32 %v863_v19, %v3429_v44  ;;  %v786_v55 = vld [vmem:[%s764_s1] sm:$0xff]  ;;  %v787_v59 = vld [vmem:[%s764_s1 + $0x8] sm:$0xff] }
  0x38   : > { %1085 = vmatpush.msrb.mxu0 %v975_v52  ;;  %978 = vmatpush.msra.mxu1 %v977_v58  ;;  %v1187_v27 = vand.u32 4294901760, %v1186_v22  ;;  %v868_v32 = vadd.f32 %v867_v21, %v866_v20  ;;  %v1203_v36 = vand.u32 4294901760, %v3527_v30  ;;  %v849_v41 = vperm.slane %v3432_v45, 0 }
  0x39   : > { %v837_v51 = vsub.f32 %v835_v46, %v836_v49  ;;  %v799_v53 = vsub.f32 %v797_v48, %v798_v50  ;;  %1149 = vmatpush.msrb.mxu2 %v3459_v0  ;;  %v874_v39 = vmul.f32 %v3532_v33, %v3532_v33  ;;  %v833_v46 = vld [vmem:[%s4621_s10] sm:$0x3]  ;;  %v832_v49 = vld [vmem:[%s769_s13 + $0x8] sm:$0xff]  ;;  %v811_v52 = vperm.slane %v3436_v47, 0 }
  0x3a   : > { %1089 = vmatpush.msrb.mxu0 %v981_v56  ;;  %984 = vmatpush.msra.mxu1 %v983_v61  ;;  %v873_v38 = vmul.f32 %v868_v32, %v3429_v44  ;;  %v1204_v43 = vsub.f32 %v3527_v30, %v1203_v36  ;;  %v831_v44 = vld [vmem:[%s769_s13] sm:$0xff]  ;;  %v856_v47 = vperm.slane %v833_v46, 1  ;;  %s758_s13 = sand.u32 1, %s3180_s26  }
  0x3b   : > { %v3443_v54 = vadd.f32 1e-05, %v837_v51  ;;  %v3445_v57 = vadd.f32 1e-05, %v799_v53  ;;  %1151 = vmatpush.msrb.mxu2 %v3482_v12  ;;  %1188 = vmatpush.msrb.mxu3 %v1187_v27  ;;  %v788_v56 = vld [vmem:[%s4624_s9] sm:$0x3]  ;;  %v850_v60 = vsub.f32 %v831_v44, %v849_v41  ;;  %v813_v8 = vsub.f32 %v787_v59, %v811_v52 }
  0x3c   : > { %1112 = vmatpush.msrb.mxu1 %v3374_v3  ;;  %v3485_v3 = vsub.f32 %v899_v63, %v3459_v0  ;;  %v875_v51 = vsub.f32 %v873_v38, %v874_v39  ;;  %v1205_v53 = vand.u32 4294901760, %v1204_v43  ;;  %v851_v63 = vsub.f32 %v832_v49, %v849_v41  ;;  %s3730_s1 = scalar_lea.vmem %s4633_s29, %s3513_s2  ;;  %s759_s2 = scalar_lea.vmem [#allocation2], %s758_s13 }
  0x3d   : > { %3118 = vrsqrt.f32 %v3443_v54  ;;  %vm845_vm2 = vweird.f32 %v3443_v54  ;;  %vm807_vm4 = vweird.f32 %v3445_v57  ;;  %1153 = vmatpush.msrb.mxu2 %v3508_v24  ;;  %s2975_s27 = sshll.u32 %s759_s2, 4  ;;  %s2965_s7 = scalar_lea.sflag [#allocation3], %s758_s13  ;;  %s2976_s27 = int_to_ptr.vmem [resolvable:$true] %s2975_s27 }
  0x3e   : > { %3120 = vrsqrt.f32 %v3445_v57  ;;  %1114 = vmatpush.msrb.mxu1 %v3376_v4  ;;  %v1191_v23 = vand.u32 4294901760, %v3485_v3  ;;  %v3511_v4 = vsub.f32 %v898_v6, %v3482_v12  ;;  %v812_v6 = vsub.f32 %v786_v55, %v811_v52  ;;  %v1350_v55 = vld [vmem:[%s4541_s14] sm:$0xff]  ;;  %s3146_s29 = scalar_lea.hbm %s4551_s24, 2 }
  0x40   : > { %1116 = vmatpush.msrb.mxu1 %v3388_v10  ;;  %v1192_v28 = vsub.f32 %v3485_v3, %v1191_v23  ;;  %v1197_v29 = vand.u32 4294901760, %v3511_v4 }
  0x42   : > { %1118 = vmatpush.msrb.mxu1 %v3394_v14  ;;  %v1193_v34 = vand.u32 4294901760, %v1192_v28  ;;  %v1198_v35 = vsub.f32 %v3511_v4, %v1197_v29 }
  0x43   : > { %v3477_v9 = vpop.eup %3118 }
  0x44   : > { %v3493_v16 = vpop.eup %3120  ;;  %v840_v17 = vmul.f32 %v3477_v9, %v3443_v54  ;;  %vm846_vm3 = vweird.f32 %v3477_v9  ;;  %1194 = vmatpush.msrb.mxu3 %v1193_v34  ;;  %v1199_v42 = vand.u32 4294901760, %v1198_v35 }
  0x45   : > { %v802_v26 = vmul.f32 %v3493_v16, %v3445_v57  ;;  %vm808_vm5 = vweird.f32 %v3493_v16  ;;  %vm3554_vm6 = vmor %vm845_vm2, %vm846_vm3  ;;  %v3582_v57 = vadd.f32 1e-05, %v875_v51 }
  0x46   : > { %v841_v25 = vmul.f32 %v3477_v9, %v840_v17  ;;  %1200 = vmatpush.msrb.mxu3 %v1199_v42  ;;  %vm3570_vm7 = vmor %vm807_vm4, %vm808_vm5  ;;  %v818_v17 = vperm.slane %v788_v56, 1 }
  0x47   : > { %v803_v10 = vmul.f32 %v3493_v16, %v802_v26  ;;  %3122 = vrsqrt.f32 %v3582_v57  ;;  %vm883_vm9 = vweird.f32 %v3582_v57 }
  0x48   : > { %v842_v31 = vmul.f32 0.5, %v841_v25  ;;  %1206 = vmatpush.msrb.mxu3 %v1205_v53 }
  0x49   : > { %v804_v14 = vmul.f32 0.5, %v803_v10 }
  0x4a   : > { %v843_v37 = vsub.f32 1.5, %v842_v31 }
  0x4b   : > { %v805_v50 = vsub.f32 1.5, %v804_v14 }
  0x4c   : > { %v844_v48 = vmul.f32 %v3477_v9, %v843_v37 }
  0x4d   : > { %v806_v58 = vmul.f32 %v3493_v16, %v805_v50  ;;  %v3588_v22 = vpop.eup %3122  ;;  %v1352_v50 = vld [vmem:[%s4541_s14 + $0x10] sm:$0xff] }
  0x4e   : > { %v848_v54 = vsel %vm3554_vm6, %v3477_v9, %v844_v48  ;;  %v878_v31 = vmul.f32 %v3588_v22, %v3582_v57  ;;  %v1353_v48 = vld [vmem:[%s4541_s14 + $0x18] sm:$0xff]  ;;  %vm884_vm10 = vweird.f32 %v3588_v22  ;;  %v3705_v57 = vand.u32 4294901760, %v1350_v55 }
  0x4f   : > { %v852_v61 = vmul.f32 %v848_v54, %v833_v46  ;;  %v810_v2 = vsel %vm3570_vm7, %v3493_v16, %v806_v58  ;;  %vm3686_vm11 = vmor %vm883_vm9, %vm884_vm10 }
  0x50   : > { %v814_v7 = vmul.f32 %v810_v2, %v788_v56  ;;  %v879_v14 = vmul.f32 %v3588_v22, %v878_v31 }
  0x51   : > { %v853_v5 = vperm.slane %v852_v61, 0 }
  0x52   : > { %v815_v15 = vperm.slane %v814_v7, 0  ;;  %v880_v41 = vmul.f32 0.5, %v879_v14 }
  0x53   : > { %v854_v9 = vmul.f32 %v853_v5, %v850_v60  ;;  %v855_v13 = vmul.f32 %v853_v5, %v851_v63  ;;  %v3724_v5 = vsub.f32 %v1350_v55, %v3705_v57 }
  0x54   : > { %v816_v20 = vmul.f32 %v815_v15, %v812_v6  ;;  %v817_v21 = vmul.f32 %v815_v15, %v813_v8  ;;  %v881_v49 = vsub.f32 1.5, %v880_v41  ;;  %v869_v15 = vld [vmem:[%s3730_s1] sm:$0xff] }
  0x55   : > { %v857_v18 = vadd.f32 %v856_v47, %v854_v9  ;;  %v858_v19 = vadd.f32 %v856_v47, %v855_v13  ;;  %v1429_v9 = vand.u32 4294901760, %v3724_v5 }
  0x56   : > { %v819_v26 = vadd.f32 %v818_v17, %v816_v20  ;;  %v820_v32 = vadd.f32 %v818_v17, %v817_v21 }
  0x57   : > { %v907_v25 = vsel %vm905_vm8, %v857_v18, 0  ;;  %v910_v16 = vsel %vm905_vm8, %v858_v19, 0 }
  0x58   : > { %v3592_v27 = vand.u32 4294901760, %v907_v25  ;;  %v3594_v28 = vand.u32 4294901760, %v910_v16  ;;  %v1129_v10 = vsel %vm905_vm8, %v819_v26, 0  ;;  %v1132_v40 = vsel %vm905_vm8, %v820_v32, 0 }
  0x59   : > { %v3606_v37 = vand.u32 4294901760, %v1129_v10  ;;  %v3635_v46 = vand.u32 4294901760, %v1132_v40 }
  0x5a   : > { %v3600_v34 = vsub.f32 %v907_v25, %v3592_v27  ;;  %986 = vmatmul.f32.vlgmr.msra.gmra.mxu1 %v3592_v27  ;;  %v3604_v35 = vsub.f32 %v910_v16, %v3594_v28  ;;  %v870_v16 = vld [vmem:[%s3730_s1 + $0x8] sm:$0xff]  ;;  %s2973_s1 = scalar_lea.hbm %s4551_s24, %s3338_s6 }
  0x5b   : > { %1264 = vmatpush.msra.mxu1 %v3453_v62  ;;  %v3615_v39 = vsub.f32 %v1129_v10, %v3606_v37  ;;  %4627 = vst [vmem:[#allocation10_spill] sm:$0xff] %v3635_v46  ;;  %v3667_v45 = vsub.f32 %v1132_v40, %v3635_v46  ;;  %s2977_s0 = sshll.u32 %s2973_s1, 4  ;;  %s2978_s0 = int_to_ptr.hbm [resolvable:$true] %s2977_s0 }
  0x5c   : > { %1020 = vmatmul.f32.vlgmr.msra.gmra.mxu2 %v3600_v34  ;;  %v3612_v38 = vand.u32 4294901760, %v3600_v34  ;;  %v3625_v43 = vand.u32 4294901760, %v3604_v35  ;;  %s3140_s8 = sshra.s32 %s2978_s0, 4  ;;  %s3141_s8 = int_to_ptr.hbm [resolvable:$true] %s3140_s8 }
  0x5d   : > { %4625 = vst [vmem:[#allocation8_spill] sm:$0xff] %v3615_v39  ;;  %1299 = vmatpush.msra.mxu2 %v1185_v11  ;;  %1266 = vmatpush.msra.mxu1 %v3459_v0  ;;  %v3633_v11 = vand.u32 4294901760, %v3615_v39  ;;  %v3710_v61 = vand.u32 4294901760, %v3667_v45  ;;  %s3142_s9 = scalar_lea.hbm %s3141_s8, 1  ;;  %p3147_p0 = scmp.lt.s32.totalorder %s3141_s8, %s4551_s24 }
  0x5e   : > { %1052 = vmatmul.f32.vlgmr.msra.gmra.mxu3 %v3612_v38  ;;  %v935_v42 = vsub.f32 %v3600_v34, %v3612_v38  ;;  %4628 = vst [vmem:[#allocation11_spill] sm:$0xff] %v3667_v45  ;;  %p3143_p11 = scmp.ne.s32.totalorder %s3141_s8, %s3142_s9  ;;  %p3148_p1 = scmp.lt.s32.totalorder %s3146_s29, %s3142_s9 }
  0x5f   : > { %1303 = vmatpush.msra.mxu2 %v1191_v23  ;;  %1334 = vmatpush.msra.mxu3 %v3453_v62  ;;  %4626 = vst [vmem:[#allocation9_spill] sm:$0xff] %v3633_v11  ;;  %v3644_v62 = vand.u32 4294901760, %v1353_v48  ;;  %v943_v23 = vsub.f32 %v3604_v35, %v3625_v43  ;;  %v1157_v51 = vsub.f32 %v3615_v39, %v3633_v11 }
  0x60   : > { %v3630_v44 = vand.u32 4294901760, %v935_v42  ;;  %1268 = vmatpush.msra.mxu1 %v3482_v12  ;;  %4632 = vst [vmem:[#allocation13_spill] sm:$0xff] %v3710_v61  ;;  %v1165_v13 = vsub.f32 %v3667_v45, %v3710_v61  ;;  %p3144_p12 = pnand %p3143_p11, %p3355_p5  ;;  %p3149_p2 = por %p3148_p1, %p3147_p0 }
  0x61   : > { %1307 = vmatpush.msra.mxu2 %v1197_v29  ;;  %1336 = vmatpush.msra.mxu3 %v3459_v0  ;;  %v3659_v0 = vsub.f32 %v1353_v48, %v3644_v62  ;;  %v3661_v29 = vand.u32 4294901760, %v1352_v50  ;;  %v3707_v60 = vand.u32 4294901760, %v1157_v51 }
  0x62   : > { %937 = vmatmul.f32.vlgmr.msra.gmra.mxu0 %v3630_v44  ;;  %990 = vmatmul.f32.gmra.mxu1 %v3594_v28  ;;  %v3748_v20 = vand.u32 4294901760, %v1165_v13  ;;  %p3145_p13 = pneg %p3144_p12 }
  0x63   : > { %1230 = vmatpush.msra.mxu0 %v3462_v1  ;;  %1311 = vmatpush.msra.mxu2 %v1203_v36  ;;  %v1351_v1 = vld [vmem:[%s4541_s14 + $0x8] sm:$0xff]  ;;  %v882_v36 = vmul.f32 %v3588_v22, %v881_v49  ;;  %v1411_v52 = vand.u32 4294901760, %v3659_v0  ;;  %v3678_v53 = vsub.f32 %v1352_v50, %v3661_v29  ;;  %4631 = vst [vmem:[#allocation12_spill] sm:$0xff] %v3707_v60 }
  0x64   : > { %1025 = vmatmul.f32.gmra.mxu2 %v3604_v35  ;;  %1338 = vmatpush.msra.mxu3 %v3482_v12  ;;  %v3680_v54 = vand.u32 4294901760, %v1351_v1  ;;  %4634 = vst [vmem:[#allocation14_spill] sm:$0xff] %v3748_v20  ;;  %v1597_v12 = vld [vmem:[%s4543_s16 + $0x58] sm:$0xff]  ;;  %p3150_p3 = pnand %p3149_p2, %p3145_p13 }
  0x65   : > { %1233 = vmatpush.msra.mxu0 %v3485_v3  ;;  %1270 = vmatpush.msra.mxu1 %v3508_v24  ;;  %v3691_v3 = vand.u32 4294901760, %v943_v23  ;;  %v1412_v56 = vsub.f32 %v3659_v0, %v1411_v52  ;;  %v1417_v58 = vand.u32 4294901760, %v3678_v53  ;;  %v3834_v55 = vand.u32 4294901760, %v1597_v12 }
  0x66   : > { %1058 = vmatmul.f32.gmra.mxu3 %v3625_v43  ;;  %v3703_v59 = vsub.f32 %v1351_v1, %v3680_v54 }
  0x67   : > { %1236 = vmatpush.msra.mxu0 %v3511_v4  ;;  %1340 = vmatpush.msra.mxu3 %v3508_v24  ;;  %v871_v24 = vld [vmem:[%s4538_s11] sm:$0x3]  ;;  %v886_v4 = vsel %vm3686_vm11, %v3588_v22, %v882_v36  ;;  %v1413_v63 = vand.u32 4294901760, %v1412_v56  ;;  %v1418_v47 = vsub.f32 %v3678_v53, %v1417_v58  ;;  %v1596_v56 = vld [vmem:[%s4543_s16 + $0x50] sm:$0xff] }
  0x68   : > { %v1423_v2 = vand.u32 4294901760, %v3703_v59  ;;  %v890_v8 = vmul.f32 %v886_v4, %v871_v24  ;;  %v894_v25 = vperm.slane %v871_v24, 1  ;;  %v3846_v24 = vand.u32 4294901760, %v1596_v56 }
  0x69   : > { %1239 = vmatpush.msra.mxu0 %v3527_v30  ;;  %v887_v30 = vperm.slane %v3532_v33, 0  ;;  %v1419_v6 = vand.u32 4294901760, %v1418_v47  ;;  %v1430_v33 = vsub.f32 %v3724_v5, %v1429_v9 }
  0x6a   : > { %945 = vmatmul.f32.gmra.mxu0 %v3691_v3  ;;  %1120 = vmatmul.f32.vlgmr.msrb.gmra.mxu1 %v3592_v27  ;;  %v1424_v7 = vsub.f32 %v3703_v59, %v1423_v2  ;;  %v891_v19 = vperm.slane %v890_v8, 0 }
  0x6b   : > { %1414 = vmatpush.msrb.mxu1 %v1413_v63  ;;  %v888_v18 = vsub.f32 %v869_v15, %v887_v30  ;;  %v1431_v21 = vand.u32 4294901760, %v1430_v33  ;;  %v889_v31 = vsub.f32 %v870_v16, %v887_v30  ;;  %v1595_v63 = vld [vmem:[%s4543_s16 + $0x48] sm:$0xff]  ;;  %v1593_v15 = vld [vmem:[%s4543_s16 + $0x38] sm:$0xff] }
  0x6c   : > { %1159 = vmatmul.f32.vlgmr.msrb.gmra.mxu2 %v3707_v60  ;;  %v1425_v17 = vand.u32 4294901760, %v1424_v7  ;;  %v3861_v30 = vand.u32 4294901760, %v1595_v63 }
  0x6d   : > { %1456 = vmatpush.msrb.mxu2 %v3659_v0  ;;  %1420 = vmatpush.msrb.mxu1 %v1419_v6  ;;  %v892_v22 = vmul.f32 %v891_v19, %v888_v18  ;;  %v893_v32 = vmul.f32 %v891_v19, %v889_v31  ;;  %v1594_v6 = vld [vmem:[%s4543_s16 + $0x40] sm:$0xff] }
  0x6e   : > { %1208 = vmatmul.f32.vlgmr.msrb.gmra.mxu3 %v3606_v37  ;;  %v3876_v13 = vand.u32 4294901760, %v1594_v6 }
  0x6f   : > { %1459 = vmatpush.msrb.mxu2 %v3678_v53  ;;  %1490 = vmatpush.msrb.mxu3 %v3644_v62  ;;  %v895_v26 = vadd.f32 %v894_v25, %v892_v22  ;;  %v896_v40 = vadd.f32 %v894_v25, %v893_v32  ;;  %v1592_v22 = vld [vmem:[%s4543_s16 + $0x30] sm:$0xff] }
  0x70   : > { %1426 = vmatpush.msrb.mxu1 %v1425_v17  ;;  %v3889_v19 = vsub.f32 %v1594_v6, %v3876_v13  ;;  %v3907_v32 = vand.u32 4294901760, %v1592_v22 }
  0x71   : > { %1462 = vmatpush.msrb.mxu2 %v3703_v59  ;;  %1492 = vmatpush.msrb.mxu3 %v3661_v29  ;;  %v1355_v10 = vsel %vm905_vm8, %v895_v26, 0  ;;  %v1358_v42 = vsel %vm905_vm8, %v896_v40, 0 }
  0x72   : > { %1091 = vmatmul.f32.vlgmr.msrb.gmra.mxu0 %v3592_v27  ;;  %1124 = vmatmul.f32.gmra.mxu1 %v3594_v28  ;;  %v3771_v14 = vand.u32 4294901760, %v1355_v10  ;;  %v3790_v49 = vand.u32 4294901760, %v1358_v42 }
  0x73   : > { %1373 = vmatpush.msrb.mxu0 %v3644_v62  ;;  %1465 = vmatpush.msrb.mxu2 %v3724_v5  ;;  %v3859_v5 = vsub.f32 %v1596_v56, %v3846_v24 }
  0x74   : > { %1167 = vmatmul.f32.gmra.mxu2 %v3748_v20  ;;  %1494 = vmatpush.msrb.mxu3 %v3680_v54  ;;  %4635 = vst [vmem:[#allocation15_spill] sm:$0xff] %v3771_v14  ;;  %v3778_v41 = vsub.f32 %v1355_v10, %v3771_v14  ;;  %v3799_v23 = vsub.f32 %v1358_v42, %v3790_v49  ;;  %v4564_v10 = vand.u32 4294901760, %v3889_v19 }
  0x75   : > { %1375 = vmatpush.msrb.mxu0 %v3661_v29  ;;  %1432 = vmatpush.msrb.mxu1 %v1431_v21  ;;  %4638 = vst [vmem:[#allocation18_spill] sm:$0xff] %v3790_v49  ;;  %v4567_v8 = vand.u32 4294901760, %v3859_v5  ;;  %v3893_v21 = vand.u32 4294901760, %v1593_v15 }
  0x76   : > { %1212 = vmatmul.f32.gmra.mxu3 %v3635_v46  ;;  %4636 = vst [vmem:[#allocation16_spill] sm:$0xff] %v3778_v41  ;;  %v3788_v48 = vand.u32 4294901760, %v3778_v41  ;;  %v3806_v0 = vand.u32 4294901760, %v3799_v23  ;;  %v1679_v56 = vsub.f32 %v3889_v19, %v4564_v10  ;;  %v1589_v10 = vld [vmem:[%s4543_s16 + $0x18] sm:$0xff] }
  0x77   : > { %1377 = vmatpush.msrb.mxu0 %v3680_v54  ;;  %1496 = vmatpush.msrb.mxu3 %v3705_v57  ;;  %4639 = vst [vmem:[#allocation19_spill] sm:$0xff] %v3799_v23  ;;  %v1667_v33 = vsub.f32 %v3859_v5, %v4567_v8  ;;  %v3913_v42 = vsub.f32 %v1593_v15, %v3893_v21  ;;  %v1590_v15 = vld [vmem:[%s4543_s16 + $0x20] sm:$0xff]  ;;  %v1588_v8 = vld [vmem:[%s4543_s16 + $0x10] sm:$0xff] }
  0x78   : > { %4637 = vst [vmem:[#allocation17_spill] sm:$0xff] %v3788_v48 }
  0x79   : > { %1379 = vmatpush.msrb.mxu0 %v3705_v57  ;;  %4641 = vst [vmem:[#allocation21_spill] sm:$0xff] %v3806_v0  ;;  %v1668_v26 = vand.u32 4294901760, %v1667_v33 }
  0x7a   : > { %1095 = vmatmul.f32.gmra.mxu0 %v3594_v28  ;;  %1274 = vmatmul.f32.vlgmr.msra.gmra.mxu1 %v3633_v11  ;;  %v4644_v11 = vand.u32 4294901760, %v3859_v5 }
  0x7b   : > { %1560 = vmatpush.msra.mxu1 %v3644_v62  ;;  %v1383_v62 = vsub.f32 %v3778_v41, %v3788_v48 }
  0x7c   : > { %1313 = vmatmul.f32.vlgmr.msra.gmra.mxu2 %v3606_v37 }
  0x7d   : > { %1562 = vmatpush.msra.mxu1 %v3661_v29  ;;  %v3803_v50 = vand.u32 4294901760, %v1383_v62  ;;  %v1391_v29 = vsub.f32 %v3799_v23, %v3806_v0  ;;  %1614 = vmatpush.msra.mxu2 %v3834_v55  ;;  %v1591_v62 = vld [vmem:[%s4543_s16 + $0x28] sm:$0xff] }
  0x7e   : > { %1342 = vmatmul.f32.vlgmr.msra.gmra.mxu3 %v3606_v37  ;;  %v3928_v6 = vand.u32 4294901760, %v1591_v62 }
  0x7f   : > { %1564 = vmatpush.msra.mxu1 %v3680_v54  ;;  %4640 = vst [vmem:[#allocation20_spill] sm:$0xff] %v3803_v50  ;;  %v3814_v51 = vand.u32 4294901760, %v1391_v29  ;;  %1616 = vmatpush.msra.mxu2 %v3846_v24 }
  0x81   : > { %1566 = vmatpush.msra.mxu1 %v3705_v57  ;;  %4642 = vst [vmem:[#allocation22_spill] sm:$0xff] %v3814_v51  ;;  %v3844_v57 = vsub.f32 %v1597_v12, %v3834_v55  ;;  %1618 = vmatpush.msra.mxu2 %v3861_v30 }
  0x82   : > { %1242 = vmatmul.f32.vlgmr.msra.gmra.mxu0 %v3615_v39  ;;  %1280 = vmatmul.f32.gmra.mxu1 %v3710_v61 }
  0x83   : > { %1525 = vmatpush.msra.mxu0 %v1411_v52  ;;  %1620 = vmatpush.msra.mxu2 %v3876_v13 }
  0x84   : > { %1317 = vmatmul.f32.gmra.mxu2 %v3635_v46 }
  0x85   : > { %1529 = vmatpush.msra.mxu0 %v1417_v58  ;;  %1622 = vmatpush.msra.mxu2 %v3893_v21 }
  0x86   : > { %1346 = vmatmul.f32.gmra.mxu3 %v3635_v46 }
  0x87   : > { %1533 = vmatpush.msra.mxu0 %v1423_v2  ;;  %v4569_v2 = vand.u32 4294901760, %v3844_v57  ;;  %1624 = vmatpush.msra.mxu2 %v3907_v32 }
  0x89   : > { %1537 = vmatpush.msra.mxu0 %v1429_v9  ;;  %v1661_v7 = vsub.f32 %v3844_v57, %v4569_v2  ;;  %v3874_v9 = vsub.f32 %v1595_v63, %v3861_v30  ;;  %v3926_v63 = vsub.f32 %v1592_v22, %v3907_v32  ;;  %v3940_v22 = vand.u32 4294901760, %v1590_v15  ;;  %1626 = vmatpush.msra.mxu2 %v3928_v6 }
  0x8a   : > { %1247 = vmatmul.f32.gmra.mxu0 %v3667_v45  ;;  %1434 = vmatmul.f32.vlgmr.msrb.gmra.mxu1 %v3771_v14 }
  0x8b   : > { %1795 = vmatpush.msrb.mxu1 %v3834_v55  ;;  %v1662_v17 = vand.u32 4294901760, %v1661_v7  ;;  %v4565_v18 = vand.u32 4294901760, %v3874_v9  ;;  %v4566_v7 = vand.u32 4294901760, %v3913_v42  ;;  %v4568_v33 = vand.u32 4294901760, %v3926_v63  ;;  %1628 = vmatpush.msra.mxu2 %v3940_v22 }
  0x8c   : > { %1468 = vmatmul.f32.vlgmr.msrb.gmra.mxu2 %v3778_v41  ;;  %v3980_v41 = vand.u32 4294901760, %v1588_v8 }
  0x8d   : > { %1797 = vmatpush.msrb.mxu1 %v3846_v24  ;;  %1663 = vmatpush.msra.mxu3 %v1662_v17  ;;  %v1673_v31 = vsub.f32 %v3874_v9, %v4565_v18  ;;  %v1680_v17 = vand.u32 4294901760, %v1679_v56  ;;  %v3956_v56 = vsub.f32 %v1590_v15, %v3940_v22  ;;  %v3958_v18 = vand.u32 4294901760, %v1589_v10 }
  0x8e   : > { %1500 = vmatmul.f32.vlgmr.msrb.gmra.mxu3 %v3788_v48 }
  0x8f   : > { %1799 = vmatpush.msrb.mxu1 %v3861_v30  ;;  %1669 = vmatpush.msra.mxu3 %v1668_v26  ;;  %v1674_v12 = vand.u32 4294901760, %v1673_v31  ;;  %v3938_v26 = vsub.f32 %v1591_v62, %v3928_v6  ;;  %v1685_v31 = vsub.f32 %v3913_v42, %v4566_v7  ;;  %v1691_v62 = vsub.f32 %v3926_v63, %v4568_v33 }
  0x90   : > { %1630 = vmatpush.msra.mxu2 %v3958_v18 }
  0x91   : > { %1801 = vmatpush.msrb.mxu1 %v3876_v13  ;;  %1675 = vmatpush.msra.mxu3 %v1674_v12  ;;  %v4574_v12 = vand.u32 4294901760, %v3938_v26  ;;  %v1686_v7 = vand.u32 4294901760, %v1685_v31  ;;  %v1692_v2 = vand.u32 4294901760, %v1691_v62  ;;  %v3975_v31 = vsub.f32 %v1589_v10, %v3958_v18  ;;  %v1587_v62 = vld [vmem:[%s4543_s16 + $0x8] sm:$0xff] }
  0x92   : > { %1385 = vmatmul.f32.vlgmr.msrb.gmra.mxu0 %v3803_v50  ;;  %1438 = vmatmul.f32.gmra.mxu1 %v3790_v49 }
  0x93   : > { %1745 = vmatpush.msrb.mxu0 %v3844_v57  ;;  %1803 = vmatpush.msrb.mxu1 %v3893_v21  ;;  %v1697_v15 = vsub.f32 %v3938_v26, %v4574_v12  ;;  %v4584_v10 = vand.u32 4294901760, %v3975_v31 }
  0x94   : > { %1473 = vmatmul.f32.gmra.mxu2 %v3799_v23  ;;  %1681 = vmatpush.msra.mxu3 %v1680_v17  ;;  %v4578_v23 = vand.u32 4294901760, %v3956_v56 }
  0x95   : > { %1748 = vmatpush.msrb.mxu0 %v3859_v5  ;;  %1805 = vmatpush.msrb.mxu1 %v3907_v32  ;;  %v1698_v48 = vand.u32 4294901760, %v1697_v15  ;;  %v1586_v15 = vld [vmem:[%s4543_s16] sm:$0xff] }
  0x96   : > { %1506 = vmatmul.f32.gmra.mxu3 %v3806_v0  ;;  %v1703_v12 = vsub.f32 %v3956_v56, %v4578_v23  ;;  %1632 = vmatpush.msra.mxu2 %v3980_v41 }
  0x97   : > { %1751 = vmatpush.msrb.mxu0 %v3874_v9  ;;  %1807 = vmatpush.msrb.mxu1 %v3928_v6 }
  0x98   : > { %1687 = vmatpush.msra.mxu3 %v1686_v7  ;;  %v3995_v7 = vsub.f32 %v1588_v8, %v3980_v41  ;;  %v1704_v23 = vand.u32 4294901760, %v1703_v12 }
  0x99   : > { %1754 = vmatpush.msrb.mxu0 %v3889_v19  ;;  %1809 = vmatpush.msrb.mxu1 %v3940_v22 }
  0x9a   : > { %1393 = vmatmul.f32.gmra.mxu0 %v3814_v51  ;;  %1568 = vmatmul.f32.vlgmr.msra.gmra.mxu1 %v3771_v14  ;;  %v1714_v8 = vand.u32 4294901760, %v3995_v7 }
  0x9b   : > { %1757 = vmatpush.msrb.mxu0 %v3913_v42  ;;  %1811 = vmatpush.msrb.mxu1 %v3958_v18 }
  0x9c   : > { %1693 = vmatpush.msra.mxu3 %v1692_v2  ;;  %v4009_v2 = vand.u32 4294901760, %v1586_v15 }
  0x9d   : > { %1760 = vmatpush.msrb.mxu0 %v3926_v63  ;;  %1813 = vmatpush.msrb.mxu1 %v3980_v41 }
  0x9e   : > { %1699 = vmatpush.msra.mxu3 %v1698_v48  ;;  %v4017_v61 = vsub.f32 %v1586_v15, %v4009_v2  ;;  %v1715_v48 = vsub.f32 %v3995_v7, %v1714_v8 }
  0x9f   : > { %1763 = vmatpush.msrb.mxu0 %v3938_v26 }
  0xa0   : > { %1705 = vmatpush.msra.mxu3 %v1704_v23  ;;  %v1726_v45 = vand.u32 4294901760, %v4017_v61  ;;  %v1716_v15 = vand.u32 4294901760, %v1715_v48  ;;  %v4645_v48 = vand.u32 4294901760, %v3874_v9 }
  0xa1   : > { %1766 = vmatpush.msrb.mxu0 %v3956_v56 }
  0xa2   : > { %1539 = vmatmul.f32.vlgmr.msra.gmra.mxu0 %v3771_v14  ;;  %1572 = vmatmul.f32.gmra.mxu1 %v3790_v49  ;;  %v1709_v14 = vsub.f32 %v3975_v31, %v4584_v10 }
  0xa3   : > { %1769 = vmatpush.msrb.mxu0 %v3975_v31 }
  0xa4   : > { %v1710_v20 = vand.u32 4294901760, %v1709_v14 }
  0xa5   : > { %1772 = vmatpush.msrb.mxu0 %v3995_v7  ;;  %v4643_v7 = vand.u32 4294901760, %v3844_v57 }
  0xa6   : > { %1711 = vmatpush.msra.mxu3 %v1710_v20 }
  0xa8   : > { %1717 = vmatpush.msra.mxu3 %v1716_v15 }
  0xaa   : > { %1543 = vmatmul.f32.gmra.mxu0 %v3790_v49  ;;  %v3990_v49 = vand.u32 4294901760, %v1587_v62 }
  0xac   : > { %v4007_v50 = vsub.f32 %v1587_v62, %v3990_v49  ;;  %1634 = vmatpush.msra.mxu2 %v3990_v49  ;;  %1815 = vmatpush.msrb.mxu1 %v3990_v49 }
  0xae   : > { %v1720_v12 = vand.u32 4294901760, %v4007_v50  ;;  %1775 = vmatpush.msrb.mxu0 %v4007_v50  ;;  %1636 = vmatpush.msra.mxu2 %v4009_v2 }
  0xaf   : > { %1817 = vmatpush.msrb.mxu1 %v4009_v2 }
  0xb0   : > { %v1721_v14 = vsub.f32 %v4007_v50, %v1720_v12  ;;  %1778 = vmatpush.msrb.mxu0 %v4017_v61  ;;  %1838 = vmatpush.msrb.mxu2 %v4643_v7 }
  0xb2   : > { %v1722_v23 = vand.u32 4294901760, %v1721_v14  ;;  %1842 = vmatpush.msrb.mxu2 %v4644_v11  ;;  %v4647_v11 = vand.u32 4294901760, %v3913_v42 }
  0xb4   : > { %1723 = vmatpush.msra.mxu3 %v1722_v23  ;;  %1846 = vmatpush.msrb.mxu2 %v4645_v48 }
  0xd7   : > { %v3821_v1 = vpop.f32.mrf.mxu1 }
  0xdf   : > { %v3823_v36 = vpop.f32.mrf.mxu0  ;;  %v3825_v52 = vpop.f32.mrf.mxu2 }
  0xe0   : > { %v3827_v53 = vpop.f32.mrf.mxu1  ;;  %v988_v62 = vadd.f32 %v3821_v1, %v3823_v36  ;;  %v1727_v36 = vsub.f32 %v4017_v61, %v1726_v45 }
  0xe1   : > { %v3829_v54 = vpop.f32.mrf.mxu3 }
  0xe2   : > { %v1022_v50 = vadd.f32 %v3825_v52, %v988_v62  ;;  %v1728_v60 = vand.u32 4294901760, %v1727_v36  ;;  %v4646_v52 = vand.u32 4294901760, %v3889_v19 }
  0xe4   : > { %v1054_v39 = vadd.f32 %v3829_v54, %v1022_v50  ;;  %1729 = vmatpush.msra.mxu3 %v1728_v60  ;;  %1850 = vmatpush.msrb.mxu2 %v4646_v52  ;;  %v4648_v60 = vand.u32 4294901760, %v3926_v63 }
  0xe6   : > { %1897 = vmatpush.msrb.mxu3 %v3834_v55  ;;  %1854 = vmatpush.msrb.mxu2 %v4647_v11 }
  0xe7   : > { %v3839_v58 = vpop.f32.mrf.mxu0  ;;  %v3841_v59 = vpop.f32.mrf.mxu2 }
  0xe8   : > { %v3850_v4 = vpop.f32.mrf.mxu1  ;;  %v992_v61 = vadd.f32 %v3827_v53, %v3839_v58  ;;  %1899 = vmatpush.msrb.mxu3 %v3846_v24  ;;  %1858 = vmatpush.msrb.mxu2 %v4648_v60 }
  0xe9   : > { %v3855_v47 = vpop.f32.mrf.mxu3 }
  0xea   : > { %v1027_v9 = vadd.f32 %v3841_v59, %v992_v61  ;;  %1901 = vmatpush.msrb.mxu3 %v3861_v30  ;;  %v4650_v59 = vand.u32 4294901760, %v3956_v56 }
  0xec   : > { %1903 = vmatpush.msrb.mxu3 %v3876_v13  ;;  %v1060_v55 = vadd.f32 %v3855_v47, %v1027_v9 }
  0xee   : > { %1905 = vmatpush.msrb.mxu3 %v3893_v21 }
  0xef   : > { %v3899_v25 = vpop.f32.mrf.mxu0  ;;  %v3901_v16 = vpop.f32.mrf.mxu2 }
  0xf0   : > { %v3910_v40 = vpop.f32.mrf.mxu1  ;;  %v1093_v5 = vadd.f32 %v3899_v25, %v1054_v39  ;;  %v4649_v39 = vand.u32 4294901760, %v3938_v26  ;;  %1907 = vmatpush.msrb.mxu3 %v3907_v32 }
  0xf1   : > { %v3920_v29 = vpop.f32.mrf.mxu3 }
  0xf2   : > { %v1122_v53 = vadd.f32 %v3850_v4, %v1093_v5  ;;  %1862 = vmatpush.msrb.mxu2 %v4649_v39  ;;  %v4651_v4 = vand.u32 4294901760, %v3975_v31  ;;  %1909 = vmatpush.msrb.mxu3 %v3928_v6 }
  0xf4   : > { %1866 = vmatpush.msrb.mxu2 %v4650_v59  ;;  %v1161_v30 = vadd.f32 %v3901_v16, %v1122_v53  ;;  %1911 = vmatpush.msrb.mxu3 %v3940_v22  ;;  %v1942_v59 = vld [vmem:[%s4545_s18 + $0x58] sm:$0xff] }
  0xf6   : > { %1870 = vmatpush.msrb.mxu2 %v4651_v4  ;;  %v1210_v47 = vadd.f32 %v3920_v29, %v1161_v30  ;;  %1913 = vmatpush.msrb.mxu3 %v3958_v18  ;;  %v4087_v30 = vand.u32 4294901760, %v1942_v59 }
  0xf7   : > { %v3966_v17 = vpop.f32.mrf.mxu0  ;;  %v3968_v33 = vpop.f32.mrf.mxu2 }
  0xf8   : > { %v3978_v0 = vpop.f32.mrf.mxu1  ;;  %v1097_v19 = vadd.f32 %v3966_v17, %v1060_v55  ;;  %1874 = vmatpush.msrb.mxu2 %v1714_v8  ;;  %1915 = vmatpush.msrb.mxu3 %v3980_v41  ;;  %v4093_v4 = vsub.f32 %v1942_v59, %v4087_v30 }
  0xf9   : > { %v4001_v51 = vpop.f32.mrf.mxu3  ;;  %1958 = vmatpush.msra.mxu0 %v4087_v30 }
  0xfa   : > { %v1126_v13 = vadd.f32 %v3910_v40, %v1097_v19  ;;  %1878 = vmatpush.msrb.mxu2 %v1720_v12  ;;  %1917 = vmatpush.msrb.mxu3 %v3990_v49  ;;  %v3112_v49 = vld [vmem:[%s4542_s15] ss:$0 sm:$0xff]  ;;  %v1941_v19 = vld [vmem:[%s4545_s18 + $0x50] sm:$0xff] }
  0xfc   : > { %1882 = vmatpush.msrb.mxu2 %v1726_v45  ;;  %v1169_v32 = vadd.f32 %v3968_v33, %v1126_v13  ;;  %1919 = vmatpush.msrb.mxu3 %v4009_v2  ;;  %v1940_v13 = vld [vmem:[%s4545_s18 + $0x48] sm:$0xff] }
  0xfe   : > { %v1214_v40 = vadd.f32 %v4001_v51, %v1169_v32 }
  0xff   : > { %v1243_v10 = vpop.f32.mrf.mxu0  ;;  %v1314_v46 = vpop.f32.mrf.mxu2 }
 0x100   : > { %v4030_v1 = vpop.f32.mrf.mxu1  ;;  %v1244_v16 = vadd.f32 %v1243_v10, %v1210_v47  ;;  %v4095_v47 = vand.u32 4294901760, %v1941_v19 }
 0x101   : > { %v1343_v20 = vpop.f32.mrf.mxu3 }
 0x102   : > { %v1276_v29 = vadd.f32 %v3978_v0, %v1244_v16  ;;  %v4106_v16 = vand.u32 4294901760, %v1940_v13  ;;  %1960 = vmatpush.msra.mxu0 %v4095_v47 }
 0x104   : > { %v1315_v56 = vadd.f32 %v1314_v46, %v1276_v29  ;;  %1962 = vmatpush.msra.mxu0 %v4106_v16 }
 0x106   : > { %v1344_v8 = vadd.f32 %v1343_v20, %v1315_v56 }
 0x107   : > { %v1248_v57 = vpop.f32.mrf.mxu0  ;;  %v1318_v54 = vpop.f32.mrf.mxu2 }
 0x108   : > { %v1435_v62 = vpop.f32.mrf.mxu1  ;;  %v1249_v17 = vadd.f32 %v1248_v57, %v1214_v40 }
 0x109   : > { %v1347_v58 = vpop.f32.mrf.mxu3 }
 0x10a   : > { %v1282_v41 = vadd.f32 %v4030_v1, %v1249_v17 }
 0x10c   : > { %v1319_v15 = vadd.f32 %v1318_v54, %v1282_v41 }
 0x10e   : > { %v1348_v48 = vadd.f32 %v1347_v58, %v1319_v15 }
 0x10f   : > { %v1386_v24 = vpop.f32.mrf.mxu0  ;;  %v1469_v21 = vpop.f32.mrf.mxu2 }
 0x110   : > { %v1439_v25 = vpop.f32.mrf.mxu1  ;;  %v1436_v42 = vadd.f32 %v1435_v62, %v1386_v24 }
 0x111   : > { %v1501_v26 = vpop.f32.mrf.mxu3 }
 0x112   : > { %v1470_v6 = vadd.f32 %v1469_v21, %v1436_v42  ;;  %v2004_v21 = vand.u32 4294901760, %v4093_v4  ;;  %v1939_v42 = vld [vmem:[%s4545_s18 + $0x40] sm:$0xff] }
 0x113   : > { %v4121_v29 = vand.u32 4294901760, %v1939_v42 }
 0x114   : > { %v1502_v31 = vadd.f32 %v1501_v26, %v1470_v6  ;;  %v4119_v26 = vsub.f32 %v1940_v13, %v4106_v16  ;;  %v1938_v6 = vld [vmem:[%s4545_s18 + $0x38] sm:$0xff] }
 0x115   : > { %v4134_v17 = vsub.f32 %v1939_v42, %v4121_v29  ;;  %1964 = vmatpush.msra.mxu0 %v4121_v29 }
 0x116   : > { %v2016_v56 = vand.u32 4294901760, %v4119_v26 }
 0x117   : > { %v1394_v63 = vpop.f32.mrf.mxu0  ;;  %v1474_v45 = vpop.f32.mrf.mxu2 }
 0x118   : > { %v1569_v22 = vpop.f32.mrf.mxu1  ;;  %v1440_v18 = vadd.f32 %v1439_v25, %v1394_v63  ;;  %v4104_v25 = vsub.f32 %v1941_v19, %v4095_v47  ;;  %v2005_v63 = vsub.f32 %v4093_v4, %v2004_v21  ;;  %v1931_v19 = vld [vmem:[%s4545_s18] sm:$0xff] }
 0x119   : > { %v1507_v51 = vpop.f32.mrf.mxu3 }
 0x11a   : > { %v1475_v12 = vadd.f32 %v1474_v45, %v1440_v18  ;;  %v2010_v32 = vand.u32 4294901760, %v4104_v25  ;;  %v2006_v40 = vand.u32 4294901760, %v2005_v63  ;;  %v1937_v18 = vld [vmem:[%s4545_s18 + $0x30] sm:$0xff] }
 0x11c   : > { %v1508_v2 = vadd.f32 %v1507_v51, %v1475_v12  ;;  %2007 = vmatpush.msra.mxu1 %v2006_v40  ;;  %v1936_v12 = vld [vmem:[%s4545_s18 + $0x28] sm:$0xff] }
 0x11f   : > { %v1540_v10 = vpop.f32.mrf.mxu0 }
 0x120   : > { %v1541_v33 = vadd.f32 %v1540_v10, %v1502_v31  ;;  %v1573_v36 = vpop.f32.mrf.mxu1  ;;  %v4138_v31 = vand.u32 4294901760, %v1938_v6  ;;  %v2017_v10 = vsub.f32 %v4119_v26, %v2016_v56 }
 0x122   : > { %v1570_v0 = vadd.f32 %v1569_v22, %v1541_v33  ;;  %v2011_v22 = vsub.f32 %v4104_v25, %v2010_v32  ;;  %v2022_v33 = vand.u32 4294901760, %v4134_v17  ;;  %v4152_v41 = vsub.f32 %v1938_v6, %v4138_v31  ;;  %1966 = vmatpush.msra.mxu0 %v4138_v31 }
 0x123   : > { %v4225_v6 = vand.u32 4294901760, %v1931_v19 }
 0x124   : > { %v1576_v14 = vadd.f32 %v1570_v0, %v1344_v8  ;;  %v2012_v45 = vand.u32 4294901760, %v2011_v22  ;;  %v4148_v8 = vand.u32 4294901760, %v1937_v18  ;;  %v2018_v0 = vand.u32 4294901760, %v2017_v10 }
 0x125   : > { %v2028_v15 = vand.u32 4294901760, %v4152_v41 }
 0x126   : > { %v1582_v46 = vadd.f32 %v3112_v49, %v1576_v14  ;;  %2013 = vmatpush.msra.mxu1 %v2012_v45  ;;  %v4163_v51 = vsub.f32 %v1937_v18, %v4148_v8  ;;  %v4165_v14 = vand.u32 4294901760, %v1936_v12  ;;  %1968 = vmatpush.msra.mxu0 %v4148_v8  ;;  %v2069_v45 = vsub.f32 %v1931_v19, %v4225_v6 }
 0x127   : > { %v1544_v23 = vpop.f32.mrf.mxu0 }
 0x128   : > { %v1584_v7 = vmax.f32 %v1582_v46, 0.0  ;;  %v1545_v50 = vadd.f32 %v1544_v23, %v1508_v2  ;;  %v1935_v2 = vld [vmem:[%s4545_s18 + $0x20] sm:$0xff]  ;;  %2019 = vmatpush.msra.mxu1 %v2018_v0  ;;  %v2034_v23 = vand.u32 4294901760, %v4163_v51  ;;  %1970 = vmatpush.msra.mxu0 %v4165_v14  ;;  %v2070_v0 = vand.u32 4294901760, %v2069_v45 }
 0x12a   : > { %v1604_v20 = vsel %vm1602_vm12, %v1584_v7, 0  ;;  %v1574_v1 = vadd.f32 %v1573_v36, %v1545_v50  ;;  %v4175_v36 = vsub.f32 %v1936_v12, %v4165_v14  ;;  %v4177_v7 = vand.u32 4294901760, %v1935_v2 }
 0x12b   : > { %v1637_v61 = vand.u32 4294901760, %v1604_v20  ;;  %v2029_v50 = vsub.f32 %v4152_v41, %v2028_v15 }
 0x12c   : > { %v1577_v57 = vadd.f32 %v1574_v1, %v1348_v48  ;;  %v1934_v48 = vld [vmem:[%s4545_s18 + $0x18] sm:$0xff]  ;;  %v2040_v1 = vand.u32 4294901760, %v4175_v36  ;;  %1972 = vmatpush.msra.mxu0 %v4177_v7 }
 0x12d   : > { %1731 = vmatmul.f32.vlgmr.msra.gmra.mxu3 %v1637_v61  ;;  %v1638_v52 = vsub.f32 %v1604_v20, %v1637_v61  ;;  %v2035_v20 = vsub.f32 %v4163_v51, %v2034_v23 }
 0x12e   : > { %v1583_v5 = vadd.f32 %v3112_v49, %v1577_v57  ;;  %2139 = vmatpush.msra.mxu3 %v4087_v30  ;;  %v2023_v49 = vsub.f32 %v4134_v17, %v2022_v33  ;;  %v4195_v57 = vand.u32 4294901760, %v1934_v48 }
 0x12f   : > { %1781 = vmatmul.f32.vlgmr.msrb.gmra.mxu0 %v1638_v52  ;;  %v1639_v11 = vand.u32 4294901760, %v1638_v52 }
 0x130   : > { %v1585_v9 = vmax.f32 %v1583_v5, 0.0  ;;  %2141 = vmatpush.msra.mxu3 %v4095_v47  ;;  %v2024_v46 = vand.u32 4294901760, %v2023_v49  ;;  %v1933_v5 = vld [vmem:[%s4545_s18 + $0x10] sm:$0xff]  ;;  %1974 = vmatpush.msra.mxu0 %v4195_v57 }
 0x131   : > { %1821 = vmatmul.f32.vlgmr.msrb.gmra.mxu1 %v1639_v11  ;;  %v1640_v54 = vsub.f32 %v1638_v52, %v1639_v11  ;;  %v2030_v52 = vand.u32 4294901760, %v2029_v50  ;;  %v2036_v11 = vand.u32 4294901760, %v2035_v20 }
 0x132   : > { %v1607_v62 = vsel %vm1602_vm12, %v1585_v9, 0  ;;  %2143 = vmatpush.msra.mxu3 %v4106_v16  ;;  %2025 = vmatpush.msra.mxu1 %v2024_v46  ;;  %v2041_v9 = vsub.f32 %v4175_v36, %v2040_v1  ;;  %v2071_v46 = vsub.f32 %v2069_v45, %v2070_v0 }
 0x133   : > { %v1641_v60 = vand.u32 4294901760, %v1640_v54  ;;  %v1645_v53 = vand.u32 4294901760, %v1607_v62 }
 0x134   : > { %2145 = vmatpush.msra.mxu3 %v4121_v29  ;;  %2031 = vmatpush.msra.mxu1 %v2030_v52  ;;  %v2072_v50 = vand.u32 4294901760, %v2071_v46 }
 0x135   : > { %1642 = vmatmul.f32.vlgmr.msra.gmra.mxu2 %v1641_v60  ;;  %1735 = vmatmul.f32.gmra.mxu3 %v1645_v53  ;;  %v1646_v39 = vsub.f32 %v1607_v62, %v1645_v53  ;;  %v2051_v62 = vsub.f32 %v1934_v48, %v4195_v57  ;;  %v4209_v60 = vand.u32 4294901760, %v1933_v5 }
 0x136   : > { %2089 = vmatpush.msra.mxu2 %v4093_v4  ;;  %2147 = vmatpush.msra.mxu3 %v4138_v31 }
 0x137   : > { %1786 = vmatmul.f32.gmra.mxu0 %v1646_v39  ;;  %v1647_v55 = vand.u32 4294901760, %v1646_v39  ;;  %2037 = vmatpush.msra.mxu1 %v2036_v11  ;;  %v2057_v59 = vsub.f32 %v1933_v5, %v4209_v60 }
 0x138   : > { %2092 = vmatpush.msra.mxu2 %v4104_v25  ;;  %2149 = vmatpush.msra.mxu3 %v4148_v8 }
 0x139   : > { %1827 = vmatmul.f32.gmra.mxu1 %v1647_v55  ;;  %v1648_v58 = vsub.f32 %v1646_v39, %v1647_v55  ;;  %v2042_v39 = vand.u32 4294901760, %v2041_v9  ;;  %1976 = vmatpush.msra.mxu0 %v4209_v60  ;;  %v2058_v40 = vand.u32 4294901760, %v2057_v59 }
 0x13a   : > { %2095 = vmatpush.msra.mxu2 %v4119_v26  ;;  %2151 = vmatpush.msra.mxu3 %v4165_v14 }
 0x13b   : > { %v1649_v24 = vand.u32 4294901760, %v1648_v58  ;;  %v2052_v58 = vand.u32 4294901760, %v2051_v62  ;;  %2043 = vmatpush.msra.mxu1 %v2042_v39  ;;  %v2059_v10 = vsub.f32 %v2057_v59, %v2058_v40 }
 0x13c   : > { %2098 = vmatpush.msra.mxu2 %v4134_v17  ;;  %2153 = vmatpush.msra.mxu3 %v4177_v7 }
 0x13d   : > { %1650 = vmatmul.f32.gmra.mxu2 %v1649_v24  ;;  %1921 = vmatmul.f32.vlgmr.msrb.gmra.mxu3 %v1637_v61  ;;  %v2053_v42 = vsub.f32 %v2051_v62, %v2052_v58  ;;  %v2060_v49 = vand.u32 4294901760, %v2059_v10 }
 0x13e   : > { %2101 = vmatpush.msra.mxu2 %v4152_v41  ;;  %2155 = vmatpush.msra.mxu3 %v4195_v57 }
 0x13f   : > { %v2054_v22 = vand.u32 4294901760, %v2053_v42 }
 0x140   : > { %2104 = vmatpush.msra.mxu2 %v4163_v51  ;;  %2157 = vmatpush.msra.mxu3 %v4209_v60 }
 0x142   : > { %2107 = vmatpush.msra.mxu2 %v4175_v36 }
 0x145   : > { %1884 = vmatmul.f32.vlgmr.msrb.gmra.mxu2 %v1637_v61  ;;  %1925 = vmatmul.f32.gmra.mxu3 %v1645_v53  ;;  %v4193_v61 = vsub.f32 %v1935_v2, %v4177_v7 }
 0x147   : > { %v2046_v54 = vand.u32 4294901760, %v4193_v61  ;;  %2110 = vmatpush.msra.mxu2 %v4193_v61 }
 0x149   : > { %v2047_v55 = vsub.f32 %v4193_v61, %v2046_v54  ;;  %2113 = vmatpush.msra.mxu2 %v2051_v62 }
 0x14b   : > { %v2048_v13 = vand.u32 4294901760, %v2047_v55  ;;  %2116 = vmatpush.msra.mxu2 %v2057_v59 }
 0x14d   : > { %1888 = vmatmul.f32.gmra.mxu2 %v1645_v53  ;;  %v1932_v53 = vld [vmem:[%s4545_s18 + $0x8] sm:$0xff]  ;;  %2049 = vmatpush.msra.mxu1 %v2048_v13 }
 0x14e   : > { %v4216_v24 = vand.u32 4294901760, %v1932_v53 }
 0x14f   : > { %2055 = vmatpush.msra.mxu1 %v2054_v22 }
 0x150   : > { %v2063_v63 = vsub.f32 %v1932_v53, %v4216_v24  ;;  %1978 = vmatpush.msra.mxu0 %v4216_v24  ;;  %2159 = vmatpush.msra.mxu3 %v4216_v24 }
 0x151   : > { %2061 = vmatpush.msra.mxu1 %v2060_v49 }
 0x152   : > { %v2064_v18 = vand.u32 4294901760, %v2063_v63  ;;  %2119 = vmatpush.msra.mxu2 %v2063_v63  ;;  %1980 = vmatpush.msra.mxu0 %v4225_v6 }
 0x153   : > { %2161 = vmatpush.msra.mxu3 %v4225_v6 }
 0x154   : > { %v2065_v12 = vsub.f32 %v2063_v63, %v2064_v18  ;;  %2122 = vmatpush.msra.mxu2 %v2069_v45  ;;  %2182 = vmatpush.msrb.mxu0 %v2004_v21 }
 0x156   : > { %v2066_v2 = vand.u32 4294901760, %v2065_v12  ;;  %2186 = vmatpush.msrb.mxu0 %v2010_v32 }
 0x158   : > { %2067 = vmatpush.msra.mxu1 %v2066_v2  ;;  %2190 = vmatpush.msrb.mxu0 %v2016_v56 }
 0x15a   : > { %2073 = vmatpush.msra.mxu1 %v2072_v50  ;;  %2194 = vmatpush.msrb.mxu0 %v2022_v33 }
 0x15c   : > { %2241 = vmatpush.msrb.mxu1 %v4087_v30  ;;  %2198 = vmatpush.msrb.mxu0 %v2028_v15  ;;  %v2282_v30 = vld [vmem:[%s4548_s21 + $0x18] sm:$0xff] }
 0x15d   : > { %v4260_v21 = vand.u32 4294901760, %v2282_v30 }
 0x15e   : > { %2243 = vmatpush.msrb.mxu1 %v4095_v47  ;;  %2202 = vmatpush.msrb.mxu0 %v2034_v23  ;;  %v3113_v47 = vld [vmem:[%s4544_s17] ss:$0 sm:$0xff] }
 0x15f   : > { %2296 = vmatpush.msrb.mxu2 %v4260_v21  ;;  %v4268_v32 = vsub.f32 %v2282_v30, %v4260_v21  ;;  %v2278_v30 = vld [vmem:[%s4547_s20 + $0x18] sm:$0xff] }
 0x160   : > { %2245 = vmatpush.msrb.mxu1 %v4106_v16  ;;  %2206 = vmatpush.msrb.mxu0 %v2040_v1  ;;  %v2281_v16 = vld [vmem:[%s4548_s21 + $0x10] sm:$0xff] }
 0x161   : > { %v4270_v26 = vand.u32 4294901760, %v2281_v16  ;;  %v2334_v17 = vand.u32 4294901760, %v4268_v32 }
 0x162   : > { %2247 = vmatpush.msrb.mxu1 %v4121_v29  ;;  %2210 = vmatpush.msrb.mxu0 %v2046_v54  ;;  %v2280_v29 = vld [vmem:[%s4548_s21 + $0x8] sm:$0xff] }
 0x163   : > { %2298 = vmatpush.msrb.mxu2 %v4270_v26  ;;  %v4281_v33 = vand.u32 4294901760, %v2280_v29  ;;  %v2335_v41 = vsub.f32 %v4268_v32, %v2334_v17 }
 0x164   : > { %2249 = vmatpush.msrb.mxu1 %v4138_v31  ;;  %2214 = vmatpush.msrb.mxu0 %v2052_v58  ;;  %v4279_v31 = vsub.f32 %v2281_v16, %v4270_v26 }
 0x165   : > { %2300 = vmatpush.msrb.mxu2 %v4281_v33 }
 0x166   : > { %2251 = vmatpush.msrb.mxu1 %v4148_v8  ;;  %2218 = vmatpush.msrb.mxu0 %v2058_v40  ;;  %v2279_v8 = vld [vmem:[%s4548_s21] sm:$0xff]  ;;  %v2340_v51 = vand.u32 4294901760, %v4279_v31 }
 0x167   : > { %v4294_v23 = vand.u32 4294901760, %v2279_v8 }
 0x168   : > { %2253 = vmatpush.msrb.mxu1 %v4165_v14  ;;  %2222 = vmatpush.msrb.mxu0 %v2064_v18  ;;  %v4291_v14 = vsub.f32 %v2280_v29, %v4281_v33  ;;  %v2341_v48 = vsub.f32 %v4279_v31, %v2340_v51 }
 0x169   : > { %2302 = vmatpush.msrb.mxu2 %v4294_v23 }
 0x16a   : > { %2255 = vmatpush.msrb.mxu1 %v4177_v7  ;;  %2226 = vmatpush.msrb.mxu0 %v2070_v0  ;;  %v2336_v7 = vand.u32 4294901760, %v2335_v41  ;;  %v2346_v20 = vand.u32 4294901760, %v4291_v14  ;;  %v2342_v52 = vand.u32 4294901760, %v2341_v48 }
 0x16c   : > { %2257 = vmatpush.msrb.mxu1 %v4195_v57  ;;  %v4301_v57 = vsub.f32 %v2279_v8, %v4294_v23  ;;  %2337 = vmatpush.msrb.mxu3 %v2336_v7  ;;  %v2347_v5 = vsub.f32 %v4291_v14, %v2346_v20 }
 0x16e   : > { %2259 = vmatpush.msrb.mxu1 %v4209_v60  ;;  %v2352_v11 = vand.u32 4294901760, %v4301_v57  ;;  %2343 = vmatpush.msrb.mxu3 %v2342_v52  ;;  %v2348_v62 = vand.u32 4294901760, %v2347_v5 }
 0x170   : > { %2261 = vmatpush.msrb.mxu1 %v4216_v24  ;;  %v2353_v53 = vsub.f32 %v4301_v57, %v2352_v11  ;;  %2349 = vmatpush.msrb.mxu3 %v2348_v62 }
 0x172   : > { %2263 = vmatpush.msrb.mxu1 %v4225_v6  ;;  %v2354_v39 = vand.u32 4294901760, %v2353_v53 }
 0x174   : > { %2355 = vmatpush.msrb.mxu3 %v2354_v39 }
 0x1ac   : > { %v1782_v1 = vpop.f32.mrf.mxu0 }
 0x1ae   : > { %v1822_v60 = vpop.f32.mrf.mxu1 }
 0x1b0   : > { %v1732_v4 = vpop.f32.mrf.mxu3 }
 0x1b4   : > { %v1787_v13 = vpop.f32.mrf.mxu0 }
 0x1b6   : > { %v1828_v40 = vpop.f32.mrf.mxu1 }
 0x1b8   : > { %v1643_v25 = vpop.f32.mrf.mxu2  ;;  %v1736_v15 = vpop.f32.mrf.mxu3 }
 0x1b9   : > { %v1644_v56 = vadd.f32 %v3113_v47, %v1643_v25  ;;  %v4319_v25 = vand.u32 4294901760, %v2278_v30 }
 0x1bb   : > { %v1733_v36 = vadd.f32 %v1732_v4, %v1644_v56  ;;  %v4326_v56 = vsub.f32 %v2278_v30, %v4319_v25  ;;  %v4660_v30 = vld [vmem:[#allocation15_spill] sm:$0xff] }
 0x1bd   : > { %v1783_v54 = vadd.f32 %v1782_v1, %v1733_v36  ;;  %v2550_v8 = vand.u32 4294901760, %v4326_v56 }
 0x1bf   : > { %v1823_v58 = vadd.f32 %v1822_v60, %v1783_v54  ;;  %v2717_v60 = vld [vmem:[%s4549_s22 + $0x10] sm:$0xff] }
 0x1c0   : > { %v1651_v61 = vpop.f32.mrf.mxu2  ;;  %v1922_v24 = vpop.f32.mrf.mxu3  ;;  %v4396_v39 = vand.u32 4294901760, %v2717_v60 }
 0x1c1   : > { %v1652_v9 = vadd.f32 %v3113_v47, %v1651_v61 }
 0x1c3   : > { %v1737_v55 = vadd.f32 %v1736_v15, %v1652_v9  ;;  %v2718_v9 = vld [vmem:[%s4549_s22 + $0x18] sm:$0xff] }
 0x1c4   : > { %v4386_v54 = vand.u32 4294901760, %v2718_v9 }
 0x1c5   : > { %v1788_v63 = vadd.f32 %v1787_v13, %v1737_v55  ;;  %v2715_v13 = vld [vmem:[%s4549_s22] sm:$0xff] }
 0x1c6   : > { %v4394_v53 = vsub.f32 %v2718_v9, %v4386_v54 }
 0x1c7   : > { %v1829_v18 = vadd.f32 %v1828_v40, %v1788_v63 }
 0x1c8   : > { %v1885_v59 = vpop.f32.mrf.mxu2  ;;  %v1926_v49 = vpop.f32.mrf.mxu3 }
 0x1c9   : > { %v1886_v19 = vadd.f32 %v1885_v59, %v1823_v58  ;;  %v2716_v58 = vld [vmem:[%s4549_s22 + $0x8] sm:$0xff]  ;;  %v4407_v59 = vsub.f32 %v2717_v60, %v4396_v39 }
 0x1cb   : > { %v1923_v42 = vadd.f32 %v1922_v24, %v1886_v19  ;;  %v2770_v24 = vand.u32 4294901760, %v4394_v53  ;;  %v4409_v19 = vand.u32 4294901760, %v2716_v58 }
 0x1cd   : > { %v1929_v6 = vmax.f32 %v1923_v42, 0.0  ;;  %v2776_v42 = vand.u32 4294901760, %v4407_v59  ;;  %v2781_v63 = vsub.f32 %v2716_v58, %v4409_v19 }
 0x1cf   : > { %v1948_v22 = vsel %vm1602_vm12, %v1929_v6, 0  ;;  %v2737_v6 = vand.u32 4294901760, %v2715_v13  ;;  %v2782_v40 = vand.u32 4294901760, %v2781_v63 }
 0x1d0   : > { %v4308_v45 = vand.u32 4294901760, %v1948_v22  ;;  %v1889_v10 = vpop.f32.mrf.mxu2 }
 0x1d1   : > { %v1890_v12 = vadd.f32 %v1889_v10, %v1829_v18  ;;  %v2777_v18 = vsub.f32 %v4407_v59, %v2776_v42  ;;  %v2783_v10 = vsub.f32 %v2781_v63, %v2782_v40 }
 0x1d2   : > { %v1982_v0 = vsub.f32 %v1948_v22, %v4308_v45  ;;  %2075 = vmatmul.f32.vlgmr.msra.gmra.mxu1 %v4308_v45  ;;  %v2787_v22 = vsub.f32 %v2715_v13, %v2737_v6 }
 0x1d3   : > { %v1927_v2 = vadd.f32 %v1926_v49, %v1890_v12  ;;  %2413 = vmatpush.msra.mxu1 %v4260_v21  ;;  %v2784_v49 = vand.u32 4294901760, %v2783_v10 }
 0x1d4   : > { %2125 = vmatmul.f32.vlgmr.msra.gmra.mxu2 %v1982_v0  ;;  %v1983_v46 = vand.u32 4294901760, %v1982_v0  ;;  %v2788_v12 = vand.u32 4294901760, %v2787_v22 }
 0x1d5   : > { %v1930_v50 = vmax.f32 %v1927_v2, 0.0  ;;  %2448 = vmatpush.msra.mxu2 %v2334_v17  ;;  %2415 = vmatpush.msra.mxu1 %v4270_v26 }
 0x1d6   : > { %2165 = vmatmul.f32.vlgmr.msra.gmra.mxu3 %v1983_v46  ;;  %v1984_v4 = vsub.f32 %v1982_v0, %v1983_v46  ;;  %v2778_v0 = vand.u32 4294901760, %v2777_v18  ;;  %v2789_v2 = vsub.f32 %v2787_v22, %v2788_v12  ;;  %v4657_v46 = vld [vmem:[#allocation13_spill] sm:$0xff] }
 0x1d7   : > { %v1951_v47 = vsel %vm1602_vm12, %v1930_v50, 0  ;;  %2483 = vmatpush.msra.mxu3 %v4260_v21  ;;  %2452 = vmatpush.msra.mxu2 %v2340_v51  ;;  %v2277_v21 = vld [vmem:[%s4547_s20 + $0x10] sm:$0xff]  ;;  %v2551_v51 = vsub.f32 %v4326_v56, %v2550_v8 }
 0x1d8   : > { %v4321_v16 = vand.u32 4294901760, %v1951_v47  ;;  %v1985_v29 = vand.u32 4294901760, %v1984_v4  ;;  %2417 = vmatpush.msra.mxu1 %v4281_v33  ;;  %v4658_v50 = vld [vmem:[#allocation14_spill] sm:$0xff]  ;;  %v4659_v4 = vld [vmem:[#allocation20_spill] sm:$0xff] }
 0x1d9   : > { %2485 = vmatpush.msra.mxu3 %v4270_v26  ;;  %2456 = vmatpush.msra.mxu2 %v2346_v20  ;;  %v4336_v26 = vand.u32 4294901760, %v2277_v21  ;;  %v2552_v36 = vand.u32 4294901760, %v2551_v51  ;;  %v2275_v20 = vld [vmem:[%s4547_s20] sm:$0xff] }
 0x1da   : > { %1986 = vmatmul.f32.vlgmr.msra.gmra.mxu0 %v1985_v29  ;;  %2079 = vmatmul.f32.gmra.mxu1 %v4321_v16  ;;  %v1990_v17 = vsub.f32 %v1951_v47, %v4321_v16  ;;  %v4661_v47 = vld [vmem:[#allocation22_spill] sm:$0xff]  ;;  %v4664_v29 = vld [vmem:[#allocation16_spill] sm:$0xff] }
 0x1db   : > { %2379 = vmatpush.msra.mxu0 %v4268_v32  ;;  %2487 = vmatpush.msra.mxu3 %v4281_v33  ;;  %v4344_v15 = vsub.f32 %v2277_v21, %v4336_v26  ;;  %v2276_v33 = vld [vmem:[%s4547_s20 + $0x8] sm:$0xff]  ;;  %v3114_v21 = vld [vmem:[%s4546_s19] ss:$0 sm:$0xff] }
 0x1dc   : > { %2130 = vmatmul.f32.gmra.mxu2 %v1990_v17  ;;  %v1991_v41 = vand.u32 4294901760, %v1990_v17  ;;  %2419 = vmatpush.msra.mxu1 %v4294_v23  ;;  %v4352_v7 = vand.u32 4294901760, %v2276_v33 }
 0x1dd   : > { %2382 = vmatpush.msra.mxu0 %v4279_v31  ;;  %2460 = vmatpush.msra.mxu2 %v2352_v11  ;;  %v2556_v31 = vand.u32 4294901760, %v4344_v15 }
 0x1de   : > { %2171 = vmatmul.f32.gmra.mxu3 %v1991_v41  ;;  %v1992_v32 = vsub.f32 %v1990_v17, %v1991_v41 }
 0x1df   : > { %2385 = vmatpush.msra.mxu0 %v4291_v14  ;;  %2489 = vmatpush.msra.mxu3 %v4294_v23  ;;  %v2557_v1 = vsub.f32 %v4344_v15, %v2556_v31  ;;  %v4362_v14 = vsub.f32 %v2276_v33, %v4352_v7  ;;  %v4364_v23 = vand.u32 4294901760, %v2275_v20 }
 0x1e0   : > { %v1993_v48 = vand.u32 4294901760, %v1992_v32 }
 0x1e1   : > { %2388 = vmatpush.msra.mxu0 %v4301_v57  ;;  %v2558_v61 = vand.u32 4294901760, %v2557_v1  ;;  %v2562_v52 = vand.u32 4294901760, %v4362_v14  ;;  %v4369_v5 = vsub.f32 %v2275_v20, %v4364_v23 }
 0x1e2   : > { %1994 = vmatmul.f32.gmra.mxu0 %v1993_v48  ;;  %2265 = vmatmul.f32.vlgmr.msrb.gmra.mxu1 %v4308_v45 }
 0x1e3   : > { %2553 = vmatpush.msrb.mxu1 %v2552_v36  ;;  %v2563_v57 = vsub.f32 %v4362_v14, %v2562_v52  ;;  %v2568_v11 = vand.u32 4294901760, %v4369_v5 }
 0x1e4   : > { %2308 = vmatmul.f32.vlgmr.msrb.gmra.mxu2 %v3630_v44 }
 0x1e5   : > { %2595 = vmatpush.msrb.mxu2 %v4326_v56  ;;  %2559 = vmatpush.msrb.mxu1 %v2558_v61  ;;  %v2569_v44 = vsub.f32 %v4369_v5, %v2568_v11  ;;  %v2564_v62 = vand.u32 4294901760, %v2563_v57  ;;  %v4665_v56 = vld [vmem:[#allocation21_spill] sm:$0xff] }
 0x1e6   : > { %2357 = vmatmul.f32.vlgmr.msrb.gmra.mxu3 %v3592_v27 }
 0x1e7   : > { %2629 = vmatpush.msrb.mxu3 %v4319_v25  ;;  %2598 = vmatpush.msrb.mxu2 %v4344_v15  ;;  %v2570_v55 = vand.u32 4294901760, %v2569_v44 }
 0x1e8   : > { %2565 = vmatpush.msrb.mxu1 %v2564_v62 }
 0x1e9   : > { %2631 = vmatpush.msrb.mxu3 %v4336_v26  ;;  %2601 = vmatpush.msrb.mxu2 %v4362_v14 }
 0x1ea   : > { %2228 = vmatmul.f32.vlgmr.msrb.gmra.mxu0 %v4308_v45  ;;  %2269 = vmatmul.f32.gmra.mxu1 %v4321_v16 }
 0x1eb   : > { %2512 = vmatpush.msrb.mxu0 %v4319_v25  ;;  %2633 = vmatpush.msrb.mxu3 %v4352_v7 }
 0x1ec   : > { %2316 = vmatmul.f32.gmra.mxu2 %v3691_v3  ;;  %2571 = vmatpush.msrb.mxu1 %v2570_v55  ;;  %v2771_v3 = vsub.f32 %v4394_v53, %v2770_v24 }
 0x1ed   : > { %2514 = vmatpush.msrb.mxu0 %v4336_v26  ;;  %2604 = vmatpush.msrb.mxu2 %v4369_v5 }
 0x1ee   : > { %2361 = vmatmul.f32.gmra.mxu3 %v3594_v28  ;;  %v2772_v45 = vand.u32 4294901760, %v2771_v3 }
 0x1ef   : > { %2516 = vmatpush.msrb.mxu0 %v4352_v7  ;;  %2635 = vmatpush.msrb.mxu3 %v4364_v23 }
 0x1f1   : > { %2518 = vmatpush.msrb.mxu0 %v4364_v23 }
 0x1f2   : > { %2232 = vmatmul.f32.gmra.mxu0 %v4321_v16  ;;  %2423 = vmatmul.f32.vlgmr.msra.gmra.mxu1 %v3612_v38  ;;  %v2790_v38 = vand.u32 4294901760, %v2789_v2  ;;  %v4663_v16 = vld [vmem:[#allocation17_spill] sm:$0xff] }
 0x1f3   : > { %2699 = vmatpush.msra.mxu1 %v4319_v25  ;;  %v4662_v25 = vld [vmem:[#allocation18_spill] sm:$0xff] }
 0x1f4   : > { %2462 = vmatmul.f32.vlgmr.msra.gmra.mxu2 %v3592_v27 }
 0x1f5   : > { %2732 = vmatpush.msra.mxu2 %v4386_v54  ;;  %2701 = vmatpush.msra.mxu1 %v4336_v26 }
 0x1f6   : > { %2491 = vmatmul.f32.vlgmr.msra.gmra.mxu3 %v3592_v27  ;;  %v4652_v27 = vld [vmem:[#allocation8_spill] sm:$0xff] }
 0x1f7   : > { %2773 = vmatpush.msra.mxu3 %v2772_v45  ;;  %2734 = vmatpush.msra.mxu2 %v4396_v39 }
 0x1f8   : > { %2703 = vmatpush.msra.mxu1 %v4352_v7 }
 0x1f9   : > { %2779 = vmatpush.msra.mxu3 %v2778_v0  ;;  %2736 = vmatpush.msra.mxu2 %v4409_v19 }
 0x1fa   : > { %2391 = vmatmul.f32.vlgmr.msra.gmra.mxu0 %v3600_v34  ;;  %2429 = vmatmul.f32.gmra.mxu1 %v3625_v43  ;;  %v4653_v34 = vld [vmem:[#allocation9_spill] sm:$0xff]  ;;  %v4656_v43 = vld [vmem:[#allocation11_spill] sm:$0xff] }
 0x1fb   : > { %2664 = vmatpush.msra.mxu0 %v2550_v8  ;;  %2785 = vmatpush.msra.mxu3 %v2784_v49 }
 0x1fc   : > { %2466 = vmatmul.f32.gmra.mxu2 %v3594_v28  ;;  %2705 = vmatpush.msra.mxu1 %v4364_v23 }
 0x1fd   : > { %2668 = vmatpush.msra.mxu0 %v2556_v31  ;;  %2738 = vmatpush.msra.mxu2 %v2737_v6 }
 0x1fe   : > { %2495 = vmatmul.f32.gmra.mxu3 %v3594_v28  ;;  %v4654_v28 = vld [vmem:[#allocation12_spill] sm:$0xff] }
 0x1ff   : > { %2672 = vmatpush.msra.mxu0 %v2562_v52  ;;  %2791 = vmatpush.msra.mxu3 %v2790_v38 }
 0x201   : > { %2676 = vmatpush.msra.mxu0 %v2568_v11 }
 0x202   : > { %2396 = vmatmul.f32.gmra.mxu0 %v3604_v35  ;;  %2573 = vmatmul.f32.vlgmr.msrb.gmra.mxu1 %v3606_v37  ;;  %v4655_v35 = vld [vmem:[#allocation10_spill] sm:$0xff] }
 0x203   : > { %2849 = vmatpush.msrb.mxu1 %v4386_v54 }
 0x204   : > { %2607 = vmatmul.f32.vlgmr.msrb.gmra.mxu2 %v4652_v27 }
 0x205   : > { %2884 = vmatpush.msrb.mxu2 %v2770_v24  ;;  %2851 = vmatpush.msrb.mxu1 %v4396_v39 }
 0x206   : > { %2639 = vmatmul.f32.vlgmr.msrb.gmra.mxu3 %v4653_v34 }
 0x207   : > { %2919 = vmatpush.msrb.mxu3 %v4386_v54  ;;  %2888 = vmatpush.msrb.mxu2 %v2776_v42 }
 0x208   : > { %2853 = vmatpush.msrb.mxu1 %v4409_v19 }
 0x209   : > { %2921 = vmatpush.msrb.mxu3 %v4396_v39  ;;  %2892 = vmatpush.msrb.mxu2 %v2782_v40 }
 0x20a   : > { %2524 = vmatmul.f32.vlgmr.msrb.gmra.mxu0 %v4654_v28  ;;  %2577 = vmatmul.f32.gmra.mxu1 %v4655_v35 }
 0x20b   : > { %2815 = vmatpush.msrb.mxu0 %v4394_v53  ;;  %2923 = vmatpush.msrb.mxu3 %v4409_v19 }
 0x20c   : > { %2612 = vmatmul.f32.gmra.mxu2 %v4656_v43  ;;  %2855 = vmatpush.msrb.mxu1 %v2737_v6 }
 0x20d   : > { %2818 = vmatpush.msrb.mxu0 %v4407_v59  ;;  %2896 = vmatpush.msrb.mxu2 %v2788_v12 }
 0x20e   : > { %2645 = vmatmul.f32.gmra.mxu3 %v4657_v46 }
 0x20f   : > { %2821 = vmatpush.msrb.mxu0 %v2781_v63  ;;  %2925 = vmatpush.msrb.mxu3 %v2737_v6 }
 0x211   : > { %2824 = vmatpush.msrb.mxu0 %v2787_v22 }
 0x212   : > { %2532 = vmatmul.f32.gmra.mxu0 %v4658_v50  ;;  %2707 = vmatmul.f32.vlgmr.msra.gmra.mxu1 %v3606_v37 }
 0x214   : > { %2744 = vmatmul.f32.vlgmr.msra.gmra.mxu2 %v4659_v4 }
 0x216   : > { %2793 = vmatmul.f32.vlgmr.msra.gmra.mxu3 %v4660_v30 }
 0x21a   : > { %2678 = vmatmul.f32.vlgmr.msra.gmra.mxu0 %v3606_v37  ;;  %2711 = vmatmul.f32.gmra.mxu1 %v4655_v35  ;;  %v4666_v37 = vld [vmem:[#allocation19_spill] sm:$0xff] }
 0x21c   : > { %2752 = vmatmul.f32.gmra.mxu2 %v4661_v47 }
 0x21e   : > { %2797 = vmatmul.f32.gmra.mxu3 %v4662_v25 }
 0x222   : > { %2682 = vmatmul.f32.gmra.mxu0 %v4655_v35  ;;  %2859 = vmatmul.f32.vlgmr.msrb.gmra.mxu1 %v4663_v16 }
 0x224   : > { %2898 = vmatmul.f32.vlgmr.msrb.gmra.mxu2 %v4660_v30 }
 0x226   : > { %2927 = vmatmul.f32.vlgmr.msrb.gmra.mxu3 %v4660_v30 }
 0x22a   : > { %2827 = vmatmul.f32.vlgmr.msrb.gmra.mxu0 %v4664_v29  ;;  %2865 = vmatmul.f32.gmra.mxu1 %v4665_v56 }
 0x22c   : > { %2902 = vmatmul.f32.gmra.mxu2 %v4662_v25 }
 0x22e   : > { %2931 = vmatmul.f32.gmra.mxu3 %v4662_v25 }
 0x232   : > { %2832 = vmatmul.f32.gmra.mxu0 %v4666_v37 }
 0x24f   : > { %v2076_v17 = vpop.f32.mrf.mxu1 }
 0x257   : > { %v1987_v8 = vpop.f32.mrf.mxu0  ;;  %v2080_v26 = vpop.f32.mrf.mxu1 }
 0x258   : > { %v1988_v41 = vadd.f32 %v3114_v21, %v1987_v8  ;;  %v2126_v51 = vpop.f32.mrf.mxu2 }
 0x259   : > { %v2166_v15 = vpop.f32.mrf.mxu3 }
 0x25a   : > { %v2077_v32 = vadd.f32 %v2076_v17, %v1988_v41 }
 0x25c   : > { %v2127_v33 = vadd.f32 %v2126_v51, %v2077_v32 }
 0x25e   : > { %v2167_v36 = vadd.f32 %v2166_v15, %v2127_v33 }
 0x25f   : > { %v1995_v31 = vpop.f32.mrf.mxu0  ;;  %v2266_v7 = vpop.f32.mrf.mxu1 }
 0x260   : > { %v1996_v48 = vadd.f32 %v3114_v21, %v1995_v31  ;;  %v2131_v20 = vpop.f32.mrf.mxu2 }
 0x261   : > { %v2172_v1 = vpop.f32.mrf.mxu3 }
 0x262   : > { %v2081_v14 = vadd.f32 %v2080_v26, %v1996_v48 }
 0x264   : > { %v2132_v23 = vadd.f32 %v2131_v20, %v2081_v14 }
 0x266   : > { %v2173_v61 = vadd.f32 %v2172_v1, %v2132_v23 }
 0x267   : > { %v2229_v52 = vpop.f32.mrf.mxu0  ;;  %v2270_v5 = vpop.f32.mrf.mxu1 }
 0x268   : > { %v2230_v57 = vadd.f32 %v2229_v52, %v2167_v36  ;;  %v2309_v11 = vpop.f32.mrf.mxu2 }
 0x269   : > { %v2358_v9 = vpop.f32.mrf.mxu3 }
 0x26a   : > { %v4484_v44 = vadd.f32 %v2266_v7, %v2230_v57  ;;  %v2359_v45 = vadd.f32 %v2358_v9, %v2309_v11 }
 0x26f   : > { %v2233_v54 = vpop.f32.mrf.mxu0  ;;  %v2424_v62 = vpop.f32.mrf.mxu1 }
 0x270   : > { %v2234_v60 = vadd.f32 %v2233_v54, %v2173_v61  ;;  %v2317_v53 = vpop.f32.mrf.mxu2  ;;  %v3191_v54 = vmov 16.0  }
 0x271   : > { %v2362_v39 = vpop.f32.mrf.mxu3  ;;  %3124 = vrcp.f32 %v3191_v54 }
 0x272   : > { %v4486_v55 = vadd.f32 %v2270_v5, %v2234_v60  ;;  %v2363_v38 = vadd.f32 %v2362_v39, %v2317_v53  ;;  %v3115_v53 = vld [vmem:[%s4550_s23] ss:$0 sm:$0xff] }
 0x277   : > { %v2392_v58 = vpop.f32.mrf.mxu0  ;;  %v2430_v24 = vpop.f32.mrf.mxu1 }
 0x278   : > { %v2463_v59 = vpop.f32.mrf.mxu2  ;;  %v2393_v12 = vadd.f32 %v2392_v58, %v2359_v45 }
 0x279   : > { %v2492_v19 = vpop.f32.mrf.mxu3 }
 0x27a   : > { %v2425_v27 = vadd.f32 %v2424_v62, %v2393_v12 }
 0x27c   : > { %v2464_v35 = vadd.f32 %v2463_v59, %v2425_v27 }
 0x27e   : > { %v2493_v30 = vadd.f32 %v2492_v19, %v2464_v35 }
 0x27f   : > { %v2397_v13 = vpop.f32.mrf.mxu0  ;;  %v2574_v42 = vpop.f32.mrf.mxu1 }
 0x280   : > { %v2467_v63 = vpop.f32.mrf.mxu2  ;;  %v2398_v34 = vadd.f32 %v2397_v13, %v2363_v38 }
 0x281   : > { %v2496_v6 = vpop.f32.mrf.mxu3 }
 0x282   : > { %v2431_v50 = vadd.f32 %v2430_v24, %v2398_v34 }
 0x284   : > { %v2468_v47 = vadd.f32 %v2467_v63, %v2431_v50  ;;  %v2273_v63 = vmax.f32 %v4484_v44, 0.0 }
 0x286   : > { %v2497_v37 = vadd.f32 %v2496_v6, %v2468_v47 }
 0x287   : > { %v2525_v3 = vpop.f32.mrf.mxu0  ;;  %v2578_v40 = vpop.f32.mrf.mxu1 }
 0x288   : > { %v2608_v22 = vpop.f32.mrf.mxu2  ;;  %v2526_v25 = vadd.f32 %v2525_v3, %v2493_v30  ;;  %v2274_v3 = vmax.f32 %v4486_v55, 0.0 }
 0x289   : > { %v2640_v18 = vpop.f32.mrf.mxu3 }
 0x28a   : > { %v2575_v17 = vadd.f32 %v2574_v42, %v2526_v25  ;;  %v3125_v42 = vpop.eup %3124 }
 0x28b   : > { %vm2959_vm13 = vweird.f32 %v3125_v42 }
 0x28c   : > { %v2609_v26 = vadd.f32 %v2608_v22, %v2575_v17 }
 0x28e   : > { %v2641_v31 = vadd.f32 %v2640_v18, %v2609_v26  ;;  %v2955_v18 = vmul.f32 16.0, %v3125_v42 }
 0x28f   : > { %v2533_v10 = vpop.f32.mrf.mxu0  ;;  %v2708_v2 = vpop.f32.mrf.mxu1 }
 0x290   : > { %v2613_v0 = vpop.f32.mrf.mxu2  ;;  %v2534_v21 = vadd.f32 %v2533_v10, %v2497_v37 }
 0x291   : > { %v2646_v49 = vpop.f32.mrf.mxu3 }
 0x292   : > { %v2579_v15 = vadd.f32 %v2578_v40, %v2534_v21 }
 0x294   : > { %v2614_v48 = vadd.f32 %v2613_v0, %v2579_v15  ;;  %v2956_v0 = vsub.f32 1.0, %v2955_v18 }
 0x296   : > { %v2647_v5 = vadd.f32 %v2646_v49, %v2614_v48  ;;  %v2957_v38 = vmul.f32 %v3125_v42, %v2956_v0 }
 0x297   : > { %v2679_v28 = vpop.f32.mrf.mxu0  ;;  %v2712_v4 = vpop.f32.mrf.mxu1 }
 0x298   : > { %v2745_v43 = vpop.f32.mrf.mxu2  ;;  %v2680_v20 = vadd.f32 %v2679_v28, %v2641_v31  ;;  %v2958_v44 = vadd.f32 %v3125_v42, %v2957_v38 }
 0x299   : > { %v2794_v46 = vpop.f32.mrf.mxu3 }
 0x29a   : > { %v2795_v41 = vadd.f32 %v2794_v46, %v2745_v43  ;;  %v2709_v57 = vadd.f32 %v2708_v2, %v2680_v20  ;;  %v2960_v35 = vsel %vm2959_vm13, %v3125_v42, %v2958_v44 }
 0x29f   : > { %v2683_v16 = vpop.f32.mrf.mxu0  ;;  %v2860_v8 = vpop.f32.mrf.mxu1 }
 0x2a0   : > { %v2753_v29 = vpop.f32.mrf.mxu2  ;;  %v2684_v62 = vadd.f32 %v2683_v16, %v2647_v5 }
 0x2a1   : > { %v2798_v56 = vpop.f32.mrf.mxu3 }
 0x2a2   : > { %v2799_v14 = vadd.f32 %v2798_v56, %v2753_v29  ;;  %v2713_v59 = vadd.f32 %v2712_v4, %v2684_v62 }
 0x2a7   : > { %v2828_v51 = vpop.f32.mrf.mxu0  ;;  %v2866_v52 = vpop.f32.mrf.mxu1 }
 0x2a8   : > { %v2829_v32 = vadd.f32 %v2828_v51, %v2795_v41  ;;  %v2899_v33 = vpop.f32.mrf.mxu2 }
 0x2a9   : > { %v2928_v36 = vpop.f32.mrf.mxu3 }
 0x2aa   : > { %v2861_v7 = vadd.f32 %v2860_v8, %v2829_v32 }
 0x2ac   : > { %v2900_v1 = vadd.f32 %v2899_v33, %v2861_v7 }
 0x2ae   : > { %v2929_v23 = vadd.f32 %v2928_v36, %v2900_v1 }
 0x2af   : > { %v2833_v61 = vpop.f32.mrf.mxu0 }
 0x2b0   : > { %v2834_v11 = vadd.f32 %v2833_v61, %v2799_v14  ;;  %v2903_v9 = vpop.f32.mrf.mxu2  ;;  %v2935_v60 = vadd.f32 %v2929_v23, %v2709_v57 }
 0x2b1   : > { %v2932_v58 = vpop.f32.mrf.mxu3 }
 0x2b2   : > { %v2867_v39 = vadd.f32 %v2866_v52, %v2834_v11  ;;  %v2941_v19 = vadd.f32 %v3115_v53, %v2935_v60 }
 0x2b4   : > { %v2904_v24 = vadd.f32 %v2903_v9, %v2867_v39  ;;  %v2943_v40 = vadd.f32 %v2941_v19, %v2273_v63 }
 0x2b6   : > { %v2933_v13 = vadd.f32 %v2932_v58, %v2904_v24  ;;  %v2945_v10 = vsel %vm1602_vm12, %v2943_v40, 0.0 }
 0x2b8   : > { %v2936_v6 = vadd.f32 %v2933_v13, %v2713_v59 }
 0x2ba   : > { %v2942_v22 = vadd.f32 %v3115_v53, %v2936_v6 }
 0x2bc   : > { %v2944_v45 = vadd.f32 %v2942_v22, %v2274_v3 }
 0x2be   : > { %v2946_v12 = vsel %vm1602_vm12, %v2944_v45, 0.0 }
 0x2bf   : > { %v2947_v49 = vadd.f32 %v2946_v12, %v2945_v10 }
 0x2c1   : > { %v2948_v2 = vrot.slane %v2947_v49, 4 }
 0x2c3   : > { %v2949_v27 = vadd.f32 %v2948_v2, %v2947_v49 }
 0x2c5   : > { %v2950_v34 = vrot.slane %v2949_v27, 2 }
 0x2c7   : > { %v2951_v28 = vadd.f32 %v2950_v34, %v2949_v27 }
 0x2c9   : > { %v2952_v55 = vrot.slane %v2951_v28, 1 }
 0x2cb   : > { %v2953_v43 = vadd.f32 %v2952_v55, %v2951_v28 }
 0x2cd   : > { %v2961_v46 = vmul.f32 %v2960_v35, %v2953_v43 }
 0x2cf   : > { %2963 = vst.msk [vmem:[%s759_s2] sm:$0x1] %vm2962_vm14, %v2961_v46 }
 0x2d0   : > { %3153 = shalt.err (!%p3150_p3)
}
 0x2d1   : > { %3071 = dma.vmem_to_hbm [thread:$0]  (%p3355_p5), %s2976_s27, 16, %s2978_s0, %s2965_s7  }
 0x2d2 PF: > { %p3077_p4 = scmp.ge.s32.totalorder %s3188_s28, 2  ;;  %s2989_s13 = sand.u32 1, %s3176_s5  }
 0x2d3   : > { %s2990_s2 = scalar_lea.sflag [#allocation3], %s2989_s13 }
 0x2d4   : > { %p3074_p7 = pnand %p3077_p4, %p3359_p6 }
 0x2d6   : > { %p3075_p8 = pneg %p3074_p7 }
 0x2d8   : > { %3171 = dma.done.wait (%p3075_p8), %s2990_s2, 16  }
 0x2d9   : > { %3173 = vsyncadd (%p3075_p8), %s2990_s2, 4294967280  ;;  %s4667_s28 = sld [smem:[#allocation6_spill]]  ;;  %s4670_s5 = smov %s3180_s26 }
 0x2da   : > { %s4668_s9 = sld [smem:[#allocation5_spill]] }
 0x2db   : > { %s4669_s27 = sld [smem:[#allocation7_spill]] }
 0x2df   : > { %p34_p9 = scmp.ge.s32.totalorder %s4667_s28, 4  }
 0x2e0   : > { %s4671_s26 = smov %s4668_s9 }
 0x2e1   :  { %36 = sbr.rel (!%p34_p9) target bundleno = 16 (0x10), region = 157 }
 0x2e6   :  { %2995 = vsyncpa [#allocation3], 1 }
 0x2e7   :  { %2997 = vsyncpa [#allocation3 + $0x1], 1 }

</bundles_post_ra>
